<compile_context>
chip_gen: v7x
topology: tpu7x:2x2x1
jax: 0.10.0
libtpu: 0.0.40
codegen_flags: <defaults>
</compile_context>

<pallas_src>
import jax
import jax.numpy as jnp
from jax.experimental import pallas as pl
from jax.experimental.pallas import tpu as pltpu

# ---------------- module hyper-parameters (match KANLinear defaults) ----------
IN_FEATURES = 32
OUT_FEATURES = 32
GRID_SIZE = 5
SPLINE_ORDER = 3
GRID_RANGE = (-1.0, 1.0)

K = GRID_SIZE + SPLINE_ORDER            # number of B-spline basis functions = 8
G = GRID_SIZE + 2 * SPLINE_ORDER + 1    # number of grid knots per feature    = 12
N_DEN = 2 * sum(G - 1 - k for k in range(1, SPLINE_ORDER + 1))  # = 54 reciprocal cols
K_TOTAL = (K + 1) * IN_FEATURES         # fused contraction length            = 288

BATCH = 512
TILE_B = 128


# ---------------------------- Pallas kernel -----------------------------------
def kan_linear_kernel(x_ref, g_ref, invd_ref, w_ref, o_ref, lhs_ref):
    # x_ref:    (IN, TB)       feature-major input tile (batch on the lane axis)
    # g_ref:    (IN, G)        per-feature B-spline knots (PyTorch buffer layout)
    # invd_ref: (IN, N_DEN)    precomputed [1/left_den, -1/right_den] columns
    # w_ref:    (OUT, K_TOTAL) fused [base_weight | scaled_spline_weight_k for k]
    # o_ref:    (OUT, TB)      lane-dense output tile
    # lhs_ref:  (K_TOTAL, TB)  VMEM scratch holding [SiLU(x); bases_0..bases_{K-1}]
    x = x_ref[...]                                      # (IN, TB) f32

    # ---- base path: SiLU(x) into slab 0 (sublane offset 0, aligned) ----
    lhs_ref[0:IN_FEATURES, :] = x * jax.nn.sigmoid(x)

    # per-feature knot columns, broadcast along the (batch) lane axis
    knots = [g_ref[:, j:j + 1] for j in range(G)]       # each (IN, 1)

    # ---- degree-0 bases: same interval test as the reference ----
    bases = [
        jnp.logical_and(x >= knots[j], x < knots[j + 1]).astype(jnp.float32)
        for j in range(G - 1)
    ]

    # ---- Cox-de Boor recursion, statically unrolled; divides replaced by
    #      precomputed reciprocals (right reciprocal pre-negated); (x - knot)
    #      numerators are recomputed per level instead of kept live ----
    d = 0
    for k in range(1, SPLINE_ORDER + 1):
        new_bases = []
        for j in range(len(bases) - 1):
            inv_l = invd_ref[:, d:d + 1]        #  1 / (knot(j+k)   - knot(j))
            inv_rn = invd_ref[:, d + 1:d + 2]   # -1 / (knot(j+k+1) - knot(j+1))
            d += 2
            left = (x - knots[j]) * inv_l * bases[j]
            right = (x - knots[j + k + 1]) * inv_rn * bases[j + 1]
            new_bases.append(left + right)
        bases = new_bases
    # len(bases) == K; bases[k][i, b] == b_splines(x)[b, i, k]

    # ---- spline slabs at sublane-aligned offsets (multiples of IN = 32) ----
    for kb in range(K):
        lo = (1 + kb) * IN_FEATURES
        lhs_ref[lo:lo + IN_FEATURES, :] = bases[kb]

    # ---- single fused MXU matmul, lane-dense (OUT, TB) result ----
    # TODO(synk): K_TOTAL=288 is not a multiple of the 256-wide MXU tile; padding is
    # left implicit because the matmul is ~9 MFLOP/tile and off the critical path.
    o_ref[...] = jnp.dot(w_ref[...], lhs_ref[...],
                         preferred_element_type=jnp.float32)


# ---------------------------- wrapper ------------------------------------------
def kan_linear_forward(x, grid, base_weight, spline_weight, spline_scaler,
                       *, tile_b=TILE_B):
    """Parameter prep / layout plumbing in plain JAX, hot path in Pallas."""
    B, IN = x.shape
    OUT = base_weight.shape[0]

    # Fused weight (OUT, (K+1)*IN): [base_weight | (spline_weight*scaler)[:,:,k] for k]
    sw_scaled = spline_weight * spline_scaler[:, :, None]                 # (OUT, IN, K)
    w_fused = jnp.concatenate(
        [base_weight] + [sw_scaled[:, :, k] for k in range(K)], axis=1)   # (OUT, K_TOTAL)

    # x-independent reciprocal knot denominators, (IN, N_DEN); right one pre-negated.
    # TODO(synk): assumes strictly increasing knots per feature (standard KANLinear grid);
    # repeated knots would give inf*0 here vs 0/0 in the torch reference.
    cols = []
    for k in range(1, SPLINE_ORDER + 1):
        for j in range(G - 1 - k):
            cols.append(1.0 / (grid[:, j + k] - grid[:, j]))
            cols.append(-1.0 / (grid[:, j + k + 1] - grid[:, j + 1]))
    inv_den = jnp.stack(cols, axis=1).astype(jnp.float32)                 # (IN, N_DEN)

    # Pad the batch (lane axis after transpose) to a multiple of tile_b, never collapse.
    b_pad = ((B + tile_b - 1) // tile_b) * tile_b
    if b_pad != B:
        x = jnp.pad(x, ((0, b_pad - B), (0, 0)))
    x_t = jnp.transpose(x)                                                # (IN, b_pad)

    out_t = pl.pallas_call(
        kan_linear_kernel,
        out_shape=jax.ShapeDtypeStruct((OUT, b_pad), jnp.float32),
        grid=(b_pad // tile_b,),
        in_specs=[
            pl.BlockSpec((IN, tile_b), lambda i: (0, i)),
            pl.BlockSpec((IN, G), lambda i: (0, 0)),
            pl.BlockSpec((IN, N_DEN), lambda i: (0, 0)),
            pl.BlockSpec((OUT, K_TOTAL), lambda i: (0, 0)),
        ],
        out_specs=pl.BlockSpec((OUT, tile_b), lambda i: (0, i)),
        scratch_shapes=[pltpu.VMEM((K_TOTAL, tile_b), jnp.float32)],
        compiler_params=pltpu.CompilerParams(
            dimension_semantics=("parallel",)),
    )(x_t, grid.astype(jnp.float32), inv_den, w_fused.astype(jnp.float32))

    return jnp.transpose(out_t)[:B]                                       # (B, OUT)


def kan_block_forward(*inputs, grid, base_weight, spline_weight, spline_scaler):
    """Block.forward semantics: concat multiple inputs along the last dim, then block_eval."""
    x = inputs[0] if len(inputs) == 1 else jnp.concatenate(inputs, axis=-1)
    return kan_linear_forward(x, grid, base_weight, spline_weight, spline_scaler)


# ---------------------------- pure-JAX reference ------------------------------
def b_splines_ref(x, grid):
    # x: (B, IN), grid: (IN, G) -> (B, IN, K)
    xe = x[:, :, None]                                                    # (B, IN, 1)
    bases = ((xe >= grid[:, :-1]) & (xe < grid[:, 1:])).astype(x.dtype)
    for k in range(1, SPLINE_ORDER + 1):
        bases = ((xe - grid[:, :-(k + 1)]) / (grid[:, k:-1] - grid[:, :-(k + 1)]) * bases[:, :, :-1]
                 + (grid[:, k + 1:] - xe) / (grid[:, k + 1:] - grid[:, 1:-k]) * bases[:, :, 1:])
    return bases


def kan_linear_ref(x, grid, base_weight, spline_weight, spline_scaler):
    silu = x * jax.nn.sigmoid(x)
    base_out = silu @ base_weight.T
    bsp = b_splines_ref(x, grid).reshape(x.shape[0], -1)                  # (B, IN*K)
    sw = (spline_weight * spline_scaler[:, :, None]).reshape(OUT_FEATURES, -1)
    return base_out + bsp @ sw.T


# ---------------------------------- main ---------------------------------------
if __name__ == "__main__":
    key = jax.random.PRNGKey(0)
    k_bw, k_sw, k_sc, k_x = jax.random.split(key, 4)

    # Deterministic synthetic parameters (shapes match KANLinear.__init__).
    # TODO(synk): reset_parameters uses torch lstsq-based curve2coeff init; we use
    # deterministic random values of the same shapes (forward semantics unaffected).
    base_weight = jax.random.uniform(
        k_bw, (OUT_FEATURES, IN_FEATURES), minval=-1.0, maxval=1.0,
        dtype=jnp.float32) / jnp.sqrt(jnp.float32(IN_FEATURES))
    spline_weight = jax.random.uniform(
        k_sw, (OUT_FEATURES, IN_FEATURES, K), minval=-1.0, maxval=1.0,
        dtype=jnp.float32) * 0.1
    spline_scaler = jax.random.uniform(
        k_sc, (OUT_FEATURES, IN_FEATURES), minval=-1.0, maxval=1.0,
        dtype=jnp.float32) / jnp.sqrt(jnp.float32(IN_FEATURES))

    # Grid buffer (PyTorch layout (IN, G)): arange(-so, gs+so+1)*h + grid_range[0].
    h = (GRID_RANGE[1] - GRID_RANGE[0]) / GRID_SIZE
    knots = jnp.arange(-SPLINE_ORDER, GRID_SIZE + SPLINE_ORDER + 1,
                       dtype=jnp.float32) * h + GRID_RANGE[0]             # (G,)
    grid = jnp.broadcast_to(knots[None, :], (IN_FEATURES, G)).astype(jnp.float32)

    # Input (mostly inside grid_range so splines are active).
    x = jax.random.normal(k_x, (BATCH, IN_FEATURES), dtype=jnp.float32) * 0.7

    # Exercise Block.forward multi-input concat: split x into two halves.
    x1, x2 = x[:, :IN_FEATURES // 2], x[:, IN_FEATURES // 2:]
    out = kan_block_forward(x1, x2, grid=grid, base_weight=base_weight,
                            spline_weight=spline_weight, spline_scaler=spline_scaler)
    out = jax.block_until_ready(out)

    ref = kan_linear_ref(x, grid, base_weight, spline_weight, spline_scaler)
    assert out.shape == (BATCH, OUT_FEATURES)
    assert jnp.allclose(out, ref, atol=1e-4, rtol=1e-4), (
        f"max abs err = {jnp.max(jnp.abs(out - ref))}")

    print("KERNEL_OK")
</pallas_src>

<mosaic_0001>
module attributes {stable_mosaic.version = 11 : i64} {
  func.func @kan_linear_kernel(%arg0: i32, %arg1: memref<32x128xf32, #tpu.memory_space<vmem>>, %arg2: memref<32x12xf32, #tpu.memory_space<vmem>>, %arg3: memref<32x54xf32, #tpu.memory_space<vmem>>, %arg4: memref<32x288xf32, #tpu.memory_space<vmem>>, %arg5: memref<32x128xf32, #tpu.memory_space<vmem>>, %arg6: memref<288x128xf32, #tpu.memory_space<vmem>>) attributes {dimension_semantics = [#tpu.dimension_semantics<parallel>], iteration_bounds = array<i64: 4>, scalar_prefetch = 0 : i64, scratch_operands = 1 : i64, tpu.core_type = #tpu.core_type<tc>, window_params = [{transform_indices = @transform_0, window_bounds = array<i64: 32, 128>}, {pipeline_mode = #tpu.pipeline_mode<synchronous>, transform_indices = @transform_1, window_bounds = array<i64: 32, 12>}, {pipeline_mode = #tpu.pipeline_mode<synchronous>, transform_indices = @transform_2, window_bounds = array<i64: 32, 54>}, {pipeline_mode = #tpu.pipeline_mode<synchronous>, transform_indices = @transform_3, window_bounds = array<i64: 32, 288>}, {transform_indices = @transform_4, window_bounds = array<i64: 32, 128>}]} {
    %c0 = arith.constant 0 : index
    %c0_0 = arith.constant 0 : index
    %0 = vector.load %arg1[%c0, %c0_0] : memref<32x128xf32, #tpu.memory_space<vmem>>, vector<32x128xf32>
    %1 = arith.negf %0 : vector<32x128xf32>
    %2 = math.exp %1 : vector<32x128xf32>
    %cst = arith.constant 1.000000e+00 : f32
    %3 = vector.broadcast %cst : f32 to vector<32x128xf32>
    %4 = arith.addf %3, %2 : vector<32x128xf32>
    %5 = arith.divf %3, %4 : vector<32x128xf32>
    %6 = arith.mulf %0, %5 : vector<32x128xf32>
    %c0_1 = arith.constant 0 : index
    %c0_2 = arith.constant 0 : index
    %7 = vector.load %arg6[%c0_1, %c0_2] : memref<288x128xf32, #tpu.memory_space<vmem>>, vector<32x128xf32>
    tpu.vector_store %arg6[%c0_1, %c0_2], %6 {strides = array<i32>} : memref<288x128xf32, #tpu.memory_space<vmem>>, vector<32x128xf32>,
    %c0_3 = arith.constant 0 : index
    %c0_4 = arith.constant 0 : index
    %8 = vector.load %arg2[%c0_3, %c0_4] : memref<32x12xf32, #tpu.memory_space<vmem>>, vector<32x1xf32>
    %c0_5 = arith.constant 0 : index
    %c1 = arith.constant 1 : index
    %9 = vector.load %arg2[%c0_5, %c1] : memref<32x12xf32, #tpu.memory_space<vmem>>, vector<32x1xf32>
    %c0_6 = arith.constant 0 : index
    %c2 = arith.constant 2 : index
    %10 = vector.load %arg2[%c0_6, %c2] : memref<32x12xf32, #tpu.memory_space<vmem>>, vector<32x1xf32>
    %c0_7 = arith.constant 0 : index
    %c3 = arith.constant 3 : index
    %11 = vector.load %arg2[%c0_7, %c3] : memref<32x12xf32, #tpu.memory_space<vmem>>, vector<32x1xf32>
    %c0_8 = arith.constant 0 : index
    %c4 = arith.constant 4 : index
    %12 = vector.load %arg2[%c0_8, %c4] : memref<32x12xf32, #tpu.memory_space<vmem>>, vector<32x1xf32>
    %c0_9 = arith.constant 0 : index
    %c5 = arith.constant 5 : index
    %13 = vector.load %arg2[%c0_9, %c5] : memref<32x12xf32, #tpu.memory_space<vmem>>, vector<32x1xf32>
    %c0_10 = arith.constant 0 : index
    %c6 = arith.constant 6 : index
    %14 = vector.load %arg2[%c0_10, %c6] : memref<32x12xf32, #tpu.memory_space<vmem>>, vector<32x1xf32>
    %c0_11 = arith.constant 0 : index
    %c7 = arith.constant 7 : index
    %15 = vector.load %arg2[%c0_11, %c7] : memref<32x12xf32, #tpu.memory_space<vmem>>, vector<32x1xf32>
    %c0_12 = arith.constant 0 : index
    %c8 = arith.constant 8 : index
    %16 = vector.load %arg2[%c0_12, %c8] : memref<32x12xf32, #tpu.memory_space<vmem>>, vector<32x1xf32>
    %c0_13 = arith.constant 0 : index
    %c9 = arith.constant 9 : index
    %17 = vector.load %arg2[%c0_13, %c9] : memref<32x12xf32, #tpu.memory_space<vmem>>, vector<32x1xf32>
    %c0_14 = arith.constant 0 : index
    %c10 = arith.constant 10 : index
    %18 = vector.load %arg2[%c0_14, %c10] : memref<32x12xf32, #tpu.memory_space<vmem>>, vector<32x1xf32>
    %c0_15 = arith.constant 0 : index
    %c11 = arith.constant 11 : index
    %19 = vector.load %arg2[%c0_15, %c11] : memref<32x12xf32, #tpu.memory_space<vmem>>, vector<32x1xf32>
    %20 = vector.broadcast %8 : vector<32x1xf32> to vector<32x128xf32>
    %21 = arith.cmpf oge, %0, %20 : vector<32x128xf32>
    %22 = vector.broadcast %9 : vector<32x1xf32> to vector<32x128xf32>
    %23 = arith.cmpf olt, %0, %22 : vector<32x128xf32>
    %24 = arith.andi %21, %23 : vector<32x128xi1>
    %25 = arith.extui %24 : vector<32x128xi1> to vector<32x128xi32>
    %26 = arith.sitofp %25 : vector<32x128xi32> to vector<32x128xf32>
    %27 = vector.broadcast %9 : vector<32x1xf32> to vector<32x128xf32>
    %28 = arith.cmpf oge, %0, %27 : vector<32x128xf32>
    %29 = vector.broadcast %10 : vector<32x1xf32> to vector<32x128xf32>
    %30 = arith.cmpf olt, %0, %29 : vector<32x128xf32>
    %31 = arith.andi %28, %30 : vector<32x128xi1>
    %32 = arith.extui %31 : vector<32x128xi1> to vector<32x128xi32>
    %33 = arith.sitofp %32 : vector<32x128xi32> to vector<32x128xf32>
    %34 = vector.broadcast %10 : vector<32x1xf32> to vector<32x128xf32>
    %35 = arith.cmpf oge, %0, %34 : vector<32x128xf32>
    %36 = vector.broadcast %11 : vector<32x1xf32> to vector<32x128xf32>
    %37 = arith.cmpf olt, %0, %36 : vector<32x128xf32>
    %38 = arith.andi %35, %37 : vector<32x128xi1>
    %39 = arith.extui %38 : vector<32x128xi1> to vector<32x128xi32>
    %40 = arith.sitofp %39 : vector<32x128xi32> to vector<32x128xf32>
    %41 = vector.broadcast %11 : vector<32x1xf32> to vector<32x128xf32>
    %42 = arith.cmpf oge, %0, %41 : vector<32x128xf32>
    %43 = vector.broadcast %12 : vector<32x1xf32> to vector<32x128xf32>
    %44 = arith.cmpf olt, %0, %43 : vector<32x128xf32>
    %45 = arith.andi %42, %44 : vector<32x128xi1>
    %46 = arith.extui %45 : vector<32x128xi1> to vector<32x128xi32>
    %47 = arith.sitofp %46 : vector<32x128xi32> to vector<32x128xf32>
    %48 = vector.broadcast %12 : vector<32x1xf32> to vector<32x128xf32>
    %49 = arith.cmpf oge, %0, %48 : vector<32x128xf32>
    %50 = vector.broadcast %13 : vector<32x1xf32> to vector<32x128xf32>
    %51 = arith.cmpf olt, %0, %50 : vector<32x128xf32>
    %52 = arith.andi %49, %51 : vector<32x128xi1>
    %53 = arith.extui %52 : vector<32x128xi1> to vector<32x128xi32>
    %54 = arith.sitofp %53 : vector<32x128xi32> to vector<32x128xf32>
    %55 = vector.broadcast %13 : vector<32x1xf32> to vector<32x128xf32>
    %56 = arith.cmpf oge, %0, %55 : vector<32x128xf32>
    %57 = vector.broadcast %14 : vector<32x1xf32> to vector<32x128xf32>
    %58 = arith.cmpf olt, %0, %57 : vector<32x128xf32>
    %59 = arith.andi %56, %58 : vector<32x128xi1>
    %60 = arith.extui %59 : vector<32x128xi1> to vector<32x128xi32>
    %61 = arith.sitofp %60 : vector<32x128xi32> to vector<32x128xf32>
    %62 = vector.broadcast %14 : vector<32x1xf32> to vector<32x128xf32>
    %63 = arith.cmpf oge, %0, %62 : vector<32x128xf32>
    %64 = vector.broadcast %15 : vector<32x1xf32> to vector<32x128xf32>
    %65 = arith.cmpf olt, %0, %64 : vector<32x128xf32>
    %66 = arith.andi %63, %65 : vector<32x128xi1>
    %67 = arith.extui %66 : vector<32x128xi1> to vector<32x128xi32>
    %68 = arith.sitofp %67 : vector<32x128xi32> to vector<32x128xf32>
    %69 = vector.broadcast %15 : vector<32x1xf32> to vector<32x128xf32>
    %70 = arith.cmpf oge, %0, %69 : vector<32x128xf32>
    %71 = vector.broadcast %16 : vector<32x1xf32> to vector<32x128xf32>
    %72 = arith.cmpf olt, %0, %71 : vector<32x128xf32>
    %73 = arith.andi %70, %72 : vector<32x128xi1>
    %74 = arith.extui %73 : vector<32x128xi1> to vector<32x128xi32>
    %75 = arith.sitofp %74 : vector<32x128xi32> to vector<32x128xf32>
    %76 = vector.broadcast %16 : vector<32x1xf32> to vector<32x128xf32>
    %77 = arith.cmpf oge, %0, %76 : vector<32x128xf32>
    %78 = vector.broadcast %17 : vector<32x1xf32> to vector<32x128xf32>
    %79 = arith.cmpf olt, %0, %78 : vector<32x128xf32>
    %80 = arith.andi %77, %79 : vector<32x128xi1>
    %81 = arith.extui %80 : vector<32x128xi1> to vector<32x128xi32>
    %82 = arith.sitofp %81 : vector<32x128xi32> to vector<32x128xf32>
    %83 = vector.broadcast %17 : vector<32x1xf32> to vector<32x128xf32>
    %84 = arith.cmpf oge, %0, %83 : vector<32x128xf32>
    %85 = vector.broadcast %18 : vector<32x1xf32> to vector<32x128xf32>
    %86 = arith.cmpf olt, %0, %85 : vector<32x128xf32>
    %87 = arith.andi %84, %86 : vector<32x128xi1>
    %88 = arith.extui %87 : vector<32x128xi1> to vector<32x128xi32>
    %89 = arith.sitofp %88 : vector<32x128xi32> to vector<32x128xf32>
    %90 = vector.broadcast %18 : vector<32x1xf32> to vector<32x128xf32>
    %91 = arith.cmpf oge, %0, %90 : vector<32x128xf32>
    %92 = vector.broadcast %19 : vector<32x1xf32> to vector<32x128xf32>
    %93 = arith.cmpf olt, %0, %92 : vector<32x128xf32>
    %94 = arith.andi %91, %93 : vector<32x128xi1>
    %95 = arith.extui %94 : vector<32x128xi1> to vector<32x128xi32>
    %96 = arith.sitofp %95 : vector<32x128xi32> to vector<32x128xf32>
    %c0_16 = arith.constant 0 : index
    %c0_17 = arith.constant 0 : index
    %97 = vector.load %arg3[%c0_16, %c0_17] : memref<32x54xf32, #tpu.memory_space<vmem>>, vector<32x1xf32>
    %c0_18 = arith.constant 0 : index
    %c1_19 = arith.constant 1 : index
    %98 = vector.load %arg3[%c0_18, %c1_19] : memref<32x54xf32, #tpu.memory_space<vmem>>, vector<32x1xf32>
    %99 = vector.broadcast %8 : vector<32x1xf32> to vector<32x128xf32>
    %100 = arith.subf %0, %99 : vector<32x128xf32>
    %101 = vector.broadcast %97 : vector<32x1xf32> to vector<32x128xf32>
    %102 = arith.mulf %100, %101 : vector<32x128xf32>
    %103 = arith.mulf %102, %26 : vector<32x128xf32>
    %104 = vector.broadcast %10 : vector<32x1xf32> to vector<32x128xf32>
    %105 = arith.subf %0, %104 : vector<32x128xf32>
    %106 = vector.broadcast %98 : vector<32x1xf32> to vector<32x128xf32>
    %107 = arith.mulf %105, %106 : vector<32x128xf32>
    %108 = arith.mulf %107, %33 : vector<32x128xf32>
    %109 = arith.addf %103, %108 : vector<32x128xf32>
    %c0_20 = arith.constant 0 : index
    %c2_21 = arith.constant 2 : index
    %110 = vector.load %arg3[%c0_20, %c2_21] : memref<32x54xf32, #tpu.memory_space<vmem>>, vector<32x1xf32>
    %c0_22 = arith.constant 0 : index
    %c3_23 = arith.constant 3 : index
    %111 = vector.load %arg3[%c0_22, %c3_23] : memref<32x54xf32, #tpu.memory_space<vmem>>, vector<32x1xf32>
    %112 = vector.broadcast %9 : vector<32x1xf32> to vector<32x128xf32>
    %113 = arith.subf %0, %112 : vector<32x128xf32>
    %114 = vector.broadcast %110 : vector<32x1xf32> to vector<32x128xf32>
    %115 = arith.mulf %113, %114 : vector<32x128xf32>
    %116 = arith.mulf %115, %33 : vector<32x128xf32>
    %117 = vector.broadcast %11 : vector<32x1xf32> to vector<32x128xf32>
    %118 = arith.subf %0, %117 : vector<32x128xf32>
    %119 = vector.broadcast %111 : vector<32x1xf32> to vector<32x128xf32>
    %120 = arith.mulf %118, %119 : vector<32x128xf32>
    %121 = arith.mulf %120, %40 : vector<32x128xf32>
    %122 = arith.addf %116, %121 : vector<32x128xf32>
    %c0_24 = arith.constant 0 : index
    %c4_25 = arith.constant 4 : index
    %123 = vector.load %arg3[%c0_24, %c4_25] : memref<32x54xf32, #tpu.memory_space<vmem>>, vector<32x1xf32>
    %c0_26 = arith.constant 0 : index
    %c5_27 = arith.constant 5 : index
    %124 = vector.load %arg3[%c0_26, %c5_27] : memref<32x54xf32, #tpu.memory_space<vmem>>, vector<32x1xf32>
    %125 = vector.broadcast %10 : vector<32x1xf32> to vector<32x128xf32>
    %126 = arith.subf %0, %125 : vector<32x128xf32>
    %127 = vector.broadcast %123 : vector<32x1xf32> to vector<32x128xf32>
    %128 = arith.mulf %126, %127 : vector<32x128xf32>
    %129 = arith.mulf %128, %40 : vector<32x128xf32>
    %130 = vector.broadcast %12 : vector<32x1xf32> to vector<32x128xf32>
    %131 = arith.subf %0, %130 : vector<32x128xf32>
    %132 = vector.broadcast %124 : vector<32x1xf32> to vector<32x128xf32>
    %133 = arith.mulf %131, %132 : vector<32x128xf32>
    %134 = arith.mulf %133, %47 : vector<32x128xf32>
    %135 = arith.addf %129, %134 : vector<32x128xf32>
    %c0_28 = arith.constant 0 : index
    %c6_29 = arith.constant 6 : index
    %136 = vector.load %arg3[%c0_28, %c6_29] : memref<32x54xf32, #tpu.memory_space<vmem>>, vector<32x1xf32>
    %c0_30 = arith.constant 0 : index
    %c7_31 = arith.constant 7 : index
    %137 = vector.load %arg3[%c0_30, %c7_31] : memref<32x54xf32, #tpu.memory_space<vmem>>, vector<32x1xf32>
    %138 = vector.broadcast %11 : vector<32x1xf32> to vector<32x128xf32>
    %139 = arith.subf %0, %138 : vector<32x128xf32>
    %140 = vector.broadcast %136 : vector<32x1xf32> to vector<32x128xf32>
    %141 = arith.mulf %139, %140 : vector<32x128xf32>
    %142 = arith.mulf %141, %47 : vector<32x128xf32>
    %143 = vector.broadcast %13 : vector<32x1xf32> to vector<32x128xf32>
    %144 = arith.subf %0, %143 : vector<32x128xf32>
    %145 = vector.broadcast %137 : vector<32x1xf32> to vector<32x128xf32>
    %146 = arith.mulf %144, %145 : vector<32x128xf32>
    %147 = arith.mulf %146, %54 : vector<32x128xf32>
    %148 = arith.addf %142, %147 : vector<32x128xf32>
    %c0_32 = arith.constant 0 : index
    %c8_33 = arith.constant 8 : index
    %149 = vector.load %arg3[%c0_32, %c8_33] : memref<32x54xf32, #tpu.memory_space<vmem>>, vector<32x1xf32>
    %c0_34 = arith.constant 0 : index
    %c9_35 = arith.constant 9 : index
    %150 = vector.load %arg3[%c0_34, %c9_35] : memref<32x54xf32, #tpu.memory_space<vmem>>, vector<32x1xf32>
    %151 = vector.broadcast %12 : vector<32x1xf32> to vector<32x128xf32>
    %152 = arith.subf %0, %151 : vector<32x128xf32>
    %153 = vector.broadcast %149 : vector<32x1xf32> to vector<32x128xf32>
    %154 = arith.mulf %152, %153 : vector<32x128xf32>
    %155 = arith.mulf %154, %54 : vector<32x128xf32>
    %156 = vector.broadcast %14 : vector<32x1xf32> to vector<32x128xf32>
    %157 = arith.subf %0, %156 : vector<32x128xf32>
    %158 = vector.broadcast %150 : vector<32x1xf32> to vector<32x128xf32>
    %159 = arith.mulf %157, %158 : vector<32x128xf32>
    %160 = arith.mulf %159, %61 : vector<32x128xf32>
    %161 = arith.addf %155, %160 : vector<32x128xf32>
    %c0_36 = arith.constant 0 : index
    %c10_37 = arith.constant 10 : index
    %162 = vector.load %arg3[%c0_36, %c10_37] : memref<32x54xf32, #tpu.memory_space<vmem>>, vector<32x1xf32>
    %c0_38 = arith.constant 0 : index
    %c11_39 = arith.constant 11 : index
    %163 = vector.load %arg3[%c0_38, %c11_39] : memref<32x54xf32, #tpu.memory_space<vmem>>, vector<32x1xf32>
    %164 = vector.broadcast %13 : vector<32x1xf32> to vector<32x128xf32>
    %165 = arith.subf %0, %164 : vector<32x128xf32>
    %166 = vector.broadcast %162 : vector<32x1xf32> to vector<32x128xf32>
    %167 = arith.mulf %165, %166 : vector<32x128xf32>
    %168 = arith.mulf %167, %61 : vector<32x128xf32>
    %169 = vector.broadcast %15 : vector<32x1xf32> to vector<32x128xf32>
    %170 = arith.subf %0, %169 : vector<32x128xf32>
    %171 = vector.broadcast %163 : vector<32x1xf32> to vector<32x128xf32>
    %172 = arith.mulf %170, %171 : vector<32x128xf32>
    %173 = arith.mulf %172, %68 : vector<32x128xf32>
    %174 = arith.addf %168, %173 : vector<32x128xf32>
    %c0_40 = arith.constant 0 : index
    %c12 = arith.constant 12 : index
    %175 = vector.load %arg3[%c0_40, %c12] : memref<32x54xf32, #tpu.memory_space<vmem>>, vector<32x1xf32>
    %c0_41 = arith.constant 0 : index
    %c13 = arith.constant 13 : index
    %176 = vector.load %arg3[%c0_41, %c13] : memref<32x54xf32, #tpu.memory_space<vmem>>, vector<32x1xf32>
    %177 = vector.broadcast %14 : vector<32x1xf32> to vector<32x128xf32>
    %178 = arith.subf %0, %177 : vector<32x128xf32>
    %179 = vector.broadcast %175 : vector<32x1xf32> to vector<32x128xf32>
    %180 = arith.mulf %178, %179 : vector<32x128xf32>
    %181 = arith.mulf %180, %68 : vector<32x128xf32>
    %182 = vector.broadcast %16 : vector<32x1xf32> to vector<32x128xf32>
    %183 = arith.subf %0, %182 : vector<32x128xf32>
    %184 = vector.broadcast %176 : vector<32x1xf32> to vector<32x128xf32>
    %185 = arith.mulf %183, %184 : vector<32x128xf32>
    %186 = arith.mulf %185, %75 : vector<32x128xf32>
    %187 = arith.addf %181, %186 : vector<32x128xf32>
    %c0_42 = arith.constant 0 : index
    %c14 = arith.constant 14 : index
    %188 = vector.load %arg3[%c0_42, %c14] : memref<32x54xf32, #tpu.memory_space<vmem>>, vector<32x1xf32>
    %c0_43 = arith.constant 0 : index
    %c15 = arith.constant 15 : index
    %189 = vector.load %arg3[%c0_43, %c15] : memref<32x54xf32, #tpu.memory_space<vmem>>, vector<32x1xf32>
    %190 = vector.broadcast %15 : vector<32x1xf32> to vector<32x128xf32>
    %191 = arith.subf %0, %190 : vector<32x128xf32>
    %192 = vector.broadcast %188 : vector<32x1xf32> to vector<32x128xf32>
    %193 = arith.mulf %191, %192 : vector<32x128xf32>
    %194 = arith.mulf %193, %75 : vector<32x128xf32>
    %195 = vector.broadcast %17 : vector<32x1xf32> to vector<32x128xf32>
    %196 = arith.subf %0, %195 : vector<32x128xf32>
    %197 = vector.broadcast %189 : vector<32x1xf32> to vector<32x128xf32>
    %198 = arith.mulf %196, %197 : vector<32x128xf32>
    %199 = arith.mulf %198, %82 : vector<32x128xf32>
    %200 = arith.addf %194, %199 : vector<32x128xf32>
    %c0_44 = arith.constant 0 : index
    %c16 = arith.constant 16 : index
    %201 = vector.load %arg3[%c0_44, %c16] : memref<32x54xf32, #tpu.memory_space<vmem>>, vector<32x1xf32>
    %c0_45 = arith.constant 0 : index
    %c17 = arith.constant 17 : index
    %202 = vector.load %arg3[%c0_45, %c17] : memref<32x54xf32, #tpu.memory_space<vmem>>, vector<32x1xf32>
    %203 = vector.broadcast %16 : vector<32x1xf32> to vector<32x128xf32>
    %204 = arith.subf %0, %203 : vector<32x128xf32>
    %205 = vector.broadcast %201 : vector<32x1xf32> to vector<32x128xf32>
    %206 = arith.mulf %204, %205 : vector<32x128xf32>
    %207 = arith.mulf %206, %82 : vector<32x128xf32>
    %208 = vector.broadcast %18 : vector<32x1xf32> to vector<32x128xf32>
    %209 = arith.subf %0, %208 : vector<32x128xf32>
    %210 = vector.broadcast %202 : vector<32x1xf32> to vector<32x128xf32>
    %211 = arith.mulf %209, %210 : vector<32x128xf32>
    %212 = arith.mulf %211, %89 : vector<32x128xf32>
    %213 = arith.addf %207, %212 : vector<32x128xf32>
    %c0_46 = arith.constant 0 : index
    %c18 = arith.constant 18 : index
    %214 = vector.load %arg3[%c0_46, %c18] : memref<32x54xf32, #tpu.memory_space<vmem>>, vector<32x1xf32>
    %c0_47 = arith.constant 0 : index
    %c19 = arith.constant 19 : index
    %215 = vector.load %arg3[%c0_47, %c19] : memref<32x54xf32, #tpu.memory_space<vmem>>, vector<32x1xf32>
    %216 = vector.broadcast %17 : vector<32x1xf32> to vector<32x128xf32>
    %217 = arith.subf %0, %216 : vector<32x128xf32>
    %218 = vector.broadcast %214 : vector<32x1xf32> to vector<32x128xf32>
    %219 = arith.mulf %217, %218 : vector<32x128xf32>
    %220 = arith.mulf %219, %89 : vector<32x128xf32>
    %221 = vector.broadcast %19 : vector<32x1xf32> to vector<32x128xf32>
    %222 = arith.subf %0, %221 : vector<32x128xf32>
    %223 = vector.broadcast %215 : vector<32x1xf32> to vector<32x128xf32>
    %224 = arith.mulf %222, %223 : vector<32x128xf32>
    %225 = arith.mulf %224, %96 : vector<32x128xf32>
    %226 = arith.addf %220, %225 : vector<32x128xf32>
    %c0_48 = arith.constant 0 : index
    %c20 = arith.constant 20 : index
    %227 = vector.load %arg3[%c0_48, %c20] : memref<32x54xf32, #tpu.memory_space<vmem>>, vector<32x1xf32>
    %c0_49 = arith.constant 0 : index
    %c21 = arith.constant 21 : index
    %228 = vector.load %arg3[%c0_49, %c21] : memref<32x54xf32, #tpu.memory_space<vmem>>, vector<32x1xf32>
    %229 = vector.broadcast %8 : vector<32x1xf32> to vector<32x128xf32>
    %230 = arith.subf %0, %229 : vector<32x128xf32>
    %231 = vector.broadcast %227 : vector<32x1xf32> to vector<32x128xf32>
    %232 = arith.mulf %230, %231 : vector<32x128xf32>
    %233 = arith.mulf %232, %109 : vector<32x128xf32>
    %234 = vector.broadcast %11 : vector<32x1xf32> to vector<32x128xf32>
    %235 = arith.subf %0, %234 : vector<32x128xf32>
    %236 = vector.broadcast %228 : vector<32x1xf32> to vector<32x128xf32>
    %237 = arith.mulf %235, %236 : vector<32x128xf32>
    %238 = arith.mulf %237, %122 : vector<32x128xf32>
    %239 = arith.addf %233, %238 : vector<32x128xf32>
    %c0_50 = arith.constant 0 : index
    %c22 = arith.constant 22 : index
    %240 = vector.load %arg3[%c0_50, %c22] : memref<32x54xf32, #tpu.memory_space<vmem>>, vector<32x1xf32>
    %c0_51 = arith.constant 0 : index
    %c23 = arith.constant 23 : index
    %241 = vector.load %arg3[%c0_51, %c23] : memref<32x54xf32, #tpu.memory_space<vmem>>, vector<32x1xf32>
    %242 = vector.broadcast %9 : vector<32x1xf32> to vector<32x128xf32>
    %243 = arith.subf %0, %242 : vector<32x128xf32>
    %244 = vector.broadcast %240 : vector<32x1xf32> to vector<32x128xf32>
    %245 = arith.mulf %243, %244 : vector<32x128xf32>
    %246 = arith.mulf %245, %122 : vector<32x128xf32>
    %247 = vector.broadcast %12 : vector<32x1xf32> to vector<32x128xf32>
    %248 = arith.subf %0, %247 : vector<32x128xf32>
    %249 = vector.broadcast %241 : vector<32x1xf32> to vector<32x128xf32>
    %250 = arith.mulf %248, %249 : vector<32x128xf32>
    %251 = arith.mulf %250, %135 : vector<32x128xf32>
    %252 = arith.addf %246, %251 : vector<32x128xf32>
    %c0_52 = arith.constant 0 : index
    %c24 = arith.constant 24 : index
    %253 = vector.load %arg3[%c0_52, %c24] : memref<32x54xf32, #tpu.memory_space<vmem>>, vector<32x1xf32>
    %c0_53 = arith.constant 0 : index
    %c25 = arith.constant 25 : index
    %254 = vector.load %arg3[%c0_53, %c25] : memref<32x54xf32, #tpu.memory_space<vmem>>, vector<32x1xf32>
    %255 = vector.broadcast %10 : vector<32x1xf32> to vector<32x128xf32>
    %256 = arith.subf %0, %255 : vector<32x128xf32>
    %257 = vector.broadcast %253 : vector<32x1xf32> to vector<32x128xf32>
    %258 = arith.mulf %256, %257 : vector<32x128xf32>
    %259 = arith.mulf %258, %135 : vector<32x128xf32>
    %260 = vector.broadcast %13 : vector<32x1xf32> to vector<32x128xf32>
    %261 = arith.subf %0, %260 : vector<32x128xf32>
    %262 = vector.broadcast %254 : vector<32x1xf32> to vector<32x128xf32>
    %263 = arith.mulf %261, %262 : vector<32x128xf32>
    %264 = arith.mulf %263, %148 : vector<32x128xf32>
    %265 = arith.addf %259, %264 : vector<32x128xf32>
    %c0_54 = arith.constant 0 : index
    %c26 = arith.constant 26 : index
    %266 = vector.load %arg3[%c0_54, %c26] : memref<32x54xf32, #tpu.memory_space<vmem>>, vector<32x1xf32>
    %c0_55 = arith.constant 0 : index
    %c27 = arith.constant 27 : index
    %267 = vector.load %arg3[%c0_55, %c27] : memref<32x54xf32, #tpu.memory_space<vmem>>, vector<32x1xf32>
    %268 = vector.broadcast %11 : vector<32x1xf32> to vector<32x128xf32>
    %269 = arith.subf %0, %268 : vector<32x128xf32>
    %270 = vector.broadcast %266 : vector<32x1xf32> to vector<32x128xf32>
    %271 = arith.mulf %269, %270 : vector<32x128xf32>
    %272 = arith.mulf %271, %148 : vector<32x128xf32>
    %273 = vector.broadcast %14 : vector<32x1xf32> to vector<32x128xf32>
    %274 = arith.subf %0, %273 : vector<32x128xf32>
    %275 = vector.broadcast %267 : vector<32x1xf32> to vector<32x128xf32>
    %276 = arith.mulf %274, %275 : vector<32x128xf32>
    %277 = arith.mulf %276, %161 : vector<32x128xf32>
    %278 = arith.addf %272, %277 : vector<32x128xf32>
    %c0_56 = arith.constant 0 : index
    %c28 = arith.constant 28 : index
    %279 = vector.load %arg3[%c0_56, %c28] : memref<32x54xf32, #tpu.memory_space<vmem>>, vector<32x1xf32>
    %c0_57 = arith.constant 0 : index
    %c29 = arith.constant 29 : index
    %280 = vector.load %arg3[%c0_57, %c29] : memref<32x54xf32, #tpu.memory_space<vmem>>, vector<32x1xf32>
    %281 = vector.broadcast %12 : vector<32x1xf32> to vector<32x128xf32>
    %282 = arith.subf %0, %281 : vector<32x128xf32>
    %283 = vector.broadcast %279 : vector<32x1xf32> to vector<32x128xf32>
    %284 = arith.mulf %282, %283 : vector<32x128xf32>
    %285 = arith.mulf %284, %161 : vector<32x128xf32>
    %286 = vector.broadcast %15 : vector<32x1xf32> to vector<32x128xf32>
    %287 = arith.subf %0, %286 : vector<32x128xf32>
    %288 = vector.broadcast %280 : vector<32x1xf32> to vector<32x128xf32>
    %289 = arith.mulf %287, %288 : vector<32x128xf32>
    %290 = arith.mulf %289, %174 : vector<32x128xf32>
    %291 = arith.addf %285, %290 : vector<32x128xf32>
    %c0_58 = arith.constant 0 : index
    %c30 = arith.constant 30 : index
    %292 = vector.load %arg3[%c0_58, %c30] : memref<32x54xf32, #tpu.memory_space<vmem>>, vector<32x1xf32>
    %c0_59 = arith.constant 0 : index
    %c31 = arith.constant 31 : index
    %293 = vector.load %arg3[%c0_59, %c31] : memref<32x54xf32, #tpu.memory_space<vmem>>, vector<32x1xf32>
    %294 = vector.broadcast %13 : vector<32x1xf32> to vector<32x128xf32>
    %295 = arith.subf %0, %294 : vector<32x128xf32>
    %296 = vector.broadcast %292 : vector<32x1xf32> to vector<32x128xf32>
    %297 = arith.mulf %295, %296 : vector<32x128xf32>
    %298 = arith.mulf %297, %174 : vector<32x128xf32>
    %299 = vector.broadcast %16 : vector<32x1xf32> to vector<32x128xf32>
    %300 = arith.subf %0, %299 : vector<32x128xf32>
    %301 = vector.broadcast %293 : vector<32x1xf32> to vector<32x128xf32>
    %302 = arith.mulf %300, %301 : vector<32x128xf32>
    %303 = arith.mulf %302, %187 : vector<32x128xf32>
    %304 = arith.addf %298, %303 : vector<32x128xf32>
    %c0_60 = arith.constant 0 : index
    %c32 = arith.constant 32 : index
    %305 = vector.load %arg3[%c0_60, %c32] : memref<32x54xf32, #tpu.memory_space<vmem>>, vector<32x1xf32>
    %c0_61 = arith.constant 0 : index
    %c33 = arith.constant 33 : index
    %306 = vector.load %arg3[%c0_61, %c33] : memref<32x54xf32, #tpu.memory_space<vmem>>, vector<32x1xf32>
    %307 = vector.broadcast %14 : vector<32x1xf32> to vector<32x128xf32>
    %308 = arith.subf %0, %307 : vector<32x128xf32>
    %309 = vector.broadcast %305 : vector<32x1xf32> to vector<32x128xf32>
    %310 = arith.mulf %308, %309 : vector<32x128xf32>
    %311 = arith.mulf %310, %187 : vector<32x128xf32>
    %312 = vector.broadcast %17 : vector<32x1xf32> to vector<32x128xf32>
    %313 = arith.subf %0, %312 : vector<32x128xf32>
    %314 = vector.broadcast %306 : vector<32x1xf32> to vector<32x128xf32>
    %315 = arith.mulf %313, %314 : vector<32x128xf32>
    %316 = arith.mulf %315, %200 : vector<32x128xf32>
    %317 = arith.addf %311, %316 : vector<32x128xf32>
    %c0_62 = arith.constant 0 : index
    %c34 = arith.constant 34 : index
    %318 = vector.load %arg3[%c0_62, %c34] : memref<32x54xf32, #tpu.memory_space<vmem>>, vector<32x1xf32>
    %c0_63 = arith.constant 0 : index
    %c35 = arith.constant 35 : index
    %319 = vector.load %arg3[%c0_63, %c35] : memref<32x54xf32, #tpu.memory_space<vmem>>, vector<32x1xf32>
    %320 = vector.broadcast %15 : vector<32x1xf32> to vector<32x128xf32>
    %321 = arith.subf %0, %320 : vector<32x128xf32>
    %322 = vector.broadcast %318 : vector<32x1xf32> to vector<32x128xf32>
    %323 = arith.mulf %321, %322 : vector<32x128xf32>
    %324 = arith.mulf %323, %200 : vector<32x128xf32>
    %325 = vector.broadcast %18 : vector<32x1xf32> to vector<32x128xf32>
    %326 = arith.subf %0, %325 : vector<32x128xf32>
    %327 = vector.broadcast %319 : vector<32x1xf32> to vector<32x128xf32>
    %328 = arith.mulf %326, %327 : vector<32x128xf32>
    %329 = arith.mulf %328, %213 : vector<32x128xf32>
    %330 = arith.addf %324, %329 : vector<32x128xf32>
    %c0_64 = arith.constant 0 : index
    %c36 = arith.constant 36 : index
    %331 = vector.load %arg3[%c0_64, %c36] : memref<32x54xf32, #tpu.memory_space<vmem>>, vector<32x1xf32>
    %c0_65 = arith.constant 0 : index
    %c37 = arith.constant 37 : index
    %332 = vector.load %arg3[%c0_65, %c37] : memref<32x54xf32, #tpu.memory_space<vmem>>, vector<32x1xf32>
    %333 = vector.broadcast %16 : vector<32x1xf32> to vector<32x128xf32>
    %334 = arith.subf %0, %333 : vector<32x128xf32>
    %335 = vector.broadcast %331 : vector<32x1xf32> to vector<32x128xf32>
    %336 = arith.mulf %334, %335 : vector<32x128xf32>
    %337 = arith.mulf %336, %213 : vector<32x128xf32>
    %338 = vector.broadcast %19 : vector<32x1xf32> to vector<32x128xf32>
    %339 = arith.subf %0, %338 : vector<32x128xf32>
    %340 = vector.broadcast %332 : vector<32x1xf32> to vector<32x128xf32>
    %341 = arith.mulf %339, %340 : vector<32x128xf32>
    %342 = arith.mulf %341, %226 : vector<32x128xf32>
    %343 = arith.addf %337, %342 : vector<32x128xf32>
    %c0_66 = arith.constant 0 : index
    %c38 = arith.constant 38 : index
    %344 = vector.load %arg3[%c0_66, %c38] : memref<32x54xf32, #tpu.memory_space<vmem>>, vector<32x1xf32>
    %c0_67 = arith.constant 0 : index
    %c39 = arith.constant 39 : index
    %345 = vector.load %arg3[%c0_67, %c39] : memref<32x54xf32, #tpu.memory_space<vmem>>, vector<32x1xf32>
    %346 = vector.broadcast %8 : vector<32x1xf32> to vector<32x128xf32>
    %347 = arith.subf %0, %346 : vector<32x128xf32>
    %348 = vector.broadcast %344 : vector<32x1xf32> to vector<32x128xf32>
    %349 = arith.mulf %347, %348 : vector<32x128xf32>
    %350 = arith.mulf %349, %239 : vector<32x128xf32>
    %351 = vector.broadcast %12 : vector<32x1xf32> to vector<32x128xf32>
    %352 = arith.subf %0, %351 : vector<32x128xf32>
    %353 = vector.broadcast %345 : vector<32x1xf32> to vector<32x128xf32>
    %354 = arith.mulf %352, %353 : vector<32x128xf32>
    %355 = arith.mulf %354, %252 : vector<32x128xf32>
    %356 = arith.addf %350, %355 : vector<32x128xf32>
    %c0_68 = arith.constant 0 : index
    %c40 = arith.constant 40 : index
    %357 = vector.load %arg3[%c0_68, %c40] : memref<32x54xf32, #tpu.memory_space<vmem>>, vector<32x1xf32>
    %c0_69 = arith.constant 0 : index
    %c41 = arith.constant 41 : index
    %358 = vector.load %arg3[%c0_69, %c41] : memref<32x54xf32, #tpu.memory_space<vmem>>, vector<32x1xf32>
    %359 = vector.broadcast %9 : vector<32x1xf32> to vector<32x128xf32>
    %360 = arith.subf %0, %359 : vector<32x128xf32>
    %361 = vector.broadcast %357 : vector<32x1xf32> to vector<32x128xf32>
    %362 = arith.mulf %360, %361 : vector<32x128xf32>
    %363 = arith.mulf %362, %252 : vector<32x128xf32>
    %364 = vector.broadcast %13 : vector<32x1xf32> to vector<32x128xf32>
    %365 = arith.subf %0, %364 : vector<32x128xf32>
    %366 = vector.broadcast %358 : vector<32x1xf32> to vector<32x128xf32>
    %367 = arith.mulf %365, %366 : vector<32x128xf32>
    %368 = arith.mulf %367, %265 : vector<32x128xf32>
    %369 = arith.addf %363, %368 : vector<32x128xf32>
    %c0_70 = arith.constant 0 : index
    %c42 = arith.constant 42 : index
    %370 = vector.load %arg3[%c0_70, %c42] : memref<32x54xf32, #tpu.memory_space<vmem>>, vector<32x1xf32>
    %c0_71 = arith.constant 0 : index
    %c43 = arith.constant 43 : index
    %371 = vector.load %arg3[%c0_71, %c43] : memref<32x54xf32, #tpu.memory_space<vmem>>, vector<32x1xf32>
    %372 = vector.broadcast %10 : vector<32x1xf32> to vector<32x128xf32>
    %373 = arith.subf %0, %372 : vector<32x128xf32>
    %374 = vector.broadcast %370 : vector<32x1xf32> to vector<32x128xf32>
    %375 = arith.mulf %373, %374 : vector<32x128xf32>
    %376 = arith.mulf %375, %265 : vector<32x128xf32>
    %377 = vector.broadcast %14 : vector<32x1xf32> to vector<32x128xf32>
    %378 = arith.subf %0, %377 : vector<32x128xf32>
    %379 = vector.broadcast %371 : vector<32x1xf32> to vector<32x128xf32>
    %380 = arith.mulf %378, %379 : vector<32x128xf32>
    %381 = arith.mulf %380, %278 : vector<32x128xf32>
    %382 = arith.addf %376, %381 : vector<32x128xf32>
    %c0_72 = arith.constant 0 : index
    %c44 = arith.constant 44 : index
    %383 = vector.load %arg3[%c0_72, %c44] : memref<32x54xf32, #tpu.memory_space<vmem>>, vector<32x1xf32>
    %c0_73 = arith.constant 0 : index
    %c45 = arith.constant 45 : index
    %384 = vector.load %arg3[%c0_73, %c45] : memref<32x54xf32, #tpu.memory_space<vmem>>, vector<32x1xf32>
    %385 = vector.broadcast %11 : vector<32x1xf32> to vector<32x128xf32>
    %386 = arith.subf %0, %385 : vector<32x128xf32>
    %387 = vector.broadcast %383 : vector<32x1xf32> to vector<32x128xf32>
    %388 = arith.mulf %386, %387 : vector<32x128xf32>
    %389 = arith.mulf %388, %278 : vector<32x128xf32>
    %390 = vector.broadcast %15 : vector<32x1xf32> to vector<32x128xf32>
    %391 = arith.subf %0, %390 : vector<32x128xf32>
    %392 = vector.broadcast %384 : vector<32x1xf32> to vector<32x128xf32>
    %393 = arith.mulf %391, %392 : vector<32x128xf32>
    %394 = arith.mulf %393, %291 : vector<32x128xf32>
    %395 = arith.addf %389, %394 : vector<32x128xf32>
    %c0_74 = arith.constant 0 : index
    %c46 = arith.constant 46 : index
    %396 = vector.load %arg3[%c0_74, %c46] : memref<32x54xf32, #tpu.memory_space<vmem>>, vector<32x1xf32>
    %c0_75 = arith.constant 0 : index
    %c47 = arith.constant 47 : index
    %397 = vector.load %arg3[%c0_75, %c47] : memref<32x54xf32, #tpu.memory_space<vmem>>, vector<32x1xf32>
    %398 = vector.broadcast %12 : vector<32x1xf32> to vector<32x128xf32>
    %399 = arith.subf %0, %398 : vector<32x128xf32>
    %400 = vector.broadcast %396 : vector<32x1xf32> to vector<32x128xf32>
    %401 = arith.mulf %399, %400 : vector<32x128xf32>
    %402 = arith.mulf %401, %291 : vector<32x128xf32>
    %403 = vector.broadcast %16 : vector<32x1xf32> to vector<32x128xf32>
    %404 = arith.subf %0, %403 : vector<32x128xf32>
    %405 = vector.broadcast %397 : vector<32x1xf32> to vector<32x128xf32>
    %406 = arith.mulf %404, %405 : vector<32x128xf32>
    %407 = arith.mulf %406, %304 : vector<32x128xf32>
    %408 = arith.addf %402, %407 : vector<32x128xf32>
    %c0_76 = arith.constant 0 : index
    %c48 = arith.constant 48 : index
    %409 = vector.load %arg3[%c0_76, %c48] : memref<32x54xf32, #tpu.memory_space<vmem>>, vector<32x1xf32>
    %c0_77 = arith.constant 0 : index
    %c49 = arith.constant 49 : index
    %410 = vector.load %arg3[%c0_77, %c49] : memref<32x54xf32, #tpu.memory_space<vmem>>, vector<32x1xf32>
    %411 = vector.broadcast %13 : vector<32x1xf32> to vector<32x128xf32>
    %412 = arith.subf %0, %411 : vector<32x128xf32>
    %413 = vector.broadcast %409 : vector<32x1xf32> to vector<32x128xf32>
    %414 = arith.mulf %412, %413 : vector<32x128xf32>
    %415 = arith.mulf %414, %304 : vector<32x128xf32>
    %416 = vector.broadcast %17 : vector<32x1xf32> to vector<32x128xf32>
    %417 = arith.subf %0, %416 : vector<32x128xf32>
    %418 = vector.broadcast %410 : vector<32x1xf32> to vector<32x128xf32>
    %419 = arith.mulf %417, %418 : vector<32x128xf32>
    %420 = arith.mulf %419, %317 : vector<32x128xf32>
    %421 = arith.addf %415, %420 : vector<32x128xf32>
    %c0_78 = arith.constant 0 : index
    %c50 = arith.constant 50 : index
    %422 = vector.load %arg3[%c0_78, %c50] : memref<32x54xf32, #tpu.memory_space<vmem>>, vector<32x1xf32>
    %c0_79 = arith.constant 0 : index
    %c51 = arith.constant 51 : index
    %423 = vector.load %arg3[%c0_79, %c51] : memref<32x54xf32, #tpu.memory_space<vmem>>, vector<32x1xf32>
    %424 = vector.broadcast %14 : vector<32x1xf32> to vector<32x128xf32>
    %425 = arith.subf %0, %424 : vector<32x128xf32>
    %426 = vector.broadcast %422 : vector<32x1xf32> to vector<32x128xf32>
    %427 = arith.mulf %425, %426 : vector<32x128xf32>
    %428 = arith.mulf %427, %317 : vector<32x128xf32>
    %429 = vector.broadcast %18 : vector<32x1xf32> to vector<32x128xf32>
    %430 = arith.subf %0, %429 : vector<32x128xf32>
    %431 = vector.broadcast %423 : vector<32x1xf32> to vector<32x128xf32>
    %432 = arith.mulf %430, %431 : vector<32x128xf32>
    %433 = arith.mulf %432, %330 : vector<32x128xf32>
    %434 = arith.addf %428, %433 : vector<32x128xf32>
    %c0_80 = arith.constant 0 : index
    %c52 = arith.constant 52 : index
    %435 = vector.load %arg3[%c0_80, %c52] : memref<32x54xf32, #tpu.memory_space<vmem>>, vector<32x1xf32>
    %c0_81 = arith.constant 0 : index
    %c53 = arith.constant 53 : index
    %436 = vector.load %arg3[%c0_81, %c53] : memref<32x54xf32, #tpu.memory_space<vmem>>, vector<32x1xf32>
    %437 = vector.broadcast %15 : vector<32x1xf32> to vector<32x128xf32>
    %438 = arith.subf %0, %437 : vector<32x128xf32>
    %439 = vector.broadcast %435 : vector<32x1xf32> to vector<32x128xf32>
    %440 = arith.mulf %438, %439 : vector<32x128xf32>
    %441 = arith.mulf %440, %330 : vector<32x128xf32>
    %442 = vector.broadcast %19 : vector<32x1xf32> to vector<32x128xf32>
    %443 = arith.subf %0, %442 : vector<32x128xf32>
    %444 = vector.broadcast %436 : vector<32x1xf32> to vector<32x128xf32>
    %445 = arith.mulf %443, %444 : vector<32x128xf32>
    %446 = arith.mulf %445, %343 : vector<32x128xf32>
    %447 = arith.addf %441, %446 : vector<32x128xf32>
    %c32_82 = arith.constant 32 : index
    %c0_83 = arith.constant 0 : index
    %448 = vector.load %arg6[%c32_82, %c0_83] : memref<288x128xf32, #tpu.memory_space<vmem>>, vector<32x128xf32>
    tpu.vector_store %arg6[%c32_82, %c0_83], %356 {strides = array<i32>} : memref<288x128xf32, #tpu.memory_space<vmem>>, vector<32x128xf32>,
    %c64 = arith.constant 64 : index
    %c0_84 = arith.constant 0 : index
    %449 = vector.load %arg6[%c64, %c0_84] : memref<288x128xf32, #tpu.memory_space<vmem>>, vector<32x128xf32>
    tpu.vector_store %arg6[%c64, %c0_84], %369 {strides = array<i32>} : memref<288x128xf32, #tpu.memory_space<vmem>>, vector<32x128xf32>,
    %c96 = arith.constant 96 : index
    %c0_85 = arith.constant 0 : index
    %450 = vector.load %arg6[%c96, %c0_85] : memref<288x128xf32, #tpu.memory_space<vmem>>, vector<32x128xf32>
    tpu.vector_store %arg6[%c96, %c0_85], %382 {strides = array<i32>} : memref<288x128xf32, #tpu.memory_space<vmem>>, vector<32x128xf32>,
    %c128 = arith.constant 128 : index
    %c0_86 = arith.constant 0 : index
    %451 = vector.load %arg6[%c128, %c0_86] : memref<288x128xf32, #tpu.memory_space<vmem>>, vector<32x128xf32>
    tpu.vector_store %arg6[%c128, %c0_86], %395 {strides = array<i32>} : memref<288x128xf32, #tpu.memory_space<vmem>>, vector<32x128xf32>,
    %c160 = arith.constant 160 : index
    %c0_87 = arith.constant 0 : index
    %452 = vector.load %arg6[%c160, %c0_87] : memref<288x128xf32, #tpu.memory_space<vmem>>, vector<32x128xf32>
    tpu.vector_store %arg6[%c160, %c0_87], %408 {strides = array<i32>} : memref<288x128xf32, #tpu.memory_space<vmem>>, vector<32x128xf32>,
    %c192 = arith.constant 192 : index
    %c0_88 = arith.constant 0 : index
    %453 = vector.load %arg6[%c192, %c0_88] : memref<288x128xf32, #tpu.memory_space<vmem>>, vector<32x128xf32>
    tpu.vector_store %arg6[%c192, %c0_88], %421 {strides = array<i32>} : memref<288x128xf32, #tpu.memory_space<vmem>>, vector<32x128xf32>,
    %c224 = arith.constant 224 : index
    %c0_89 = arith.constant 0 : index
    %454 = vector.load %arg6[%c224, %c0_89] : memref<288x128xf32, #tpu.memory_space<vmem>>, vector<32x128xf32>
    tpu.vector_store %arg6[%c224, %c0_89], %434 {strides = array<i32>} : memref<288x128xf32, #tpu.memory_space<vmem>>, vector<32x128xf32>,
    %c256 = arith.constant 256 : index
    %c0_90 = arith.constant 0 : index
    %455 = vector.load %arg6[%c256, %c0_90] : memref<288x128xf32, #tpu.memory_space<vmem>>, vector<32x128xf32>
    tpu.vector_store %arg6[%c256, %c0_90], %447 {strides = array<i32>} : memref<288x128xf32, #tpu.memory_space<vmem>>, vector<32x128xf32>,
    %c0_91 = arith.constant 0 : index
    %c0_92 = arith.constant 0 : index
    %456 = vector.load %arg4[%c0_91, %c0_92] : memref<32x288xf32, #tpu.memory_space<vmem>>, vector<32x288xf32>
    %c0_93 = arith.constant 0 : index
    %c0_94 = arith.constant 0 : index
    %457 = vector.load %arg6[%c0_93, %c0_94] : memref<288x128xf32, #tpu.memory_space<vmem>>, vector<288x128xf32>
    %cst_95 = arith.constant dense<0.000000e+00> : vector<32x128xf32>
    %458 = tpu.matmul %456, %457, %cst_95 {dimension_numbers = #tpu.dot_dimension_numbers<[1], [0], [0], [1], [0, 0, 1, 1], [], []>} : vector<32x288xf32>, vector<288x128xf32>, vector<32x128xf32> -> vector<32x128xf32>
    %c0_96 = arith.constant 0 : index
    %c0_97 = arith.constant 0 : index
    %459 = vector.load %arg5[%c0_96, %c0_97] : memref<32x128xf32, #tpu.memory_space<vmem>>, vector<32x128xf32>
    tpu.vector_store %arg5[%c0_96, %c0_97], %458 {strides = array<i32>} : memref<32x128xf32, #tpu.memory_space<vmem>>, vector<32x128xf32>,
    return
  }
  func.func @transform_0(%arg0: i32) -> (i32, i32) {
    %c0_i32 = arith.constant 0 : i32
    %c0_i32_0 = arith.constant 0 : i32
    return %c0_i32, %arg0 : i32, i32
  }
  func.func @transform_1(%arg0: i32) -> (i32, i32) {
    %c0_i32 = arith.constant 0 : i32
    %c0_i32_0 = arith.constant 0 : i32
    %c0_i32_1 = arith.constant 0 : i32
    return %c0_i32, %c0_i32_0 : i32, i32
  }
  func.func @transform_2(%arg0: i32) -> (i32, i32) {
    %c0_i32 = arith.constant 0 : i32
    %c0_i32_0 = arith.constant 0 : i32
    %c0_i32_1 = arith.constant 0 : i32
    return %c0_i32, %c0_i32_0 : i32, i32
  }
  func.func @transform_3(%arg0: i32) -> (i32, i32) {
    %c0_i32 = arith.constant 0 : i32
    %c0_i32_0 = arith.constant 0 : i32
    %c0_i32_1 = arith.constant 0 : i32
    return %c0_i32, %c0_i32_0 : i32, i32
  }
  func.func @transform_4(%arg0: i32) -> (i32, i32) {
    %c0_i32 = arith.constant 0 : i32
    %c0_i32_0 = arith.constant 0 : i32
    return %c0_i32, %arg0 : i32, i32
  }
}

</mosaic_0001>

<bundles_post_ra>
// kernel: tpu_custom_call.1
= control target key start
LH: loop header
LB: loop body
LE: loop exit
PB: predicated region body
PF: predicated region fallthrough
CT: control target
= control target key end

     0   :  { %9 = vsyncpa [#allocation4], 0  ;;  %s5657_s0 = inlined_call_operand.hbm [shape: f32[32,512], index: 0, kind: input, shape index: {}]   ;;  %s5658_s1 = inlined_call_operand.vmem [shape: f32[32,12], index: 1, kind: input, shape index: {}]   ;;  %s5659_s2 = inlined_call_operand.vmem [shape: f32[32,54], index: 2, kind: input, shape index: {}]   ;;  %s5660_s3 = inlined_call_operand.hbm [shape: f32[32,288], index: 3, kind: input, shape index: {}]   ;;  %s5661_s4 = inlined_call_operand.hbm [shape: f32[32,512], index: 4, kind: output, shape index: {}]  }
   0x1   :  { %11 = vsyncpa [#allocation4 + $0x1], 0 }
   0x2   :  { %12 = vsyncpa [#allocation7], 0 }
   0x3   :  { %13 = vsyncpa [#allocation5], 0 }
   0x4   :  { %15 = vsyncpa [#allocation5 + $0x1], 0  ;;  %s3187_s15 = smov 0   ;;  %s3189_s16 = smov 0  }
   0x5   :  { %s3191_s17 = smov 0   ;;  %s3193_s18 = smov 0  }
   0x6 LB: > { %s3208_s19 = sadd.s32 4294967295, %s3094_s18   ;;  %s2509_s20 = sadd.s32 4294967294, %s3094_s18   ;;  %s3094_s18 = sphi %s3193_s18, %s6398_s18   ;;  %s3090_s17 = sphi %s3191_s17, %s6397_s17   ;;  %s3086_s16 = sphi %s3189_s16, %s6396_s16   ;;  %s3082_s15 = sphi %s3187_s15, %s6395_s15  }
   0x7   : > { %s3212_s21 = sadd.s32 1, %s3094_s18   ;;  %s28_s22 = sadd.s32 1, %s3090_s17 }
   0x8   : > { %s25_s23 = ssub.s32 %s3094_s18, %s3212_s21  ;;  %p35_p0 = scmp.ne.s32.totalorder %s3090_s17, %s3086_s16 }
   0x9   : > { %p26_p1 = scmp.eq.s32.totalorder %s25_s23, 0  ;;  %p36_p2 = scmp.eq.s32.totalorder %s3094_s18, 0 }
   0xa   : > { %p41_p3 = scmp.ne.s32.totalorder %s3086_s16, %s3082_s15  ;;  %p5662_p4 = scmp.eq.s32.totalorder %s3208_s19, 0 }
   0xb   : > { %s3224_s24 = scalar_select %p26_p1, %s3090_s17, %s28_s22  }
   0xc   : > { %p3226_p5 = por %p36_p2, %p35_p0  ;;  %p3232_p6 = por %p5662_p4, %p41_p3 }
   0xd   : > { %p128_p7 = scmp.eq.s32.totalorder %s3208_s19, 3  ;;  %p134_p8 = scmp.eq.s32.totalorder %s2509_s20, 3 }
   0xe   : > { %s5859_s25 = scalar_select %p3226_p5, 1, 0 }
   0xf   : > { %s5860_s26 = scalar_select %p3232_p6, 1, 0 }
  0x10   : > { %p2510_p9 = scmp.ge.s32.totalorder %s3094_s18, 1  ;;  %p141_p10 = scmp.lt.s32.totalorder %s3094_s18, 5 }
  0x11   : > { %p3239_p11 = por %p128_p7, %p35_p0  ;;  %p3243_p12 = por %p134_p8, %p41_p3 }
  0x12   : > { %p3247_p13 = pnand %p2510_p9, %p141_p10  ;;  %s3096_s30 = smov [#allocation6]  }
  0x13   : > { %s5861_s27 = scalar_select %p3239_p11, 1, 0 }
  0x14   : > { %s5862_s28 = scalar_select %p3243_p12, 1, 0 }
  0x15   : > { %s5863_s29 = scalar_select %p3247_p13, 1, 0 }
  0x16   : > { %p2689_p1 = pneg %p3247_p13  ;;  %s159_s5 = sshll.u32 %s3096_s30, 4  ;;  %s160_s5 = int_to_ptr.vmem [resolvable:$true] %s159_s5 }
  0x17   : > { %s173_s7 = sand.u32 1, %s3090_s17   ;;  %s2966_s10 = scalar_lea.hbm %s5660_s3, 1536 }
  0x18   : > { %p3255_p2 = pnand %p2689_p1, %p5662_p4  ;;  %p2967_p3 = scmp.ne.s32.totalorder %s5660_s3, %s2966_s10 }
  0x19   : > { %p2973_p10 = scmp.lt.u32.totalorder %s2966_s10, %s5660_s3 }
  0x1a   : > { %p2968_p7 = pneg %p3255_p2 }
  0x1c   : > { %p2969_p8 = pnand %p2968_p7, %p2967_p3 }
  0x1e   : > { %p2970_p9 = pneg %p2969_p8 }
  0x20   : > { %p2975_p1 = pnand %p2973_p10, %p2970_p9 }
  0x22   : > { %2978 = shalt.err (!%p2975_p1)
}
  0x23   : > { %s2979_s20 = scalar_lea.vmem %s160_s5, 1536  ;;  %p2987_p11 = scmp.lt.s32.totalorder %s160_s5, %s160_s5 }
  0x24   : > { %p2980_p4 = scmp.ne.s32.totalorder %s160_s5, %s2979_s20  ;;  %p2988_p6 = scmp.lt.s32.totalorder %s2979_s20, %s2979_s20 }
  0x26   : > { %p2982_p0 = pnand %p2980_p4, %p2968_p7  ;;  %p2989_p13 = por %p2988_p6, %p2987_p11 }
  0x28   : > { %p2983_p12 = pneg %p2982_p0 }
  0x2a   : > { %p2990_p5 = pnand %p2989_p13, %p2983_p12 }
  0x2c   : > { %2993 = shalt.err (!%p2990_p5)
}
  0x2d   : > { %s3097_s22 = smov 384   ;;  %s3098_s23 = smov 24  }
  0x2e   : > { %2692 = dma.hbm_to_vmem [thread:$0]  (!%p3255_p2), %s5660_s3, 1536, %s160_s5, [#allocation7], %s3097_s22, %s3097_s22, %s3098_s23  }
  0x2f   : > { %p5865_p3 = scmp.ne.s32.totalorder %s5859_s25, 0  ;;  %p5866_p8 = scmp.lt.s32.totalorder %s3094_s18, 4 }
  0x30   : > { %s2513_s10 = sshll.u32 %s173_s7, 5  ;;  %s2514_s11 = sshll.u32 %s3094_s18, 7 }
  0x31   : > { %p3281_p4 = pnand %p5866_p8, %p5865_p3  ;;  %s3289_s14 = scalar_lea.hbm %s5657_s0, %s2514_s11 }
  0x32   : > { %s177_s5 = scalar_lea.vmem [#allocation3], %s2513_s10  ;;  %s3293_s6 = scalar_lea.sflag [#allocation4], %s173_s7 }
  0x33   : > { %s183_s25 = sshll.u32 %s177_s5, 4  ;;  %s2994_s20 = scalar_lea.hbm %s3289_s14, 512  ;;  %s3291_s25 = int_to_ptr.vmem [resolvable:$true] %s183_s25 }
  0x34   : > { %p2995_p5 = scmp.ne.s32.totalorder %s3289_s14, %s2994_s20  ;;  %p2996_p6 = pneg %p3281_p4 }
  0x35   : > { %s2999_s30 = scalar_lea.hbm %s5657_s0, 2048  ;;  %p3000_p13 = scmp.lt.u32.totalorder %s3289_s14, %s5657_s0 }
  0x36   : > { %p2997_p11 = pnand %p2996_p6, %p2995_p5  ;;  %p3001_p2 = scmp.lt.u32.totalorder %s2999_s30, %s2994_s20 }
  0x37   : > { %p3003_p7 = scmp.lt.u32.totalorder %s2994_s20, %s3289_s14 }
  0x38   : > { %p2998_p12 = pneg %p2997_p11  ;;  %p3002_p0 = por %p3001_p2, %p3000_p13 }
  0x3a   : > { %p3004_p9 = por %p3003_p7, %p3002_p0 }
  0x3c   : > { %p3005_p10 = pnand %p3004_p9, %p2998_p12 }
  0x3e   : > { %3008 = shalt.err (!%p3005_p10)
}
  0x3f   : > { %s3009_s7 = scalar_lea.vmem %s3291_s25, 512  ;;  %s3099_s10 = smov [#allocation3]  }
  0x40   : > { %p3010_p1 = scmp.ne.s32.totalorder %s3291_s25, %s3009_s7  ;;  %s3014_s12 = sshll.u32 %s3099_s10, 4  ;;  %s3015_s12 = int_to_ptr.vmem [resolvable:$false] %s3014_s12 }
  0x41   : > { %s3016_s13 = scalar_lea.vmem %s3015_s12, 1024  ;;  %p3017_p5 = scmp.lt.s32.totalorder %s3291_s25, %s3015_s12 }
  0x42   : > { %p3012_p3 = pnand %p3010_p1, %p2996_p6  ;;  %p3018_p11 = scmp.lt.s32.totalorder %s3016_s13, %s3009_s7 }
  0x44   : > { %p3013_p8 = pneg %p3012_p3  ;;  %p3019_p13 = por %p3018_p11, %p3017_p5 }
  0x46   : > { %p3020_p2 = pnand %p3019_p13, %p3013_p8 }
  0x48   : > { %3023 = shalt.err (!%p3020_p2)
}
  0x49   : > { %s3100_s5 = smov 512   ;;  %s3101_s20 = smov 128  }
  0x4a   : > { %s3102_s22 = smov 8   ;;  %p5868_p6 = scmp.ne.s32.totalorder %s5863_s29, 0 }
  0x4b   : > { %2696 = dma.hbm_to_vmem [thread:$0]  (!%p3281_p4), %s3289_s14, 512, %s3291_s25, %s3293_s6, %s3100_s5, %s3101_s20, %s3102_s22  }
  0x4c   : > { %195 = sbr.rel (%p5868_p6) target bundleno = 1217 (0x4c1), region = 36 }
  0x53   : > { %s3324_s23 = sand.u32 1, %s3086_s16   ;;  %p5869_p12 = scmp.ne.s32.totalorder %s5860_s26, 0 }
  0x54   : > { %s2516_s30 = sshll.u32 %s3324_s23, 5  ;;  %s198_s8 = scalar_lea.sflag [#allocation4], %s3324_s23 }
  0x55   : > { %s3330_s11 = scalar_lea.vmem [#allocation3], %s2516_s30 }
  0x56   : > { %3069 = dma.done.wait (%p5869_p12), %s198_s8, 512  }
  0x57   : > { %3071 = vsyncadd (%p5869_p12), %s198_s8, 4294966784  ;;  %p5870_p4 = scmp.eq.s32.totalorder %s3208_s19, 0 }
  0x59   : > { %3073 = dma.done.wait (%p5870_p4), [#allocation7], 1536   ;;  %p5871_p0 = pmov %p5870_p4 }
  0x5a   : > { %v3103_v0 = vmov 0   ;;  %v3345_v1 = vld [vmem:[%s5658_s1 + $0x10] sm:$0xff]  ;;  %v3350_v2 = vld [vmem:[%s5658_s1] sm:$0xff]  ;;  %v3357_v3 = vld [vmem:[%s5658_s1 + $0x18] sm:$0xff]  ;;  %v3104_v6 = vmov 1   ;;  %v3105_v7 = vmov 2  }
  0x5b   : > { %3075 = vsyncadd (%p5871_p0), [#allocation7], 4294965760  ;;  %2802 = vset.pattern.permute.xlu1 %v3103_v0  ;;  %2801 = vset.pattern.permute.xlu0 %v3103_v0  ;;  %v3362_v4 = vld [vmem:[%s5658_s1 + $0x8] sm:$0xff]  ;;  %v3383_v8 = vld [vmem:[%s5659_s2] sm:$0xff]  ;;  %v3106_v10 = vmov 3   ;;  %v3107_v11 = vmov 4  }
  0x5c   : > { %282 = vperm.xlu1 %2802, %v3345_v1   ;;  %272 = vperm.xlu0 %2801, %v3350_v2   ;;  %v3369_v5 = vld [vmem:[%s5659_s2 + $0x8] sm:$0xff]  ;;  %v3390_v9 = vld [vmem:[%s5659_s2 + $0x18] sm:$0xff]  ;;  %v3108_v12 = vmov 5   ;;  %v3109_v13 = vmov 6   ;;  %v3110_v14 = vmov 7   ;;  %v3111_v15 = vmov 8  }
  0x5d   : > { %v3112_v16 = vmov 9   ;;  %v3113_v17 = vmov 10   ;;  %v3114_v18 = vmov 11   ;;  %v3464_v20 = vld [vmem:[%s5659_s2 + $0x10] sm:$0xff]  ;;  %v3115_v30 = vmov 12   ;;  %s2572_s25 = sshll.u32 %s3208_s19, 7 }
  0x5e   : > { %v3116_v32 = vmov 13   ;;  %v5680_v37 = vmov 14   ;;  %v5678_v40 = vmov 15   ;;  %v5677_v44 = vmov 16   ;;  %s5614_s7 = scalar_lea.hbm %s5661_s4, %s2572_s25  ;;  %p6393_p9 = scmp.ne.s32.totalorder %s5861_s27, 0 }
  0x5f   : > { %v5675_v47 = vmov 17   ;;  %v5674_v52 = vmov 18   ;;  %v5672_v55 = vmov 19   ;;  %v5671_v60 = vmov 20   ;;  %s3158_s10 = smov [#allocation8]  }
  0x60   : > { %287 = vperm.xlu1 %2802, %v3357_v3   ;;  %277 = vperm.xlu0 %2801, %v3362_v4   ;;  %v5669_v63 = vmov 21   ;;  %s3028_s12 = sshll.u32 %s3158_s10, 4  ;;  %s3029_s12 = int_to_ptr.vmem [resolvable:$false] %s3028_s12 }
  0x61   : > { %s3030_s13 = scalar_lea.vmem %s3029_s12, 1024 }
  0x64   : > { %2803 = vset.pattern.permute.xlu1 %v3104_v6  ;;  %701 = vperm.xlu0 %2801, %v3369_v5  }
  0x65   : > { %299 = vperm.xlu1 %2803, %v3362_v4  }
  0x68   : > { %2815 = vset.pattern.permute.xlu0 %v3104_v6 }
  0x69   : > { %303 = vperm.xlu1 %2803, %v3345_v1   ;;  %295 = vperm.xlu0 %2815, %v3350_v2  }
  0x6d   : > { %2804 = vset.pattern.permute.xlu1 %v3105_v7  ;;  %307 = vperm.xlu0 %2815, %v3357_v3  }
  0x6e   : > { %331 = vperm.xlu1 %2804, %v3350_v2  }
  0x71   : > { %727 = vperm.xlu0 %2815, %v3383_v8  }
  0x72   : > { %339 = vperm.xlu1 %2804, %v3345_v1  }
  0x75   : > { %739 = vperm.xlu0 %2815, %v3390_v9  }
  0x76   : > { %343 = vperm.xlu1 %2804, %v3357_v3  }
  0x79   : > { %2817 = vset.pattern.permute.xlu0 %v3105_v7 }
  0x7a   : > { %2805 = vset.pattern.permute.xlu1 %v3106_v10  ;;  %335 = vperm.xlu0 %2817, %v3362_v4  }
  0x7b   : > { %371 = vperm.xlu1 %2805, %v3362_v4  }
  0x7e   : > { %763 = vperm.xlu0 %2817, %v3369_v5  }
  0x7f   : > { %375 = vperm.xlu1 %2805, %v3345_v1  }
  0x82   : > { %2819 = vset.pattern.permute.xlu0 %v3106_v10 }
  0x83   : > { %2806 = vset.pattern.permute.xlu1 %v3107_v11  ;;  %367 = vperm.xlu0 %2819, %v3350_v2  }
  0x84   : > { %403 = vperm.xlu1 %2806, %v3350_v2  }
  0x87   : > { %379 = vperm.xlu0 %2819, %v3357_v3  }
  0x88   : > { %411 = vperm.xlu1 %2806, %v3345_v1  }
  0x8b   : > { %787 = vperm.xlu0 %2819, %v3383_v8  }
  0x8c   : > { %415 = vperm.xlu1 %2806, %v3357_v3  }
  0x8f   : > { %799 = vperm.xlu0 %2819, %v3390_v9  }
  0x90   : > { %2807 = vset.pattern.permute.xlu1 %v3108_v12 }
  0x91   : > { %443 = vperm.xlu1 %2807, %v3362_v4  }
  0x93   : > { %2821 = vset.pattern.permute.xlu0 %v3107_v11 }
  0x94   : > { %407 = vperm.xlu0 %2821, %v3362_v4  }
  0x95   : > { %447 = vperm.xlu1 %2807, %v3345_v1  }
  0x98   : > { %819 = vperm.xlu0 %2821, %v3369_v5  }
  0x99   : > { %2808 = vset.pattern.permute.xlu1 %v3109_v13 }
  0x9a   : > { %475 = vperm.xlu1 %2808, %v3350_v2  }
  0x9c   : > { %2823 = vset.pattern.permute.xlu0 %v3108_v12 }
  0x9d   : > { %439 = vperm.xlu0 %2823, %v3350_v2  }
  0x9e   : > { %483 = vperm.xlu1 %2808, %v3345_v1  }
  0xa1   : > { %451 = vperm.xlu0 %2823, %v3357_v3  }
  0xa2   : > { %487 = vperm.xlu1 %2808, %v3357_v3  }
  0xa5   : > { %843 = vperm.xlu0 %2823, %v3383_v8  }
  0xa6   : > { %2809 = vset.pattern.permute.xlu1 %v3110_v14 }
  0xa7   : > { %515 = vperm.xlu1 %2809, %v3362_v4  }
  0xa9   : > { %855 = vperm.xlu0 %2823, %v3390_v9  }
  0xab   : > { %519 = vperm.xlu1 %2809, %v3345_v1  }
  0xad   : > { %2825 = vset.pattern.permute.xlu0 %v3109_v13 }
  0xae   : > { %479 = vperm.xlu0 %2825, %v3362_v4  }
  0xaf   : > { %2810 = vset.pattern.permute.xlu1 %v3111_v15 }
  0xb0   : > { %547 = vperm.xlu1 %2810, %v3350_v2  }
  0xb2   : > { %875 = vperm.xlu0 %2825, %v3369_v5  }
  0xb4   : > { %555 = vperm.xlu1 %2810, %v3345_v1  }
  0xb6   : > { %2827 = vset.pattern.permute.xlu0 %v3110_v14 }
  0xb7   : > { %511 = vperm.xlu0 %2827, %v3350_v2  }
  0xb8   : > { %559 = vperm.xlu1 %2810, %v3357_v3  }
  0xbb   : > { %523 = vperm.xlu0 %2827, %v3357_v3  }
  0xbc   : > { %2811 = vset.pattern.permute.xlu1 %v3112_v16 }
  0xbd   : > { %587 = vperm.xlu1 %2811, %v3362_v4  }
  0xbf   : > { %899 = vperm.xlu0 %2827, %v3383_v8  }
  0xc1   : > { %591 = vperm.xlu1 %2811, %v3345_v1  }
  0xc3   : > { %911 = vperm.xlu0 %2827, %v3390_v9  }
  0xc5   : > { %2812 = vset.pattern.permute.xlu1 %v3113_v17 }
  0xc6   : > { %619 = vperm.xlu1 %2812, %v3350_v2  }
  0xc7   : > { %2829 = vset.pattern.permute.xlu0 %v3111_v15 }
  0xc8   : > { %551 = vperm.xlu0 %2829, %v3362_v4  }
  0xca   : > { %627 = vperm.xlu1 %2812, %v3345_v1  }
  0xcc   : > { %931 = vperm.xlu0 %2829, %v3369_v5  }
  0xce   : > { %631 = vperm.xlu1 %2812, %v3357_v3  }
  0xd0   : > { %2831 = vset.pattern.permute.xlu0 %v3112_v16 }
  0xd1   : > { %583 = vperm.xlu0 %2831, %v3350_v2  }
  0xd2   : > { %2813 = vset.pattern.permute.xlu1 %v3114_v18 }
  0xd3   : > { %659 = vperm.xlu1 %2813, %v3362_v4  }
  0xd5   : > { %595 = vperm.xlu0 %2831, %v3357_v3  }
  0xd7   : > { %663 = vperm.xlu1 %2813, %v3345_v1  }
  0xd9   : > { %955 = vperm.xlu0 %2831, %v3383_v8  }
  0xdb   : > { %v3456_v19 = vpop.permute.xlu1 %282  ;;  %2814 = vset.pattern.permute.xlu1 %v3103_v0  ;;  %v3490_v26 = vpop.permute.xlu0 %272 }
  0xdc   : > { %5872 = vst [vmem:[#allocation12_spill] sm:$0xff] %v3456_v19  ;;  %696 = vperm.xlu1 %2814, %v3383_v8  }
  0xdd   : > { %967 = vperm.xlu0 %2831, %v3390_v9  }
  0xdf   : > { %v3466_v21 = vpop.permute.xlu1 %287  ;;  %v3499_v29 = vpop.permute.xlu0 %277 }
  0xe0   : > { %5873 = vst [vmem:[#allocation13_spill] sm:$0xff] %v3466_v21  ;;  %706 = vperm.xlu1 %2814, %v3464_v20   ;;  %v5707_v21 = vmov 39  }
  0xe1   : > { %2833 = vset.pattern.permute.xlu0 %v3113_v17 }
  0xe2   : > { %623 = vperm.xlu0 %2833, %v3362_v4  }
  0xe3   : > { %v3508_v33 = vpop.permute.xlu0 %701 }
  0xe4   : > { %v3471_v22 = vpop.permute.xlu1 %299  ;;  %711 = vperm.xlu1 %2814, %v3390_v9  }
  0xe5   : > { %5874 = vst [vmem:[#allocation14_spill] sm:$0xff] %v3471_v22 }
  0xe6   : > { %987 = vperm.xlu0 %2833, %v3369_v5  }
  0xe8   : > { %v3475_v23 = vpop.permute.xlu1 %303  ;;  %2816 = vset.pattern.permute.xlu1 %v3104_v6  ;;  %v3515_v35 = vpop.permute.xlu0 %295 }
  0xe9   : > { %5875 = vst [vmem:[#allocation15_spill] sm:$0xff] %v3475_v23  ;;  %731 = vperm.xlu1 %2816, %v3369_v5  }
  0xea   : > { %2835 = vset.pattern.permute.xlu0 %v3114_v18 }
  0xeb   : > { %655 = vperm.xlu0 %2835, %v3350_v2  }
  0xec   : > { %v3526_v39 = vpop.permute.xlu0 %307 }
  0xed   : > { %735 = vperm.xlu1 %2816, %v3464_v20   ;;  %v3482_v24 = vpop.permute.xlu1 %331  ;;  %5879 = vst [vmem:[#allocation19_spill] sm:$0xff] %v3526_v39  ;;  %v5712_v39 = vmov 33  }
  0xef   : > { %667 = vperm.xlu0 %2835, %v3357_v3   ;;  %v5668_v3 = vmov 22  }
  0xf0   : > { %v3533_v42 = vpop.permute.xlu0 %727 }
  0xf1   : > { %2818 = vset.pattern.permute.xlu1 %v3105_v7  ;;  %v3486_v25 = vpop.permute.xlu1 %339  ;;  %v5666_v7 = vmov 23  }
  0xf2   : > { %5876 = vst [vmem:[#allocation16_spill] sm:$0xff] %v3486_v25  ;;  %759 = vperm.xlu1 %2818, %v3383_v8  }
  0xf3   : > { %1011 = vperm.xlu0 %2835, %v3383_v8  }
  0xf4   : > { %v3542_v45 = vpop.permute.xlu0 %739 }
  0xf5   : > { %v3492_v27 = vpop.permute.xlu1 %343  ;;  %5880 = vst [vmem:[#allocation20_spill] sm:$0xff] %v3542_v45  ;;  %v5918_v45 = vmov 18  }
  0xf6   : > { %5877 = vst [vmem:[#allocation17_spill] sm:$0xff] %v3492_v27  ;;  %767 = vperm.xlu1 %2818, %v3464_v20  }
  0xf7   : > { %1023 = vperm.xlu0 %2835, %v3390_v9  }
  0xf9   : > { %v3553_v49 = vpop.permute.xlu0 %335 }
  0xfa   : > { %771 = vperm.xlu1 %2818, %v3390_v9   ;;  %v3497_v28 = vpop.permute.xlu1 %371  ;;  %5881 = vst [vmem:[#allocation21_spill] sm:$0xff] %v3553_v49 }
  0xfb   : > { %5878 = vst [vmem:[#allocation18_spill] sm:$0xff] %v3497_v28  ;;  %2838 = vset.pattern.permute.xlu0 %v3115_v30 }
  0xfc   : > { %1043 = vperm.xlu0 %2838, %v3369_v5  }
  0xfd   : > { %v3559_v51 = vpop.permute.xlu0 %763 }
  0xfe   : > { %2820 = vset.pattern.permute.xlu1 %v3106_v10  ;;  %v3504_v31 = vpop.permute.xlu1 %375 }
  0xff   : > { %791 = vperm.xlu1 %2820, %v3369_v5  }
 0x100   : > { %2839 = vset.pattern.permute.xlu0 %v3116_v32 }
 0x101   : > { %1067 = vperm.xlu0 %2839, %v3383_v8  }
 0x102   : > { %v3570_v56 = vpop.permute.xlu0 %367 }
 0x103   : > { %795 = vperm.xlu1 %2820, %v3464_v20   ;;  %v3512_v34 = vpop.permute.xlu1 %403 }
 0x105   : > { %1079 = vperm.xlu0 %2839, %v3390_v9  }
 0x106   : > { %v3578_v58 = vpop.permute.xlu0 %379 }
 0x107   : > { %2822 = vset.pattern.permute.xlu1 %v3107_v11  ;;  %v3518_v36 = vpop.permute.xlu1 %411  ;;  %5884 = vst [vmem:[#allocation24_spill] sm:$0xff] %v3578_v58 }
 0x108   : > { %815 = vperm.xlu1 %2822, %v3383_v8  }
 0x109   : > { %2842 = vset.pattern.permute.xlu0 %v5680_v37 }
 0x10a   : > { %1099 = vperm.xlu0 %2842, %v3369_v5   ;;  %v3586_v61 = vpop.permute.xlu0 %787 }
 0x10b   : > { %v3523_v38 = vpop.permute.xlu1 %415 }
 0x10c   : > { %823 = vperm.xlu1 %2822, %v3464_v20  }
 0x10e   : > { %2843 = vset.pattern.permute.xlu0 %v5678_v40  ;;  %v3595_v1 = vpop.permute.xlu0 %799 }
 0x10f   : > { %1123 = vperm.xlu0 %2843, %v3383_v8   ;;  %5888 = vst [vmem:[#allocation28_spill] sm:$0xff] %v3595_v1 }
 0x110   : > { %827 = vperm.xlu1 %2822, %v3390_v9   ;;  %v3531_v41 = vpop.permute.xlu1 %443 }
 0x113   : > { %1135 = vperm.xlu0 %2843, %v3390_v9   ;;  %v3604_v4 = vpop.permute.xlu0 %407 }
 0x114   : > { %2824 = vset.pattern.permute.xlu1 %v3108_v12  ;;  %v3537_v43 = vpop.permute.xlu1 %447 }
 0x115   : > { %847 = vperm.xlu1 %2824, %v3369_v5  }
 0x117   : > { %2846 = vset.pattern.permute.xlu0 %v5677_v44  ;;  %v3612_v10 = vpop.permute.xlu0 %819  ;;  %v5683_v44 = vmov 29  }
 0x118   : > { %1155 = vperm.xlu0 %2846, %v3369_v5   ;;  %5891 = vst [vmem:[#allocation31_spill] sm:$0xff] %v3612_v10 }
 0x119   : > { %851 = vperm.xlu1 %2824, %v3464_v20   ;;  %v3545_v46 = vpop.permute.xlu1 %475 }
 0x11c   : > { %2847 = vset.pattern.permute.xlu0 %v5675_v47 }
 0x11d   : > { %2826 = vset.pattern.permute.xlu1 %v3109_v13  ;;  %v3549_v48 = vpop.permute.xlu1 %483  ;;  %1179 = vperm.xlu0 %2847, %v3383_v8   ;;  %v3621_v13 = vpop.permute.xlu0 %439 }
 0x11e   : > { %871 = vperm.xlu1 %2826, %v3383_v8  }
 0x121   : > { %v3555_v50 = vpop.permute.xlu1 %487  ;;  %1191 = vperm.xlu0 %2847, %v3390_v9  }
 0x122   : > { %879 = vperm.xlu1 %2826, %v3464_v20  }
 0x125   : > { %2850 = vset.pattern.permute.xlu0 %v5674_v52 }
 0x126   : > { %883 = vperm.xlu1 %2826, %v3390_v9   ;;  %v3563_v53 = vpop.permute.xlu1 %515  ;;  %1211 = vperm.xlu0 %2850, %v3369_v5  }
 0x12a   : > { %2828 = vset.pattern.permute.xlu1 %v3110_v14  ;;  %v3567_v54 = vpop.permute.xlu1 %519  ;;  %2851 = vset.pattern.permute.xlu0 %v5672_v55  ;;  %v5667_v14 = vmov 24  }
 0x12b   : > { %5882 = vst [vmem:[#allocation22_spill] sm:$0xff] %v3567_v54  ;;  %903 = vperm.xlu1 %2828, %v3369_v5   ;;  %1235 = vperm.xlu0 %2851, %v3383_v8  }
 0x12f   : > { %907 = vperm.xlu1 %2828, %v3464_v20   ;;  %v3575_v57 = vpop.permute.xlu1 %547  ;;  %1247 = vperm.xlu0 %2851, %v3390_v9  }
 0x130   : > { %5883 = vst [vmem:[#allocation23_spill] sm:$0xff] %v3575_v57 }
 0x133   : > { %2830 = vset.pattern.permute.xlu1 %v3111_v15  ;;  %v3581_v59 = vpop.permute.xlu1 %555  ;;  %2854 = vset.pattern.permute.xlu0 %v5671_v60  ;;  %v5676_v60 = vmov 27  }
 0x134   : > { %5885 = vst [vmem:[#allocation25_spill] sm:$0xff] %v3581_v59  ;;  %927 = vperm.xlu1 %2830, %v3383_v8   ;;  %1267 = vperm.xlu0 %2854, %v3369_v5   ;;  %v5924_v59 = vmov 20  }
 0x137   : > { %v3588_v62 = vpop.permute.xlu1 %559 }
 0x138   : > { %5886 = vst [vmem:[#allocation26_spill] sm:$0xff] %v3588_v62  ;;  %935 = vperm.xlu1 %2830, %v3464_v20   ;;  %2855 = vset.pattern.permute.xlu0 %v5669_v63  ;;  %v5673_v63 = vmov 26   ;;  %v5922_v62 = vmov 19  }
 0x139   : > { %1287 = vperm.xlu0 %2855, %v3383_v8  }
 0x13c   : > { %v3593_v0 = vpop.permute.xlu1 %587  ;;  %939 = vperm.xlu1 %2830, %v3390_v9  }
 0x13d   : > { %5887 = vst [vmem:[#allocation27_spill] sm:$0xff] %v3593_v0  ;;  %1299 = vperm.xlu0 %2855, %v3390_v9   ;;  %v5909_v0 = vmov 15  }
 0x140   : > { %v3599_v2 = vpop.permute.xlu1 %591  ;;  %2832 = vset.pattern.permute.xlu1 %v3112_v16  ;;  %v3629_v16 = vpop.permute.xlu0 %451 }
 0x141   : > { %5889 = vst [vmem:[#allocation29_spill] sm:$0xff] %v3599_v2  ;;  %959 = vperm.xlu1 %2832, %v3369_v5   ;;  %2858 = vset.pattern.permute.xlu0 %v5668_v3 }
 0x142   : > { %1319 = vperm.xlu0 %2858, %v3369_v5  }
 0x145   : > { %v3607_v6 = vpop.permute.xlu1 %619  ;;  %963 = vperm.xlu1 %2832, %v3464_v20  }
 0x146   : > { %5890 = vst [vmem:[#allocation30_spill] sm:$0xff] %v3607_v6  ;;  %2859 = vset.pattern.permute.xlu0 %v5666_v7 }
 0x147   : > { %1339 = vperm.xlu0 %2859, %v3383_v8  }
 0x149   : > { %v3614_v11 = vpop.permute.xlu1 %627  ;;  %2834 = vset.pattern.permute.xlu1 %v3113_v17  ;;  %v5670_v17 = vmov 25  }
 0x14a   : > { %5892 = vst [vmem:[#allocation32_spill] sm:$0xff] %v3614_v11  ;;  %983 = vperm.xlu1 %2834, %v3383_v8  }
 0x14b   : > { %1351 = vperm.xlu0 %2859, %v3390_v9  }
 0x14d   : > { %v3619_v12 = vpop.permute.xlu1 %631 }
 0x14e   : > { %5893 = vst [vmem:[#allocation33_spill] sm:$0xff] %v3619_v12  ;;  %991 = vperm.xlu1 %2834, %v3464_v20  }
 0x14f   : > { %2862 = vset.pattern.permute.xlu0 %v5667_v14  ;;  %v3638_v14 = vpop.permute.xlu0 %843 }
 0x150   : > { %1371 = vperm.xlu0 %2862, %v3369_v5  }
 0x152   : > { %v3626_v15 = vpop.permute.xlu1 %659  ;;  %995 = vperm.xlu1 %2834, %v3390_v9  }
 0x153   : > { %5894 = vst [vmem:[#allocation34_spill] sm:$0xff] %v3626_v15 }
 0x154   : > { %2863 = vset.pattern.permute.xlu0 %v5670_v17 }
 0x155   : > { %1391 = vperm.xlu0 %2863, %v3383_v8  }
 0x156   : > { %v3633_v7 = vpop.permute.xlu1 %663  ;;  %2836 = vset.pattern.permute.xlu1 %v3114_v18  ;;  %v3648_v18 = vpop.permute.xlu0 %855 }
 0x157   : > { %5895 = vst [vmem:[#allocation35_spill] sm:$0xff] %v3633_v7  ;;  %1015 = vperm.xlu1 %2836, %v3369_v5   ;;  %5898 = vst [vmem:[#allocation38_spill] sm:$0xff] %v3648_v18  ;;  %v5904_v7 = vmov 14  }
 0x159   : > { %1403 = vperm.xlu0 %2863, %v3390_v9  }
 0x15b   : > { %v3640_v3 = vpop.permute.xlu1 %696  ;;  %1019 = vperm.xlu1 %2836, %v3464_v20  }
 0x15c   : > { %5896 = vst [vmem:[#allocation36_spill] sm:$0xff] %v3640_v3  ;;  %v5724_v3 = vmov 42  }
 0x15d   : > { %2866 = vset.pattern.permute.xlu0 %v5673_v63  ;;  %v3656_v63 = vpop.permute.xlu0 %479 }
 0x15e   : > { %1423 = vperm.xlu0 %2866, %v3369_v5  }
 0x15f   : > { %v3645_v17 = vpop.permute.xlu1 %706  ;;  %2837 = vset.pattern.permute.xlu1 %v3115_v30  ;;  %v5679_v30 = vmov 28  }
 0x160   : > { %5897 = vst [vmem:[#allocation37_spill] sm:$0xff] %v3645_v17  ;;  %1039 = vperm.xlu1 %2837, %v3383_v8   ;;  %v5691_v17 = vmov 32  }
 0x162   : > { %2867 = vset.pattern.permute.xlu0 %v5676_v60  ;;  %v3665_v60 = vpop.permute.xlu0 %875 }
 0x163   : > { %v3652_v55 = vpop.permute.xlu1 %711  ;;  %1443 = vperm.xlu0 %2867, %v3383_v8  }
 0x164   : > { %5899 = vst [vmem:[#allocation39_spill] sm:$0xff] %v3652_v55  ;;  %1047 = vperm.xlu1 %2837, %v3464_v20  }
 0x167   : > { %1455 = vperm.xlu0 %2867, %v3390_v9  }
 0x168   : > { %v3659_v52 = vpop.permute.xlu1 %731  ;;  %1051 = vperm.xlu1 %2837, %v3390_v9  }
 0x169   : > { %5900 = vst [vmem:[#allocation40_spill] sm:$0xff] %v3659_v52  ;;  %v5715_v52 = vmov 49  }
 0x16b   : > { %2870 = vset.pattern.permute.xlu0 %v5679_v30  ;;  %v3675_v30 = vpop.permute.xlu0 %511 }
 0x16c   : > { %v3663_v47 = vpop.permute.xlu1 %735  ;;  %2840 = vset.pattern.permute.xlu1 %v3116_v32  ;;  %1475 = vperm.xlu0 %2870, %v3369_v5  }
 0x16d   : > { %5901 = vst [vmem:[#allocation41_spill] sm:$0xff] %v3663_v47  ;;  %1071 = vperm.xlu1 %2840, %v3369_v5  }
 0x16f   : > { %v3682_v32 = vpop.permute.xlu0 %523 }
 0x170   : > { %2871 = vset.pattern.permute.xlu0 %v5683_v44  ;;  %5905 = vst [vmem:[#allocation44_spill] sm:$0xff] %v3682_v32  ;;  %v5688_v44 = vmov 30  }
 0x171   : > { %v3671_v40 = vpop.permute.xlu1 %759  ;;  %1075 = vperm.xlu1 %2840, %v3464_v20   ;;  %1495 = vperm.xlu0 %2871, %v3383_v8  }
 0x172   : > { %5902 = vst [vmem:[#allocation42_spill] sm:$0xff] %v3671_v40  ;;  %v5720_v40 = vmov 34  }
 0x173   : > { %v3691_v11 = vpop.permute.xlu0 %899 }
 0x175   : > { %v3677_v37 = vpop.permute.xlu1 %767  ;;  %2841 = vset.pattern.permute.xlu1 %v5904_v7  ;;  %1507 = vperm.xlu0 %2871, %v3390_v9   ;;  %v5690_v7 = vmov 31  }
 0x176   : > { %5903 = vst [vmem:[#allocation43_spill] sm:$0xff] %v3677_v37  ;;  %1095 = vperm.xlu1 %2841, %v3383_v8   ;;  %v5692_v37 = vmov 45  }
 0x179   : > { %v3684_v15 = vpop.permute.xlu1 %771  ;;  %2874 = vset.pattern.permute.xlu0 %v5688_v44  ;;  %v3701_v44 = vpop.permute.xlu0 %911 }
 0x17a   : > { %5906 = vst [vmem:[#allocation45_spill] sm:$0xff] %v3684_v15  ;;  %1103 = vperm.xlu1 %2841, %v3464_v20   ;;  %1527 = vperm.xlu0 %2874, %v3369_v5  }
 0x17e   : > { %v3689_v12 = vpop.permute.xlu1 %791  ;;  %1107 = vperm.xlu1 %2841, %v3390_v9   ;;  %2875 = vset.pattern.permute.xlu0 %v5690_v7  ;;  %v3708_v7 = vpop.permute.xlu0 %551 }
 0x17f   : > { %5907 = vst [vmem:[#allocation46_spill] sm:$0xff] %v3689_v12  ;;  %1547 = vperm.xlu0 %2875, %v3383_v8   ;;  %5911 = vst [vmem:[#allocation49_spill] sm:$0xff] %v3708_v7 }
 0x182   : > { %v3696_v6 = vpop.permute.xlu1 %795  ;;  %2844 = vset.pattern.permute.xlu1 %v5909_v0  ;;  %v5912_v0 = vmov 16   ;;  %v3718_v55 = vpop.permute.xlu0 %931 }
 0x183   : > { %5908 = vst [vmem:[#allocation47_spill] sm:$0xff] %v3696_v6  ;;  %1127 = vperm.xlu1 %2844, %v3369_v5   ;;  %1559 = vperm.xlu0 %2875, %v3390_v9   ;;  %v5916_v6 = vmov 17  }
 0x187   : > { %v3703_v2 = vpop.permute.xlu1 %815  ;;  %1131 = vperm.xlu1 %2844, %v3464_v20   ;;  %2878 = vset.pattern.permute.xlu0 %v5691_v17  ;;  %v5694_v17 = vmov 44  }
 0x188   : > { %5910 = vst [vmem:[#allocation48_spill] sm:$0xff] %v3703_v2  ;;  %1579 = vperm.xlu0 %2878, %v3369_v5  }
 0x18b   : > { %v3710_v15 = vpop.permute.xlu1 %823  ;;  %2845 = vset.pattern.permute.xlu1 %v5912_v0  ;;  %v3726_v0 = vpop.permute.xlu0 %583 }
 0x18c   : > { %1151 = vperm.xlu1 %2845, %v3383_v8   ;;  %2880 = vset.pattern.permute.xlu0 %v5692_v37  ;;  %5915 = vst [vmem:[#allocation52_spill] sm:$0xff] %v3726_v0  ;;  %v5697_v37 = vmov 46   ;;  %v5702_v0 = vmov 47  }
 0x18d   : > { %1911 = vperm.xlu0 %2880, %v3383_v8  }
 0x18f   : > { %v3716_v47 = vpop.permute.xlu1 %827 }
 0x190   : > { %5913 = vst [vmem:[#allocation50_spill] sm:$0xff] %v3716_v47  ;;  %1159 = vperm.xlu1 %2845, %v3464_v20  }
 0x191   : > { %2883 = vset.pattern.permute.xlu0 %v5694_v17  ;;  %v3735_v17 = vpop.permute.xlu0 %595 }
 0x192   : > { %1899 = vperm.xlu0 %2883, %v3390_v9   ;;  %5917 = vst [vmem:[#allocation53_spill] sm:$0xff] %v3735_v17 }
 0x194   : > { %v3723_v18 = vpop.permute.xlu1 %847  ;;  %1163 = vperm.xlu1 %2845, %v3390_v9  }
 0x195   : > { %5914 = vst [vmem:[#allocation51_spill] sm:$0xff] %v3723_v18  ;;  %v5718_v18 = vmov 40  }
 0x196   : > { %2885 = vset.pattern.permute.xlu0 %v5697_v37 }
 0x197   : > { %1939 = vperm.xlu0 %2885, %v3383_v8  }
 0x198   : > { %v3730_v47 = vpop.permute.xlu1 %851  ;;  %2848 = vset.pattern.permute.xlu1 %v5916_v6  ;;  %v3745_v6 = vpop.permute.xlu0 %955 }
 0x199   : > { %1183 = vperm.xlu1 %2848, %v3369_v5  }
 0x19b   : > { %1947 = vperm.xlu0 %2885, %v3464_v20  }
 0x19c   : > { %v3752_v23 = vpop.permute.xlu0 %967 }
 0x19d   : > { %v3737_v1 = vpop.permute.xlu1 %871  ;;  %1187 = vperm.xlu1 %2848, %v3464_v20  }
 0x19f   : > { %2891 = vset.pattern.permute.xlu0 %v5702_v0 }
 0x1a0   : > { %1967 = vperm.xlu0 %2891, %v3369_v5   ;;  %v3762_v27 = vpop.permute.xlu0 %623 }
 0x1a1   : > { %v3742_v37 = vpop.permute.xlu1 %879  ;;  %2849 = vset.pattern.permute.xlu1 %v5918_v45  ;;  %5921 = vst [vmem:[#allocation56_spill] sm:$0xff] %v3762_v27 }
 0x1a2   : > { %1207 = vperm.xlu1 %2849, %v3383_v8  }
 0x1a4   : > { %1975 = vperm.xlu0 %2891, %v3390_v9   ;;  %v3771_v19 = vpop.permute.xlu0 %987 }
 0x1a5   : > { %v3749_v17 = vpop.permute.xlu1 %883 }
 0x1a6   : > { %5919 = vst [vmem:[#allocation54_spill] sm:$0xff] %v3749_v17  ;;  %1215 = vperm.xlu1 %2849, %v3464_v20  }
 0x1a8   : > { %2894 = vset.pattern.permute.xlu0 %v5707_v21 }
 0x1a9   : > { %1755 = vperm.xlu0 %2894, %v3383_v8  }
 0x1aa   : > { %v3756_v0 = vpop.permute.xlu1 %903  ;;  %1219 = vperm.xlu1 %2849, %v3390_v9  }
 0x1ab   : > { %5920 = vst [vmem:[#allocation55_spill] sm:$0xff] %v3756_v0 }
 0x1ad   : > { %1763 = vperm.xlu0 %2894, %v3464_v20  }
 0x1ae   : > { %v3760_v45 = vpop.permute.xlu1 %907  ;;  %2852 = vset.pattern.permute.xlu1 %v5922_v62  ;;  %v3778_v62 = vpop.permute.xlu0 %655 }
 0x1af   : > { %1239 = vperm.xlu1 %2852, %v3369_v5   ;;  %5926 = vst [vmem:[#allocation59_spill] sm:$0xff] %v3778_v62  ;;  %v5930_v62 = vmov 21  }
 0x1b1   : > { %2896 = vset.pattern.permute.xlu0 %v5712_v39 }
 0x1b2   : > { %1599 = vperm.xlu0 %2896, %v3383_v8   ;;  %v3786_v10 = vpop.permute.xlu0 %667 }
 0x1b3   : > { %1243 = vperm.xlu1 %2852, %v3464_v20   ;;  %v3769_v21 = vpop.permute.xlu1 %927  ;;  %5928 = vst [vmem:[#allocation61_spill] sm:$0xff] %v3786_v10 }
 0x1b4   : > { %5923 = vst [vmem:[#allocation57_spill] sm:$0xff] %v3769_v21  ;;  %v4049_v21 = vld [vmem:[%s5659_s2 + $0x8] sm:$0xff] }
 0x1b5   : > { %6012 = vst [vmem:[#allocation129_spill] sm:$0xff] %v4049_v21 }
 0x1b6   : > { %1611 = vperm.xlu0 %2896, %v3390_v9   ;;  %v3797_v12 = vpop.permute.xlu0 %1011 }
 0x1b7   : > { %2853 = vset.pattern.permute.xlu1 %v5924_v59  ;;  %v3775_v27 = vpop.permute.xlu1 %935  ;;  %5932 = vst [vmem:[#allocation64_spill] sm:$0xff] %v3797_v12 }
 0x1b8   : > { %5925 = vst [vmem:[#allocation58_spill] sm:$0xff] %v3775_v27  ;;  %1263 = vperm.xlu1 %2853, %v3383_v8   ;;  %v5722_v27 = vmov 35  }
 0x1ba   : > { %2900 = vset.pattern.permute.xlu0 %v5715_v52  ;;  %v3803_v2 = vpop.permute.xlu0 %1023 }
 0x1bb   : > { %v3781_v39 = vpop.permute.xlu1 %939  ;;  %2015 = vperm.xlu0 %2900, %v3383_v8   ;;  %5934 = vst [vmem:[#allocation66_spill] sm:$0xff] %v3803_v2 }
 0x1bc   : > { %5927 = vst [vmem:[#allocation60_spill] sm:$0xff] %v3781_v39  ;;  %1271 = vperm.xlu1 %2853, %v3464_v20  }
 0x1be   : > { %v3814_v39 = vpop.permute.xlu0 %1043 }
 0x1bf   : > { %2023 = vperm.xlu0 %2900, %v3464_v20   ;;  %5938 = vst [vmem:[#allocation69_spill] sm:$0xff] %v3814_v39 }
 0x1c0   : > { %1275 = vperm.xlu1 %2853, %v3390_v9   ;;  %v3789_v59 = vpop.permute.xlu1 %959 }
 0x1c1   : > { %5929 = vst [vmem:[#allocation62_spill] sm:$0xff] %v3789_v59 }
 0x1c3   : > { %2907 = vset.pattern.permute.xlu0 %v5718_v18 }
 0x1c4   : > { %2856 = vset.pattern.permute.xlu1 %v5930_v62  ;;  %v3793_v52 = vpop.permute.xlu1 %963  ;;  %1787 = vperm.xlu0 %2907, %v3369_v5   ;;  %v5935_v62 = vmov 22  }
 0x1c5   : > { %5931 = vst [vmem:[#allocation63_spill] sm:$0xff] %v3793_v52  ;;  %1291 = vperm.xlu1 %2856, %v3369_v5  }
 0x1c8   : > { %1795 = vperm.xlu0 %2907, %v3390_v9  }
 0x1c9   : > { %1295 = vperm.xlu1 %2856, %v3464_v20   ;;  %v3801_v10 = vpop.permute.xlu1 %983 }
 0x1ca   : > { %5933 = vst [vmem:[#allocation65_spill] sm:$0xff] %v3801_v10 }
 0x1cc   : > { %2910 = vset.pattern.permute.xlu0 %v5720_v40  ;;  %v3822_v40 = vpop.permute.xlu0 %1067 }
 0x1cd   : > { %2857 = vset.pattern.permute.xlu1 %v5935_v62  ;;  %v3807_v18 = vpop.permute.xlu1 %991  ;;  %1627 = vperm.xlu0 %2910, %v3383_v8   ;;  %5940 = vst [vmem:[#allocation71_spill] sm:$0xff] %v3822_v40  ;;  %v5945_v40 = vmov 24  }
 0x1ce   : > { %5936 = vst [vmem:[#allocation67_spill] sm:$0xff] %v3807_v18  ;;  %1315 = vperm.xlu1 %2857, %v3383_v8   ;;  %v5941_v18 = vmov 23  }
 0x1d0   : > { %v3829_v39 = vpop.permute.xlu0 %1079 }
 0x1d1   : > { %v3811_v52 = vpop.permute.xlu1 %995  ;;  %1635 = vperm.xlu0 %2910, %v3464_v20   ;;  %5943 = vst [vmem:[#allocation73_spill] sm:$0xff] %v3829_v39  ;;  %v5728_v39 = vmov 51  }
 0x1d2   : > { %5937 = vst [vmem:[#allocation68_spill] sm:$0xff] %v3811_v52  ;;  %1323 = vperm.xlu1 %2857, %v3464_v20  }
 0x1d4   : > { %v3840_v0 = vpop.permute.xlu0 %1099 }
 0x1d5   : > { %2912 = vset.pattern.permute.xlu0 %v5722_v27  ;;  %5947 = vst [vmem:[#allocation76_spill] sm:$0xff] %v3840_v0 }
 0x1d6   : > { %1327 = vperm.xlu1 %2857, %v3390_v9   ;;  %v3819_v62 = vpop.permute.xlu1 %1015  ;;  %1655 = vperm.xlu0 %2912, %v3369_v5  }
 0x1d7   : > { %5939 = vst [vmem:[#allocation70_spill] sm:$0xff] %v3819_v62 }
 0x1da   : > { %2860 = vset.pattern.permute.xlu1 %v5941_v18  ;;  %v3825_v52 = vpop.permute.xlu1 %1019  ;;  %1663 = vperm.xlu0 %2912, %v3390_v9  }
 0x1db   : > { %5942 = vst [vmem:[#allocation72_spill] sm:$0xff] %v3825_v52  ;;  %1343 = vperm.xlu1 %2860, %v3369_v5   ;;  %v5726_v52 = vmov 50  }
 0x1de   : > { %2918 = vset.pattern.permute.xlu0 %v5724_v3 }
 0x1df   : > { %1347 = vperm.xlu1 %2860, %v3464_v20   ;;  %v3833_v27 = vpop.permute.xlu1 %1039  ;;  %1839 = vperm.xlu0 %2918, %v3369_v5  }
 0x1e0   : > { %5944 = vst [vmem:[#allocation74_spill] sm:$0xff] %v3833_v27  ;;  %v5730_v27 = vmov 43  }
 0x1e3   : > { %2861 = vset.pattern.permute.xlu1 %v5945_v40  ;;  %v3837_v18 = vpop.permute.xlu1 %1047  ;;  %2920 = vset.pattern.permute.xlu0 %v5726_v52  ;;  %v3849_v40 = vpop.permute.xlu0 %1123 }
 0x1e4   : > { %5946 = vst [vmem:[#allocation75_spill] sm:$0xff] %v3837_v18  ;;  %1367 = vperm.xlu1 %2861, %v3383_v8   ;;  %2051 = vperm.xlu0 %2920, %v3464_v20   ;;  %5949 = vst [vmem:[#allocation78_spill] sm:$0xff] %v3849_v40  ;;  %v5952_v18 = vmov 25  }
 0x1e7   : > { %v3844_v3 = vpop.permute.xlu1 %1051  ;;  %v3855_v0 = vpop.permute.xlu0 %1135 }
 0x1e8   : > { %5948 = vst [vmem:[#allocation77_spill] sm:$0xff] %v3844_v3  ;;  %1375 = vperm.xlu1 %2861, %v3464_v20   ;;  %2921 = vset.pattern.permute.xlu0 %v5728_v39  ;;  %5951 = vst [vmem:[#allocation80_spill] sm:$0xff] %v3855_v0 }
 0x1e9   : > { %2067 = vperm.xlu0 %2921, %v3383_v8  }
 0x1eb   : > { %v3866_v40 = vpop.permute.xlu0 %1155 }
 0x1ec   : > { %1379 = vperm.xlu1 %2861, %v3390_v9   ;;  %v3852_v52 = vpop.permute.xlu1 %1071  ;;  %5955 = vst [vmem:[#allocation83_spill] sm:$0xff] %v3866_v40  ;;  %v5734_v40 = vmov 37  }
 0x1ed   : > { %5950 = vst [vmem:[#allocation79_spill] sm:$0xff] %v3852_v52  ;;  %2079 = vperm.xlu0 %2921, %v3390_v9   ;;  %v5732_v52 = vmov 36  }
 0x1f0   : > { %2864 = vset.pattern.permute.xlu1 %v5952_v18  ;;  %v3858_v3 = vpop.permute.xlu1 %1075  ;;  %v5956_v18 = vmov 26  }
 0x1f1   : > { %5953 = vst [vmem:[#allocation81_spill] sm:$0xff] %v3858_v3  ;;  %1395 = vperm.xlu1 %2864, %v3369_v5   ;;  %2925 = vset.pattern.permute.xlu0 %v5730_v27  ;;  %v3875_v27 = vpop.permute.xlu0 %1179 }
 0x1f2   : > { %1867 = vperm.xlu0 %2925, %v3464_v20   ;;  %5958 = vst [vmem:[#allocation85_spill] sm:$0xff] %v3875_v27  ;;  %v5962_v27 = vmov 27  }
 0x1f5   : > { %1399 = vperm.xlu1 %2864, %v3464_v20   ;;  %v3864_v39 = vpop.permute.xlu1 %1095 }
 0x1f6   : > { %5954 = vst [vmem:[#allocation82_spill] sm:$0xff] %v3864_v39  ;;  %2928 = vset.pattern.permute.xlu0 %v5732_v52  ;;  %v3882_v52 = vpop.permute.xlu0 %1191  ;;  %v5736_v39 = vmov 52  }
 0x1f7   : > { %1683 = vperm.xlu0 %2928, %v3369_v5   ;;  %5960 = vst [vmem:[#allocation87_spill] sm:$0xff] %v3882_v52 }
 0x1f9   : > { %2865 = vset.pattern.permute.xlu1 %v5956_v18  ;;  %v3871_v0 = vpop.permute.xlu1 %1103 }
 0x1fa   : > { %5957 = vst [vmem:[#allocation84_spill] sm:$0xff] %v3871_v0  ;;  %1419 = vperm.xlu1 %2865, %v3383_v8  }
 0x1fb   : > { %1687 = vperm.xlu0 %2928, %v3464_v20  }
 0x1fd   : > { %v3877_v3 = vpop.permute.xlu1 %1107 }
 0x1fe   : > { %5959 = vst [vmem:[#allocation86_spill] sm:$0xff] %v3877_v3  ;;  %1427 = vperm.xlu1 %2865, %v3464_v20  }
 0x1ff   : > { %2931 = vset.pattern.permute.xlu0 %v5734_v40  ;;  %v3893_v40 = vpop.permute.xlu0 %1211 }
 0x200   : > { %1711 = vperm.xlu0 %2931, %v3464_v20   ;;  %5964 = vst [vmem:[#allocation90_spill] sm:$0xff] %v3893_v40 }
 0x202   : > { %1431 = vperm.xlu1 %2865, %v3390_v9   ;;  %v3885_v18 = vpop.permute.xlu1 %1127 }
 0x203   : > { %5961 = vst [vmem:[#allocation88_spill] sm:$0xff] %v3885_v18  ;;  %v5738_v18 = vmov 53  }
 0x204   : > { %2934 = vset.pattern.permute.xlu0 %v5736_v39  ;;  %v3900_v39 = vpop.permute.xlu0 %1235 }
 0x205   : > { %2099 = vperm.xlu0 %2934, %v3369_v5   ;;  %5966 = vst [vmem:[#allocation92_spill] sm:$0xff] %v3900_v39  ;;  %v5974_v39 = vmov 30  }
 0x206   : > { %2868 = vset.pattern.permute.xlu1 %v5962_v27  ;;  %v3890_v3 = vpop.permute.xlu1 %1131  ;;  %v5967_v27 = vmov 28  }
 0x207   : > { %5963 = vst [vmem:[#allocation89_spill] sm:$0xff] %v3890_v3  ;;  %1447 = vperm.xlu1 %2868, %v3369_v5   ;;  %v5971_v3 = vmov 29  }
 0x209   : > { %2103 = vperm.xlu0 %2934, %v3464_v20  }
 0x20b   : > { %1451 = vperm.xlu1 %2868, %v3464_v20   ;;  %v3897_v52 = vpop.permute.xlu1 %1151 }
 0x20c   : > { %5965 = vst [vmem:[#allocation91_spill] sm:$0xff] %v3897_v52 }
 0x20d   : > { %2937 = vset.pattern.permute.xlu0 %v5738_v18 }
 0x20e   : > { %2127 = vperm.xlu0 %2937, %v3464_v20  }
 0x20f   : > { %2869 = vset.pattern.permute.xlu1 %v5967_v27  ;;  %v3904_v0 = vpop.permute.xlu1 %1159 }
 0x210   : > { %5968 = vst [vmem:[#allocation93_spill] sm:$0xff] %v3904_v0  ;;  %1471 = vperm.xlu1 %2869, %v3383_v8  }
 0x213   : > { %v3907_v40 = vpop.permute.xlu1 %1163 }
 0x214   : > { %5969 = vst [vmem:[#allocation94_spill] sm:$0xff] %v3907_v40  ;;  %1479 = vperm.xlu1 %2869, %v3464_v20  }
 0x218   : > { %1483 = vperm.xlu1 %2869, %v3390_v9   ;;  %v3911_v52 = vpop.permute.xlu1 %1183 }
 0x219   : > { %5970 = vst [vmem:[#allocation95_spill] sm:$0xff] %v3911_v52 }
 0x21c   : > { %2872 = vset.pattern.permute.xlu1 %v5971_v3  ;;  %v3914_v18 = vpop.permute.xlu1 %1187 }
 0x21d   : > { %5972 = vst [vmem:[#allocation96_spill] sm:$0xff] %v3914_v18  ;;  %1499 = vperm.xlu1 %2872, %v3369_v5   ;;  %v5978_v18 = vmov 31  }
 0x221   : > { %1503 = vperm.xlu1 %2872, %v3464_v20   ;;  %v3918_v27 = vpop.permute.xlu1 %1207 }
 0x222   : > { %5973 = vst [vmem:[#allocation97_spill] sm:$0xff] %v3918_v27 }
 0x225   : > { %2873 = vset.pattern.permute.xlu1 %v5974_v39  ;;  %v3921_v0 = vpop.permute.xlu1 %1215 }
 0x226   : > { %5975 = vst [vmem:[#allocation98_spill] sm:$0xff] %v3921_v0  ;;  %1523 = vperm.xlu1 %2873, %v3383_v8   ;;  %v5981_v0 = vmov 32  }
 0x229   : > { %v3924_v40 = vpop.permute.xlu1 %1219 }
 0x22a   : > { %5976 = vst [vmem:[#allocation99_spill] sm:$0xff] %v3924_v40  ;;  %1531 = vperm.xlu1 %2873, %v3464_v20  }
 0x22e   : > { %1535 = vperm.xlu1 %2873, %v3390_v9   ;;  %v3928_v3 = vpop.permute.xlu1 %1239 }
 0x22f   : > { %5977 = vst [vmem:[#allocation100_spill] sm:$0xff] %v3928_v3 }
 0x232   : > { %2876 = vset.pattern.permute.xlu1 %v5978_v18  ;;  %v3931_v52 = vpop.permute.xlu1 %1243 }
 0x233   : > { %5979 = vst [vmem:[#allocation101_spill] sm:$0xff] %v3931_v52  ;;  %1551 = vperm.xlu1 %2876, %v3369_v5   ;;  %v5985_v52 = vmov 44  }
 0x237   : > { %1555 = vperm.xlu1 %2876, %v3464_v20   ;;  %v3935_v39 = vpop.permute.xlu1 %1263 }
 0x238   : > { %5980 = vst [vmem:[#allocation102_spill] sm:$0xff] %v3935_v39 }
 0x23b   : > { %2877 = vset.pattern.permute.xlu1 %v5981_v0  ;;  %v3938_v27 = vpop.permute.xlu1 %1271 }
 0x23c   : > { %5982 = vst [vmem:[#allocation103_spill] sm:$0xff] %v3938_v27  ;;  %1575 = vperm.xlu1 %2877, %v3383_v8   ;;  %v5988_v27 = vmov 45  }
 0x23f   : > { %v3941_v40 = vpop.permute.xlu1 %1275 }
 0x240   : > { %5983 = vst [vmem:[#allocation104_spill] sm:$0xff] %v3941_v40  ;;  %1583 = vperm.xlu1 %2877, %v3464_v20   ;;  %v3957_v40 = vpop.permute.xlu0 %1247 }
 0x241   : > { %5990 = vst [vmem:[#allocation109_spill] sm:$0xff] %v3957_v40 }
 0x244   : > { %1587 = vperm.xlu1 %2877, %v3390_v9   ;;  %v3945_v18 = vpop.permute.xlu1 %1291 }
 0x245   : > { %5984 = vst [vmem:[#allocation105_spill] sm:$0xff] %v3945_v18 }
 0x248   : > { %2879 = vset.pattern.permute.xlu1 %v5985_v52  ;;  %v3948_v3 = vpop.permute.xlu1 %1295 }
 0x249   : > { %5986 = vst [vmem:[#allocation106_spill] sm:$0xff] %v3948_v3  ;;  %1887 = vperm.xlu1 %2879, %v3383_v8   ;;  %v3964_v3 = vpop.permute.xlu0 %1267 }
 0x24a   : > { %5992 = vst [vmem:[#allocation111_spill] sm:$0xff] %v3964_v3 }
 0x24d   : > { %1891 = vperm.xlu1 %2879, %v3369_v5   ;;  %v3952_v0 = vpop.permute.xlu1 %1315 }
 0x24e   : > { %5987 = vst [vmem:[#allocation107_spill] sm:$0xff] %v3952_v0 }
 0x251   : > { %2881 = vset.pattern.permute.xlu1 %v5988_v27  ;;  %v3955_v39 = vpop.permute.xlu1 %1323 }
 0x252   : > { %5989 = vst [vmem:[#allocation108_spill] sm:$0xff] %v3955_v39  ;;  %1915 = vperm.xlu1 %2881, %v3369_v5   ;;  %v3970_v39 = vpop.permute.xlu0 %1287 }
 0x253   : > { %5994 = vst [vmem:[#allocation113_spill] sm:$0xff] %v3970_v39 }
 0x255   : > { %v3960_v18 = vpop.permute.xlu1 %1327 }
 0x256   : > { %5991 = vst [vmem:[#allocation110_spill] sm:$0xff] %v3960_v18  ;;  %2882 = vset.pattern.permute.xlu1 %v5985_v52  ;;  %v3977_v18 = vpop.permute.xlu0 %1299  ;;  %v5998_v52 = vmov 46  }
 0x257   : > { %1895 = vperm.xlu1 %2882, %v3464_v20   ;;  %5997 = vst [vmem:[#allocation116_spill] sm:$0xff] %v3977_v18 }
 0x25a   : > { %v3966_v2 = vpop.permute.xlu1 %1343 }
 0x25b   : > { %5993 = vst [vmem:[#allocation112_spill] sm:$0xff] %v3966_v2  ;;  %2884 = vset.pattern.permute.xlu1 %v5988_v27  ;;  %v3982_v2 = vld [vmem:[%s3330_s11 + $0x10] sm:$0xff]  ;;  %v6000_v27 = vmov 47  }
 0x25c   : > { %1919 = vperm.xlu1 %2884, %v3464_v20   ;;  %5999 = vst [vmem:[#allocation117_spill] sm:$0xff] %v3982_v2  ;;  %vm420_vm0 = vcmp.lt.f32.partialorder %v3982_v2, %v3518_v36  ;;  %vm456_vm1 = vcmp.lt.f32.partialorder %v3982_v2, %v3537_v43  ;;  %vm400_vm2 = vcmp.ge.f32.partialorder %v3982_v2, %v3504_v31 }
 0x25d   : > { %vm384_vm3 = vcmp.lt.f32.partialorder %v3982_v2, %v3504_v31  ;;  %vm436_vm4 = vcmp.ge.f32.partialorder %v3982_v2, %v3518_v36  ;;  %vm424_vm5 = vmand %vm400_vm2, %vm420_vm0  ;;  %vm364_vm7 = vcmp.ge.f32.partialorder %v3982_v2, %v3486_v25 }
 0x25e   : > { %v3972_v40 = vpop.permute.xlu1 %1347  ;;  %vm460_vm6 = vmand %vm436_vm4, %vm456_vm1 }
 0x25f   : > { %5995 = vst [vmem:[#allocation114_spill] sm:$0xff] %v3972_v40  ;;  %v4014_v40 = vsub.f32 %v3982_v2, %v3504_v31  ;;  %vm388_vm8 = vmand %vm364_vm7, %vm384_vm3 }
 0x260   : > { %1923 = vperm.xlu1 %2884, %v3390_v9   ;;  %v3989_v9 = vpop.permute.xlu0 %1319 }
 0x261   : > { %6001 = vst [vmem:[#allocation118_spill] sm:$0xff] %v3989_v9  ;;  %6006 = vst [vmem:[#allocation123_spill] sm:$0xff] %v4014_v40  ;;  %v888_v31 = vmul.f32 %v3742_v37, %v4014_v40 }
 0x263   : > { %v3975_v0 = vpop.permute.xlu1 %1367 }
 0x264   : > { %5996 = vst [vmem:[#allocation115_spill] sm:$0xff] %v3975_v0  ;;  %2886 = vset.pattern.permute.xlu1 %v5998_v52  ;;  %v4000_v0 = vsub.f32 %v3982_v2, %v3537_v43  ;;  %v4036_v62 = vpop.permute.xlu0 %1339 }
 0x265   : > { %1943 = vperm.xlu1 %2886, %v3369_v5   ;;  %v3996_v5 = vsub.f32 %v3982_v2, %v3518_v36  ;;  %v3154_v36 = vmov 38   ;;  %6009 = vst [vmem:[#allocation126_spill] sm:$0xff] %v4036_v62 }
 0x266   : > { %6003 = vst [vmem:[#allocation120_spill] sm:$0xff] %v4000_v0 }
 0x267   : > { %v1376_v3 = vpop.permute.xlu1 %1375  ;;  %6002 = vst [vmem:[#allocation119_spill] sm:$0xff] %v3996_v5  ;;  %v860_v9 = vmul.f32 %v3730_v47, %v3996_v5  ;;  %v4029_v47 = vld [vmem:[%s5659_s2] sm:$0xff] }
 0x268   : > { %6007 = vst [vmem:[#allocation124_spill] sm:$0xff] %v4029_v47 }
 0x269   : > { %2887 = vset.pattern.permute.xlu1 %v6000_v27 }
 0x26a   : > { %1963 = vperm.xlu1 %2887, %v3383_v8   ;;  %v4010_v8 = vsub.f32 %v3982_v2, %v3486_v25 }
 0x26b   : > { %v4002_v18 = vpop.permute.xlu1 %1379 }
 0x26c   : > { %6004 = vst [vmem:[#allocation121_spill] sm:$0xff] %v4002_v18  ;;  %6005 = vst [vmem:[#allocation122_spill] sm:$0xff] %v4010_v8  ;;  %v916_v18 = vmul.f32 %v3760_v45, %v4000_v0  ;;  %v832_v39 = vmul.f32 %v3710_v15, %v4010_v8  ;;  %v5746_v45 = vmov 0.0   ;;  %v1384_v12 = vmul.f32 %v1376_v3, %v4010_v8 }
 0x26d   : > { %v2537_v5 = vsel %vm424_vm5, 1.0, %v5746_v45  ;;  %v4034_v25 = vsel %vm460_vm6, 1.0, %v5746_v45  ;;  %v4042_v40 = vsel %vm388_vm8, 1.0, %v5746_v45  ;;  %v4057_v45 = vpop.permute.xlu0 %1351 }
 0x26e   : > { %2888 = vset.pattern.permute.xlu1 %v3154_v36  ;;  %6008 = vst [vmem:[#allocation125_spill] sm:$0xff] %v4034_v25  ;;  %v864_v15 = vmul.f32 %v2537_v5, %v860_v9  ;;  %v920_v37 = vmul.f32 %v4034_v25, %v916_v18  ;;  %6011 = vst [vmem:[#allocation128_spill] sm:$0xff] %v4042_v40  ;;  %v836_v59 = vmul.f32 %v4042_v40, %v832_v39  ;;  %v4191_v25 = vld [vmem:[%s3330_s11 + $0x18] sm:$0xff] }
 0x26f   : > { %1731 = vperm.xlu1 %2888, %v4029_v47   ;;  %v892_v17 = vmul.f32 %v2537_v5, %v888_v31  ;;  %6015 = vst [vmem:[#allocation132_spill] sm:$0xff] %v4057_v45  ;;  %v6016_v5 = vmov 39   ;;  %v4115_v45 = vld [vmem:[%s3330_s11] sm:$0xff]  ;;  %6044 = vst [vmem:[#allocation153_spill] sm:$0xff] %v4191_v25  ;;  %vm401_vm8 = vcmp.ge.f32.partialorder %v4191_v25, %v3578_v58 }
 0x270   : > { %v4038_v10 = vpop.permute.xlu1 %1395  ;;  %6028 = vst [vmem:[#allocation143_spill] sm:$0xff] %v4115_v45  ;;  %vm326_vm11 = vcmp.ge.f32.partialorder %v4115_v45, %v3515_v35  ;;  %vm346_vm12 = vcmp.lt.f32.partialorder %v4115_v45, %v3482_v24  ;;  %vm290_vm13 = vcmp.ge.f32.partialorder %v4115_v45, %v3490_v26  ;;  %vm310_vm14 = vcmp.lt.f32.partialorder %v4115_v45, %v3515_v35 }
 0x271   : > { %6010 = vst [vmem:[#allocation127_spill] sm:$0xff] %v4038_v10  ;;  %v4052_v10 = vadd.f32 %v864_v15, %v836_v59  ;;  %v4054_v9 = vadd.f32 %v920_v37, %v892_v17  ;;  %v4067_v59 = vpop.permute.xlu0 %1371  ;;  %v6019_v17 = vmov 33   ;;  %v4081_v37 = vld [vmem:[%s5659_s2 + $0x18] sm:$0xff]  ;;  %vm350_vm0 = vmand %vm326_vm11, %vm346_vm12  ;;  %vm382_vm1 = vcmp.lt.f32.partialorder %v4115_v45, %v3570_v56 }
 0x272   : > { %6018 = vst [vmem:[#allocation134_spill] sm:$0xff] %v4067_v59  ;;  %vm4158_vm2 = vmand %vm290_vm13, %vm310_vm14  ;;  %vm398_vm3 = vcmp.ge.f32.partialorder %v4115_v45, %v3570_v56  ;;  %vm418_vm4 = vcmp.lt.f32.partialorder %v4115_v45, %v3512_v34  ;;  %vm362_vm5 = vcmp.ge.f32.partialorder %v4115_v45, %v3482_v24  ;;  %vm434_vm12 = vcmp.ge.f32.partialorder %v4115_v45, %v3512_v34 }
 0x273   : > { %1735 = vperm.xlu1 %2888, %v4049_v21   ;;  %6013 = vst [vmem:[#allocation130_spill] sm:$0xff] %v4052_v10  ;;  %6014 = vst [vmem:[#allocation131_spill] sm:$0xff] %v4054_v9  ;;  %v1388_v39 = vmul.f32 %v1384_v12, %v4052_v10  ;;  %v5754_v10 = vmov 48   ;;  %vm454_vm14 = vcmp.lt.f32.partialorder %v4115_v45, %v3621_v13 }
 0x274   : > { %v1400_v62 = vpop.permute.xlu1 %1399  ;;  %vm4208_vm6 = vmand %vm362_vm5, %vm382_vm1 }
 0x275   : > { %v1408_v18 = vmul.f32 %v1400_v62, %v4000_v0  ;;  %v4076_v15 = vpop.permute.xlu0 %1391 }
 0x276   : > { %6022 = vst [vmem:[#allocation137_spill] sm:$0xff] %v4076_v15 }
 0x277   : > { %v1412_v3 = vmul.f32 %v1408_v18, %v4054_v9  ;;  %2889 = vset.pattern.permute.xlu1 %v6016_v5 }
 0x278   : > { %1759 = vperm.xlu1 %2889, %v4049_v21  }
 0x279   : > { %v4063_v31 = vpop.permute.xlu1 %1419  ;;  %v4065_v40 = vadd.f32 %v1412_v3, %v1388_v39  ;;  %v4088_v39 = vpop.permute.xlu0 %1403 }
 0x27a   : > { %6023 = vst [vmem:[#allocation138_spill] sm:$0xff] %v4088_v39 }
 0x27b   : > { %6017 = vst [vmem:[#allocation133_spill] sm:$0xff] %v4065_v40 }
 0x27c   : > { %2890 = vset.pattern.permute.xlu1 %v6019_v17 }
 0x27d   : > { %1603 = vperm.xlu1 %2890, %v4049_v21   ;;  %v4071_v62 = vpop.permute.xlu1 %1427  ;;  %v4093_v3 = vpop.permute.xlu0 %1423 }
 0x27e   : > { %6020 = vst [vmem:[#allocation135_spill] sm:$0xff] %v4071_v62 }
 0x281   : > { %2892 = vset.pattern.permute.xlu1 %v5998_v52  ;;  %v4074_v12 = vpop.permute.xlu1 %1431  ;;  %v4100_v59 = vpop.permute.xlu0 %1443 }
 0x282   : > { %6021 = vst [vmem:[#allocation136_spill] sm:$0xff] %v4074_v12  ;;  %1951 = vperm.xlu1 %2892, %v4081_v37  }
 0x286   : > { %2893 = vset.pattern.permute.xlu1 %v6000_v27  ;;  %v4085_v18 = vpop.permute.xlu1 %1447 }
 0x287   : > { %1971 = vperm.xlu1 %2893, %v3464_v20  }
 0x28a   : > { %v4090_v52 = vpop.permute.xlu1 %1451 }
 0x28b   : > { %6024 = vst [vmem:[#allocation139_spill] sm:$0xff] %v4090_v52  ;;  %2895 = vset.pattern.permute.xlu1 %v3154_v36  ;;  %v4107_v36 = vpop.permute.xlu0 %1455 }
 0x28c   : > { %1739 = vperm.xlu1 %2895, %v3464_v20   ;;  %6027 = vst [vmem:[#allocation142_spill] sm:$0xff] %v4107_v36  ;;  %v6035_v36 = vmov 49  }
 0x28f   : > { %v4095_v40 = vpop.permute.xlu1 %1471  ;;  %v4120_v8 = vpop.permute.xlu0 %1475 }
 0x290   : > { %1743 = vperm.xlu1 %2895, %v4081_v37  }
 0x293   : > { %v4098_v27 = vpop.permute.xlu1 %1479 }
 0x294   : > { %6025 = vst [vmem:[#allocation140_spill] sm:$0xff] %v4098_v27  ;;  %2897 = vset.pattern.permute.xlu1 %v6016_v5  ;;  %v4118_v5 = vld [vmem:[%s3330_s11 + $0x8] sm:$0xff] }
 0x295   : > { %1767 = vperm.xlu1 %2897, %v4081_v37   ;;  %vm291_vm9 = vcmp.ge.f32.partialorder %v4118_v5, %v3499_v29  ;;  %vm311_vm10 = vcmp.lt.f32.partialorder %v4118_v5, %v3471_v22  ;;  %v4179_v52 = vsub.f32 %v4118_v5, %v3471_v22  ;;  %v4200_v22 = vsub.f32 %v4115_v45, %v3515_v35 }
 0x296   : > { %vm4147_vm15 = vmand %vm291_vm9, %vm311_vm10  ;;  %vm399_vm7 = vcmp.ge.f32.partialorder %v4118_v5, %v3497_v28  ;;  %vm421_vm9 = vcmp.lt.f32.partialorder %v4191_v25, %v3523_v38  ;;  %vm419_vm11 = vcmp.lt.f32.partialorder %v4118_v5, %v3604_v4  ;;  %vm435_vm13 = vcmp.ge.f32.partialorder %v4118_v5, %v3604_v4 }
 0x297   : > { %v4104_v39 = vpop.permute.xlu1 %1483  ;;  %6040 = vst [vmem:[#allocation150_spill] sm:$0xff] %v4179_v52  ;;  %6046 = vst [vmem:[#allocation155_spill] sm:$0xff] %v4200_v22  ;;  %vm455_vm1 = vcmp.lt.f32.partialorder %v4118_v5, %v3531_v41 }
 0x298   : > { %6026 = vst [vmem:[#allocation141_spill] sm:$0xff] %v4104_v39  ;;  %v4151_v39 = vpop.permute.xlu0 %1495  ;;  %vm422_vm10 = vmand %vm398_vm3, %vm418_vm4  ;;  %vm492_vm4 = vcmp.lt.f32.partialorder %v3982_v2, %v3549_v48 }
 0x299   : > { %2898 = vset.pattern.permute.xlu1 %v6019_v17  ;;  %vm4292_vm3 = vmand %vm399_vm7, %vm419_vm11  ;;  %vm490_vm7 = vcmp.lt.f32.partialorder %v4115_v45, %v3545_v46  ;;  %vm473_vm11 = vcmp.ge.f32.partialorder %v4191_v25, %v3629_v16 }
 0x29a   : > { %1607 = vperm.xlu1 %2898, %v3464_v20   ;;  %v4130_v20 = vsub.f32 %v4115_v45, %v3482_v24  ;;  %vm4306_vm5 = vmand %vm435_vm13, %vm455_vm1  ;;  %vm506_vm1 = vcmp.ge.f32.partialorder %v4115_v45, %v3545_v46  ;;  %v4394_v24 = vsub.f32 %v4115_v45, %v3545_v46 }
 0x29c   : > { %v4110_v15 = vpop.permute.xlu1 %1499  ;;  %6030 = vst [vmem:[#allocation145_spill] sm:$0xff] %v4130_v20  ;;  %v742_v27 = vmul.f32 %v3533_v42, %v4130_v20  ;;  %v4171_v42 = vsub.f32 %v4115_v45, %v3570_v56  ;;  %v4233_v35 = vpop.permute.xlu0 %1507  ;;  %6078 = vst [vmem:[#allocation170_spill] sm:$0xff] %v4394_v24 }
 0x29d   : > { %6052 = vst [vmem:[#allocation159_spill] sm:$0xff] %v4233_v35  ;;  %v4469_v35 = vsub.f32 %v4191_v25, %v3555_v50 }
 0x29e   : > { %2899 = vset.pattern.permute.xlu1 %v5754_v10  ;;  %v4145_v10 = vsub.f32 %v4118_v5, %v3499_v29  ;;  %v4165_v29 = vsub.f32 %v4115_v45, %v3490_v26 }
 0x29f   : > { %1991 = vperm.xlu1 %2899, %v4029_v47   ;;  %6090 = vst [vmem:[#allocation176_spill] sm:$0xff] %v4469_v35 }
 0x2a0   : > { %v4122_v9 = vpop.permute.xlu1 %1503  ;;  %6032 = vst [vmem:[#allocation147_spill] sm:$0xff] %v4145_v10  ;;  %6038 = vst [vmem:[#allocation148_spill] sm:$0xff] %v4165_v29  ;;  %v4183_v26 = vmul.f32 %v3508_v33, %v4145_v10  ;;  %v4219_v10 = vsub.f32 %v4118_v5, %v3553_v49  ;;  %v4398_v49 = vsub.f32 %v4115_v45, %v3621_v13 }
 0x2a1   : > { %6029 = vst [vmem:[#allocation144_spill] sm:$0xff] %v4122_v9  ;;  %v6042_v9 = vmov 0.0  }
 0x2a2   : > { %6041 = vst [vmem:[#allocation151_spill] sm:$0xff] %v4183_v26  ;;  %v4188_v12 = vsel %vm350_vm0, 1.0, %v6042_v9  ;;  %v4215_v62 = vsel %vm4158_vm2, 1.0, %v6042_v9  ;;  %6051 = vst [vmem:[#allocation158_spill] sm:$0xff] %v4219_v10  ;;  %v802_v26 = vmul.f32 %v3586_v61, %v4171_v42  ;;  %v4255_v10 = vsub.f32 %v4115_v45, %v3512_v34 }
 0x2a3   : > { %1995 = vperm.xlu1 %2899, %v4049_v21   ;;  %6043 = vst [vmem:[#allocation152_spill] sm:$0xff] %v4188_v12  ;;  %v4203_v33 = vmul.f32 %v4188_v12, %v742_v27  ;;  %6050 = vst [vmem:[#allocation157_spill] sm:$0xff] %v4215_v62  ;;  %v6053_v27 = vmov 40   ;;  %v4266_v61 = vsel %vm4208_vm6, 1.0, %v6042_v9  ;;  %vm437_vm0 = vcmp.ge.f32.partialorder %v4191_v25, %v3523_v38 }
 0x2a4   : > { %6056 = vst [vmem:[#allocation162_spill] sm:$0xff] %v4266_v61  ;;  %vm470_vm2 = vcmp.ge.f32.partialorder %v4115_v45, %v3621_v13  ;;  %v5770_v62 = vmov 41   ;;  %vm471_vm6 = vcmp.ge.f32.partialorder %v4118_v5, %v3531_v41  ;;  %6079 = vst [vmem:[#allocation171_spill] sm:$0xff] %v4398_v49  ;;  %v4419_v13 = vsub.f32 %v3982_v2, %v3549_v48 }
 0x2a5   : > { %v4141_v17 = vpop.permute.xlu1 %1523  ;;  %6047 = vst [vmem:[#allocation156_spill] sm:$0xff] %v4203_v33  ;;  %v4302_v33 = vsub.f32 %v4191_v25, %v3523_v38  ;;  %vm4351_vm13 = vmand %vm470_vm2, %vm490_vm7  ;;  %vm491_vm2 = vcmp.lt.f32.partialorder %v4118_v5, %v3656_v63  ;;  %vm526_vm7 = vcmp.lt.f32.partialorder %v4115_v45, %v3675_v30 }
 0x2a6   : > { %6031 = vst [vmem:[#allocation146_spill] sm:$0xff] %v4141_v17  ;;  %v4238_v17 = vsub.f32 %v4118_v5, %v3497_v28  ;;  %v2520_v28 = vmul.f32 -1.442695, %v4118_v5  ;;  %v4431_v22 = vsel %vm4351_vm13, 1.0, %v6042_v9 }
 0x2a7   : > { %2901 = vset.pattern.permute.xlu1 %v6035_v36 }
 0x2a8   : > { %2019 = vperm.xlu1 %2901, %v4049_v21  }
 0x2a9   : > { %v4175_v20 = vpop.permute.xlu1 %1531 }
 0x2aa   : > { %6039 = vst [vmem:[#allocation149_spill] sm:$0xff] %v4175_v20  ;;  %v4196_v20 = vsel %vm4147_vm15, 1.0, %v6042_v9  ;;  %vm4279_vm15 = vmand %vm401_vm8, %vm421_vm9  ;;  %vm457_vm8 = vcmp.lt.f32.partialorder %v4191_v25, %v3629_v16 }
 0x2ab   : > { %6045 = vst [vmem:[#allocation154_spill] sm:$0xff] %v4196_v20  ;;  %v4242_v20 = vmul.f32 %v3559_v51, %v4179_v52  ;;  %v4261_v51 = vsub.f32 %v4191_v25, %v3578_v58  ;;  %v2519_v58 = vmul.f32 -1.442695, %v4115_v45  ;;  %vm4329_vm9 = vmand %vm434_vm12, %vm454_vm14  ;;  %v4340_v52 = vsub.f32 %v4118_v5, %v3531_v41 }
 0x2ac   : > { %2902 = vset.pattern.permute.xlu1 %v6053_v27  ;;  %vm493_vm12 = vcmp.lt.f32.partialorder %v4191_v25, %v3555_v50  ;;  %vm528_vm14 = vcmp.lt.f32.partialorder %v3982_v2, %v3567_v54  ;;  %v4426_v12 = vsel %vm4329_vm9, 1.0, %v6042_v9  ;;  %vm527_vm9 = vcmp.lt.f32.partialorder %v4118_v5, %v3563_v53 }
 0x2ad   : > { %6054 = vst [vmem:[#allocation160_spill] sm:$0xff] %v4242_v20  ;;  %1783 = vperm.xlu1 %2902, %v4029_v47   ;;  %v4249_v56 = vpop.permute.xlu1 %1535  ;;  %v4298_v20 = vmul.f32 %v4266_v61, %v802_v26  ;;  %v4321_v26 = vsel %vm4279_vm15, 1.0, %v6042_v9  ;;  %6070 = vst [vmem:[#allocation168_spill] sm:$0xff] %v4340_v52  ;;  %2939 = vpow2.f32 %v2519_v58  ;;  %v4390_v58 = vsel %vm4306_vm5, 1.0, %v6042_v9 }
 0x2ae   : > { %6055 = vst [vmem:[#allocation161_spill] sm:$0xff] %v4249_v56  ;;  %v4271_v56 = vsel %vm422_vm10, 1.0, %v6042_v9  ;;  %6065 = vst [vmem:[#allocation165_spill] sm:$0xff] %v4321_v26  ;;  %vm472_vm10 = vcmp.ge.f32.partialorder %v3982_v2, %v3537_v43  ;;  %v4364_v43 = vsel %vm4292_vm3, 1.0, %v6042_v9  ;;  %2941 = vpow2.f32 %v2520_v28 }
 0x2af   : > { %6057 = vst [vmem:[#allocation163_spill] sm:$0xff] %v4271_v56  ;;  %6062 = vst [vmem:[#allocation164_spill] sm:$0xff] %v4298_v20  ;;  %v4333_v20 = vpop.permute.xlu0 %1527  ;;  %v887_v41 = vmul.f32 %v3665_v60, %v4238_v17  ;;  %v914_v28 = vmul.f32 %v3691_v11, %v4398_v49  ;;  %v4531_v27 = vsub.f32 %v4118_v5, %v3656_v63 }
 0x2b0   : > { %6068 = vst [vmem:[#allocation166_spill] sm:$0xff] %v4333_v20  ;;  %v4357_v20 = vsub.f32 %v4118_v5, %v3604_v4  ;;  %6073 = vst [vmem:[#allocation169_spill] sm:$0xff] %v4364_v43  ;;  %v4513_v4 = vsub.f32 %v4118_v5, %v3563_v53 }
 0x2b1   : > { %2903 = vset.pattern.permute.xlu1 %v5770_v62  ;;  %vm4369_vm15 = vmand %vm472_vm10, %vm492_vm4  ;;  %vm507_vm4 = vcmp.ge.f32.partialorder %v4118_v5, %v3656_v63  ;;  %vm542_vm10 = vcmp.ge.f32.partialorder %v4115_v45, %v3675_v30  ;;  %6101 = vst [vmem:[#allocation182_spill] sm:$0xff] %v4531_v27  ;;  %v4552_v63 = vsub.f32 %v4115_v45, %v3575_v57 }
 0x2b2   : > { %1807 = vperm.xlu1 %2903, %v4029_v47   ;;  %v4336_v61 = vpop.permute.xlu1 %1551  ;;  %vm4383_vm3 = vmand %vm437_vm0, %vm457_vm8  ;;  %vm508_vm0 = vcmp.ge.f32.partialorder %v3982_v2, %v3549_v48  ;;  %v4442_v48 = vsub.f32 %v4191_v25, %v3629_v16  ;;  %v4461_v16 = vsel %vm4369_vm15, 1.0, %v6042_v9  ;;  %6098 = vst [vmem:[#allocation179_spill] sm:$0xff] %v4513_v4 }
 0x2b3   : > { %6069 = vst [vmem:[#allocation167_spill] sm:$0xff] %v4336_v61  ;;  %vm4410_vm5 = vmand %vm473_vm11, %vm493_vm12  ;;  %v4463_v34 = vpop.permute.xlu0 %1547  ;;  %vm509_vm12 = vcmp.ge.f32.partialorder %v4191_v25, %v3555_v50  ;;  %v4491_v60 = vsel %vm4383_vm3, 1.0, %v6042_v9  ;;  %vm563_vm3 = vcmp.lt.f32.partialorder %v4118_v5, %v3708_v7  ;;  %v2521_v61 = vmul.f32 -1.442695, %v3982_v2 }
 0x2b4   : > { %vm4436_vm8 = vmand %vm508_vm0, %vm528_vm14  ;;  %6085 = vst [vmem:[#allocation173_spill] sm:$0xff] %v4442_v48  ;;  %vm562_vm14 = vcmp.lt.f32.partialorder %v4115_v45, %v3575_v57  ;;  %v917_v11 = vmul.f32 %v3701_v44, %v4442_v48  ;;  %v4555_v44 = vmul.f32 %v4364_v43, %v887_v41  ;;  %v4592_v43 = vsub.f32 %v4191_v25, %v3682_v32 }
 0x2b5   : > { %vm4454_vm11 = vmand %vm471_vm6, %vm491_vm2  ;;  %6088 = vst [vmem:[#allocation174_spill] sm:$0xff] %v4461_v16  ;;  %vm529_vm6 = vcmp.lt.f32.partialorder %v4191_v25, %v3682_v32  ;;  %v4496_v16 = vsel %vm4410_vm5, 1.0, %v6042_v9  ;;  %vm543_vm2 = vcmp.ge.f32.partialorder %v4118_v5, %v3563_v53  ;;  %v6112_v53 = vmov 35  }
 0x2b6   : > { %1811 = vperm.xlu1 %2903, %v4049_v21   ;;  %v4415_v38 = vpop.permute.xlu1 %1555  ;;  %6089 = vst [vmem:[#allocation175_spill] sm:$0xff] %v4463_v34  ;;  %vm4478_vm13 = vmand %vm507_vm4, %vm527_vm9  ;;  %v4484_v34 = vmul.f32 %v3638_v14, %v4255_v10  ;;  %v2544_v50 = vsel %vm4454_vm11, 1.0, %v6042_v9  ;;  %v973_v32 = vmul.f32 %v3752_v23, %v4469_v35  ;;  %2943 = vpow2.f32 %v2521_v61  ;;  %v6122_v61 = vld [vmem:[#allocation70_spill] sm:$0xff] }
 0x2b7   : > { %6082 = vst [vmem:[#allocation172_spill] sm:$0xff] %v4415_v38  ;;  %6094 = vst [vmem:[#allocation178_spill] sm:$0xff] %v4491_v60  ;;  %v2940_v48 = vpop.eup %2939  ;;  %v4567_v38 = vsub.f32 %v4115_v45, %v3675_v30  ;;  %v4587_v30 = vpop.permute.xlu0 %1559 }
 0x2b8   : > { %6093 = vst [vmem:[#allocation177_spill] sm:$0xff] %v4484_v34  ;;  %vm4504_vm15 = vmand %vm506_vm1, %vm526_vm7  ;;  %v6097_v34 = vmov 34   ;;  %v2942_v14 = vpop.eup %2941 }
 0x2b9   : > { %vm566_vm1 = vmand %vm542_vm10, %vm562_vm14  ;;  %6105 = vst [vmem:[#allocation184_spill] sm:$0xff] %v4552_v63  ;;  %v4572_v57 = vsel %vm4504_vm15, 1.0, %v6042_v9 }
 0x2ba   : > { %2904 = vset.pattern.permute.xlu1 %v6097_v34  ;;  %v4527_v34 = vsub.f32 %v3982_v2, %v3567_v54  ;;  %vm4541_vm0 = vmand %vm509_vm12, %vm529_vm6  ;;  %v4563_v54 = vsel %vm4478_vm13, 1.0, %v6042_v9  ;;  %6106 = vst [vmem:[#allocation185_spill] sm:$0xff] %v4567_v38  ;;  %v4575_v41 = vsel %vm566_vm1, 1.0, %v6042_v9  ;;  %v921_v2 = vmul.f32 %v4491_v60, %v917_v11 }
 0x2bb   : > { %1631 = vperm.xlu1 %2904, %v4049_v21   ;;  %v4523_v46 = vpop.permute.xlu1 %1575  ;;  %6107 = vst [vmem:[#allocation186_spill] sm:$0xff] %v4575_v41  ;;  %vm4583_vm4 = vmand %vm543_vm2, %vm563_vm3  ;;  %v918_v41 = vmul.f32 %v4426_v12, %v914_v28  ;;  %v4598_v63 = vsel %vm4541_vm0, 1.0, %v6042_v9  ;;  %v943_v28 = vmul.f32 %v3718_v55, %v4357_v20  ;;  %v970_v21 = vmul.f32 %v3745_v6, %v4394_v24 }
 0x2bc   : > { %6099 = vst [vmem:[#allocation180_spill] sm:$0xff] %v4523_v46  ;;  %6100 = vst [vmem:[#allocation181_spill] sm:$0xff] %v4527_v34  ;;  %v4548_v46 = vsel %vm4436_vm8, 1.0, %v6042_v9  ;;  %v886_v11 = vmul.f32 %v3737_v1, %v4171_v42  ;;  %v999_v55 = vmul.f32 %v3771_v19, %v4340_v52  ;;  %v6124_v60 = vmov 48  }
 0x2bd   : > { %6104 = vst [vmem:[#allocation183_spill] sm:$0xff] %v4548_v46  ;;  %6110 = vst [vmem:[#allocation187_spill] sm:$0xff] %v4587_v30  ;;  %v2522_v30 = vmul.f32 -1.442695, %v4191_v25  ;;  %v4607_v46 = vsub.f32 %v4118_v5, %v3708_v7  ;;  %v246_v7 = vadd.f32 1.0, %v2940_v48  ;;  %v247_v25 = vadd.f32 1.0, %v2942_v14 }
 0x2be   : > { %6111 = vst [vmem:[#allocation188_spill] sm:$0xff] %v4592_v43  ;;  %v947_v1 = vmul.f32 %v4390_v58, %v943_v28  ;;  %v974_v19 = vmul.f32 %v4431_v22, %v970_v21  ;;  %v6121_v48 = vld [vmem:[#allocation65_spill] sm:$0xff]  ;;  %v4652_v21 = vld [vmem:[%s5659_s2 + $0x10] sm:$0xff] }
 0x2bf   : > { %2905 = vset.pattern.permute.xlu1 %v6112_v53  ;;  %v4601_v45 = vpop.permute.xlu1 %1583  ;;  %6114 = vst [vmem:[#allocation190_spill] sm:$0xff] %v4607_v46  ;;  %v6116_v53 = vld [vmem:[#allocation57_spill] sm:$0xff]  ;;  %v6118_v46 = vld [vmem:[#allocation54_spill] sm:$0xff]  ;;  %2945 = vpow2.f32 %v2522_v30  ;;  %v998_v14 = vmul.f32 %v6121_v48, %v4398_v49  ;;  %v6126_v30 = vld [vmem:[#allocation55_spill] sm:$0xff] }
 0x2c0   : > { %6113 = vst [vmem:[#allocation189_spill] sm:$0xff] %v4601_v45  ;;  %1651 = vperm.xlu1 %2905, %v4029_v47   ;;  %v4619_v45 = vsel %vm4583_vm4, 1.0, %v6042_v9  ;;  %v942_v6 = vmul.f32 %v6116_v53, %v4255_v10  ;;  %v6117_v47 = vld [vmem:[#allocation64_spill] sm:$0xff]  ;;  %v889_v62 = vmul.f32 %v6118_v46, %v4261_v51  ;;  %v6119_v9 = vld [vmem:[#allocation62_spill] sm:$0xff]  ;;  %v1027_v53 = vmul.f32 %v6122_v61, %v4513_v4 }
 0x2c1   : > { %6115 = vst [vmem:[#allocation191_spill] sm:$0xff] %v4619_v45  ;;  %v1026_v23 = vmul.f32 %v6117_v47, %v4567_v38  ;;  %v971_v45 = vmul.f32 %v6119_v9, %v4531_v27  ;;  %v4641_v47 = vpop.permute.xlu0 %1579  ;;  %v6125_v46 = vld [vmem:[#allocation66_spill] sm:$0xff]  ;;  %v915_v28 = vmul.f32 %v6126_v30, %v4340_v52  ;;  %2947 = vrcp.f32 %v246_v7  ;;  %v6127_v48 = vld [vmem:[#allocation36_spill] sm:$0xff] }
 0x2c2   : > { %6123 = vst [vmem:[#allocation64_spill] sm:$0xff] %v4641_v47  ;;  %v1029_v9 = vmul.f32 %v6125_v46, %v4592_v43  ;;  %v4657_v61 = vmul.f32 %v6127_v48, %v4165_v29  ;;  %2949 = vrcp.f32 %v247_v25  ;;  %v1003_v46 = vmul.f32 %v2544_v50, %v999_v55 }
 0x2c3   : > { %v4633_v35 = vpop.permute.xlu1 %1587  ;;  %v1030_v30 = vmul.f32 %v4572_v57, %v1026_v23  ;;  %v893_v47 = vmul.f32 %v4321_v26, %v889_v62  ;;  %v1002_v49 = vmul.f32 %v4431_v22, %v998_v14  ;;  %v1031_v7 = vmul.f32 %v4563_v54, %v1027_v53 }
 0x2c4   : > { %6120 = vst [vmem:[#allocation57_spill] sm:$0xff] %v4633_v35  ;;  %2906 = vset.pattern.permute.xlu1 %v6124_v60  ;;  %v890_v35 = vmul.f32 %v4271_v56, %v886_v11  ;;  %v4660_v60 = vmul.f32 %v4496_v16, %v973_v32  ;;  %v946_v11 = vmul.f32 %v4426_v12, %v942_v6  ;;  %v6179_v26 = vmov 34  }
 0x2c5   : > { %1999 = vperm.xlu1 %2906, %v4652_v21   ;;  %v975_v56 = vmul.f32 %v2544_v50, %v971_v45  ;;  %v1912_v52 = vpop.permute.xlu0 %1911  ;;  %v1434_v48 = vmul.f32 %v4063_v31, %v4171_v42  ;;  %v1486_v32 = vmul.f32 %v4095_v40, %v4255_v10  ;;  %v4672_v25 = vmul.f32 %v4598_v63, %v1029_v9 }
 0x2c6   : > { %v919_v12 = vmul.f32 %v4390_v58, %v915_v28  ;;  %v4675_v55 = vadd.f32 %v918_v41, %v890_v35  ;;  %v1458_v22 = vmul.f32 %v4100_v59, %v4394_v24  ;;  %v978_v45 = vadd.f32 %v974_v19, %v946_v11  ;;  %v2944_v41 = vpop.eup %2943 }
 0x2c7   : > { %v1510_v31 = vmul.f32 %v4151_v39, %v4567_v38  ;;  %v1459_v40 = vmul.f32 %v4085_v18, %v4531_v27  ;;  %v1511_v50 = vmul.f32 %v4110_v15, %v4513_v4  ;;  %v4686_v6 = vadd.f32 %v921_v2, %v893_v47  ;;  %v6130_v15 = vld [vmem:[#allocation119_spill] sm:$0xff]  ;;  %v6131_v2 = vld [vmem:[#allocation58_spill] sm:$0xff]  ;;  %v6132_v47 = vld [vmem:[#allocation60_spill] sm:$0xff] }
 0x2c8   : > { %v1888_v29 = vpop.permute.xlu1 %1887  ;;  %6128 = vst [vmem:[#allocation54_spill] sm:$0xff] %v4675_v55  ;;  %v1435_v35 = vmul.f32 %v4093_v3, %v4238_v17  ;;  %v979_v58 = vadd.f32 %v975_v56, %v947_v1  ;;  %v1487_v59 = vmul.f32 %v4120_v8, %v4357_v20  ;;  %v4692_v23 = vadd.f32 %v1030_v30, %v1002_v49  ;;  %v6134_v30 = vld [vmem:[#allocation72_spill] sm:$0xff] }
 0x2c9   : > { %2003 = vperm.xlu1 %2906, %v4081_v37   ;;  %6129 = vst [vmem:[#allocation62_spill] sm:$0xff] %v4686_v6  ;;  %v4694_v62 = vadd.f32 %v1031_v7, %v1003_v46  ;;  %v1438_v39 = vmul.f32 %v1434_v48, %v4675_v55  ;;  %v1490_v18 = vmul.f32 %v1486_v32, %v978_v45  ;;  %v2946_v14 = vpop.eup %2945  ;;  %v4706_v1 = vpop.permute.xlu0 %1899  ;;  %v248_v32 = vadd.f32 1.0, %v2944_v41 }
 0x2ca   : > { %v944_v53 = vmul.f32 %v6131_v2, %v6130_v15  ;;  %v945_v3 = vmul.f32 %v6132_v47, %v4302_v33  ;;  %v4702_v56 = vadd.f32 %v919_v12, %v4555_v44  ;;  %v1462_v8 = vmul.f32 %v1458_v22, %v978_v45  ;;  %v6138_v47 = vld [vmem:[#allocation173_spill] sm:$0xff] }
 0x2cb   : > { %v1514_v49 = vmul.f32 %v1510_v31, %v4692_v23  ;;  %v1463_v9 = vmul.f32 %v1459_v40, %v979_v58  ;;  %v1515_v28 = vmul.f32 %v1511_v50, %v4694_v62  ;;  %v1902_v11 = vmul.f32 %v1888_v29, %v4171_v42  ;;  %v2948_v46 = vpop.eup %2947  ;;  %v6136_v29 = vld [vmem:[#allocation63_spill] sm:$0xff] }
 0x2cc   : > { %v1892_v19 = vpop.permute.xlu1 %1891  ;;  %6133 = vst [vmem:[#allocation65_spill] sm:$0xff] %v4702_v56  ;;  %v1028_v7 = vmul.f32 %v6134_v30, %v4527_v34  ;;  %v1439_v44 = vmul.f32 %v1435_v35, %v4702_v56  ;;  %v1491_v48 = vmul.f32 %v1487_v59, %v979_v58  ;;  %v4716_v22 = vadd.f32 %v1462_v8, %v1438_v39  ;;  %v6137_v50 = vld [vmem:[#allocation67_spill] sm:$0xff]  ;;  %v6139_v30 = vld [vmem:[#allocation68_spill] sm:$0xff] }
 0x2cd   : > { %2908 = vset.pattern.permute.xlu1 %v6035_v36  ;;  %v2950_v36 = vpop.eup %2949  ;;  %v4714_v12 = vadd.f32 %v1514_v49, %v1490_v18  ;;  %v1903_v45 = vmul.f32 %v1892_v19, %v4238_v17  ;;  %v249_v31 = vadd.f32 1.0, %v2946_v14  ;;  %v972_v40 = vmul.f32 %v6136_v29, %v4419_v13  ;;  %v6142_v14 = vld [vmem:[#allocation183_spill] sm:$0xff] }
 0x2ce   : > { %2027 = vperm.xlu1 %2908, %v4081_v37   ;;  %6135 = vst [vmem:[#allocation70_spill] sm:$0xff] %v4716_v22  ;;  %v1000_v2 = vmul.f32 %v6137_v50, %v4000_v0  ;;  %v1001_v55 = vmul.f32 %v6139_v30, %v6138_v47  ;;  %v1926_v35 = vmul.f32 %v1912_v52, %v4567_v38  ;;  %v6141_v19 = vmov 40   ;;  %v6143_v49 = vld [vmem:[#allocation143_spill] sm:$0xff]  ;;  %v4737_v52 = vpop.permute.xlu0 %1939  ;;  %v6145_v30 = vld [vmem:[#allocation178_spill] sm:$0xff] }
 0x2cf   : > { %v1906_v59 = vmul.f32 %v1902_v11, %v4716_v22  ;;  %v4727_v41 = vadd.f32 %v1463_v9, %v1439_v44  ;;  %v4729_v39 = vadd.f32 %v1515_v28, %v1491_v48  ;;  %v1032_v8 = vmul.f32 %v6142_v14, %v1028_v7  ;;  %v6144_v44 = vld [vmem:[#allocation125_spill] sm:$0xff] }
 0x2d0   : > { %v258_v29 = vmul.f32 %v2948_v46, %v6143_v49  ;;  %v259_v50 = vmul.f32 %v2950_v36, %v4118_v5  ;;  %2951 = vrcp.f32 %v248_v32  ;;  %v1930_v11 = vmul.f32 %v1926_v35, %v4714_v12  ;;  %v6147_v36 = vld [vmem:[#allocation136_spill] sm:$0xff] }
 0x2d1   : > { %v1916_v58 = vpop.permute.xlu1 %1915  ;;  %6140 = vst [vmem:[#allocation66_spill] sm:$0xff] %v4727_v41  ;;  %v1907_v9 = vmul.f32 %v1903_v45, %v4727_v41  ;;  %2953 = vrcp.f32 %v249_v31  ;;  %v948_v48 = vmul.f32 %v6144_v44, %v944_v53  ;;  %v949_v7 = vmul.f32 %v6145_v30, %v945_v3  ;;  %v6148_v49 = vld [vmem:[#allocation144_spill] sm:$0xff]  ;;  %v6149_v31 = vld [vmem:[#allocation139_spill] sm:$0xff]  ;;  %v6152_v30 = vld [vmem:[#allocation142_spill] sm:$0xff] }
 0x2d2   : > { %v1927_v18 = vmul.f32 %v1916_v58, %v4513_v4  ;;  %2909 = vset.pattern.permute.xlu1 %v6141_v19  ;;  %v6146_v58 = vld [vmem:[#allocation174_spill] sm:$0xff]  ;;  %v1437_v32 = vmul.f32 %v6147_v36, %v4261_v51  ;;  %v1512_v22 = vmul.f32 %v6148_v49, %v4527_v34  ;;  %v1934_v41 = vadd.f32 %v1930_v11, %v1906_v59  ;;  %v6153_v36 = vld [vmem:[#allocation140_spill] sm:$0xff]  ;;  %v6154_v49 = vld [vmem:[#allocation141_spill] sm:$0xff]  ;;  %v4772_v4 = vpop.permute.xlu0 %1947 }
 0x2d3   : > { %1791 = vperm.xlu1 %2909, %v4652_v21   ;;  %v976_v19 = vmul.f32 %v6146_v58, %v972_v40  ;;  %v1004_v46 = vmul.f32 %v6146_v58, %v1000_v2  ;;  %v1005_v35 = vmul.f32 %v4496_v16, %v1001_v55  ;;  %v1460_v53 = vmul.f32 %v6149_v31, %v4419_v13  ;;  %v6151_v2 = vld [vmem:[#allocation176_spill] sm:$0xff]  ;;  %v6155_v55 = vld [vmem:[#allocation69_spill] sm:$0xff] }
 0x2d4   : > { %v1931_v28 = vmul.f32 %v1927_v18, %v4729_v39  ;;  %v6150_v3 = vmov 41   ;;  %v2643_v40 = vpack.c.bf16 %v259_v50, %v258_v29  ;;  %v1461_v58 = vmul.f32 %v6152_v30, %v6151_v2  ;;  %v6159_v29 = vld [vmem:[#allocation135_spill] sm:$0xff]  ;;  %6161 = vst [vmem:[#allocation55_spill] sm:$0xff] %v4772_v4 }
 0x2d5   : > { %v4753_v44 = vadd.f32 %v1032_v8, %v1004_v46  ;;  %v1488_v56 = vmul.f32 %v6153_v36, %v6130_v15  ;;  %v1489_v59 = vmul.f32 %v6154_v49, %v4302_v33  ;;  %v6156_v8 = vld [vmem:[#allocation190_spill] sm:$0xff]  ;;  %v6158_v46 = vld [vmem:[#allocation123_spill] sm:$0xff]  ;;  %v980_v31 = vadd.f32 %v976_v19, %v948_v48 }
 0x2d6   : > { %v1896_v45 = vpop.permute.xlu1 %1895  ;;  %v1935_v18 = vadd.f32 %v1931_v28, %v1907_v9  ;;  %v1055_v9 = vmul.f32 %v6155_v55, %v4531_v27  ;;  %v6157_v28 = vld [vmem:[#allocation79_spill] sm:$0xff]  ;;  %v1436_v50 = vmul.f32 %v6159_v29, %v6158_v46  ;;  %v1441_v49 = vmul.f32 %v1437_v32, %v4686_v6  ;;  %v6163_v55 = vld [vmem:[#allocation42_spill] sm:$0xff] }
 0x2d7   : > { %2911 = vset.pattern.permute.xlu1 %v6150_v3  ;;  %v1083_v11 = vmul.f32 %v6157_v28, %v6156_v8  ;;  %v981_v3 = vadd.f32 %v4660_v60, %v949_v7  ;;  %v6160_v30 = vld [vmem:[#allocation159_spill] sm:$0xff]  ;;  %v6164_v28 = vld [vmem:[#allocation74_spill] sm:$0xff]  ;;  %v4781_v48 = vadd.f32 %v4672_v25, %v1005_v35  ;;  %v1464_v60 = vmul.f32 %v1460_v53, %v980_v31 }
 0x2d8   : > { %1815 = vperm.xlu1 %2911, %v4652_v21   ;;  %v2641_v16 = vpack.c.bf16 %v1935_v18, %v1934_v41  ;;  %v1513_v36 = vmul.f32 %v6160_v30, %v4592_v43  ;;  %v1516_v41 = vmul.f32 %v1512_v22, %v4753_v44  ;;  %v6162_v18 = vld [vmem:[#allocation155_spill] sm:$0xff]  ;;  %v1054_v38 = vmul.f32 %v6164_v28, %v4394_v24  ;;  %v6166_v28 = vld [vmem:[#allocation184_spill] sm:$0xff]  ;;  %v6185_v15 = vld [vmem:[#allocation146_spill] sm:$0xff] }
 0x2d9   : > { %v774_v27 = vmul.f32 %v6163_v55, %v6162_v18  ;;  %v1465_v19 = vmul.f32 %v1461_v58, %v981_v3  ;;  %v1492_v29 = vmul.f32 %v1488_v56, %v980_v31  ;;  %v1493_v30 = vmul.f32 %v1489_v59, %v981_v3  ;;  %v6167_v6 = vld [vmem:[#allocation71_spill] sm:$0xff] }
 0x2da   : > { %2642 = vmatprep.subr.bf16.mxu0 %v2641_v16  ;;  %v2952_v22 = vpop.eup %2951  ;;  %v6165_v16 = vld [vmem:[#allocation21_spill] sm:$0xff]  ;;  %v1059_v55 = vmul.f32 %v4563_v54, %v1055_v9  ;;  %v1082_v25 = vmul.f32 %v6167_v6, %v6166_v28  ;;  %v6168_v35 = vld [vmem:[#allocation191_spill] sm:$0xff]  ;;  %v1517_v56 = vmul.f32 %v1513_v36, %v4781_v48  ;;  %v1904_v31 = vmul.f32 %v1896_v45, %v6158_v46  ;;  %v6173_v54 = vld [vmem:[#allocation18_spill] sm:$0xff] }
 0x2db   : > { %v1920_v7 = vpop.permute.xlu1 %1919  ;;  %2644 = vmatpush3.bf16.msra.mxu0 %v2643_v40  ;;  %vm347_vm5 = vcmp.lt.f32.partialorder %v4118_v5, %v6165_v16  ;;  %v1087_v53 = vmul.f32 %v6168_v35, %v1083_v11  ;;  %v6169_v24 = vld [vmem:[#allocation131_spill] sm:$0xff]  ;;  %v2954_v58 = vpop.eup %2953  ;;  %v4793_v59 = vadd.f32 %v1465_v19, %v1441_v49  ;;  %v4796_v3 = vadd.f32 %v1516_v41, %v1492_v29  ;;  %v6174_v6 = vld [vmem:[#allocation145_spill] sm:$0xff] }
 0x2dc   : > { %v1928_v32 = vmul.f32 %v1920_v7, %v4527_v34  ;;  %1819 = vperm.xlu1 %2911, %v4081_v37   ;;  %v1440_v40 = vmul.f32 %v1436_v50, %v6169_v24  ;;  %v6172_v7 = vld [vmem:[#allocation14_spill] sm:$0xff]  ;;  %vm363_vm8 = vcmp.ge.f32.partialorder %v4118_v5, %v6165_v16  ;;  %vm383_vm9 = vcmp.lt.f32.partialorder %v4118_v5, %v6173_v54  ;;  %v6175_v24 = vld [vmem:[#allocation48_spill] sm:$0xff]  ;;  %v1968_v49 = vpop.permute.xlu0 %1967  ;;  %v6177_v41 = vld [vmem:[#allocation167_spill] sm:$0xff] }
 0x2dd   : > { %6170 = vst [vmem:[#allocation36_spill] sm:$0xff] %v4793_v59  ;;  %6171 = vst [vmem:[#allocation58_spill] sm:$0xff] %v4796_v3  ;;  %vm327_vm7 = vcmp.ge.f32.partialorder %v4118_v5, %v6172_v7  ;;  %v830_v9 = vmul.f32 %v6175_v24, %v6174_v6  ;;  %v1058_v11 = vmul.f32 %v4572_v57, %v1054_v38  ;;  %v6180_v24 = vld [vmem:[#allocation168_spill] sm:$0xff]  ;;  %v6181_v57 = vld [vmem:[#allocation166_spill] sm:$0xff] }
 0x2de   : > { %v1905_v50 = vmul.f32 %v4706_v1, %v4261_v51  ;;  %v4809_v45 = vadd.f32 %v1464_v60, %v1440_v40  ;;  %v1563_v19 = vmul.f32 %v6177_v41, %v6156_v8  ;;  %v1932_v29 = vmul.f32 %v1928_v32, %v4796_v3  ;;  %v6182_v1 = vld [vmem:[#allocation117_spill] sm:$0xff]  ;;  %v6184_v41 = vld [vmem:[#allocation171_spill] sm:$0xff]  ;;  %vm4863_vm10 = vmand %vm327_vm7, %vm347_vm5 }
 0x2df   : > { %v1924_v36 = vpop.permute.xlu1 %1923  ;;  %v4814_v35 = vadd.f32 %v1517_v56, %v1493_v30  ;;  %v1539_v38 = vmul.f32 %v6181_v57, %v6180_v24  ;;  %v4820_v6 = vadd.f32 %v1087_v53, %v1059_v55  ;;  %v260_v60 = vmul.f32 %v2952_v22, %v6182_v1  ;;  %v6183_v40 = vld [vmem:[#allocation153_spill] sm:$0xff]  ;;  %v6187_v55 = vld [vmem:[#allocation152_spill] sm:$0xff]  ;;  %v6189_v24 = vld [vmem:[#allocation162_spill] sm:$0xff] }
 0x2e0   : > { %6176 = vst [vmem:[#allocation60_spill] sm:$0xff] %v4809_v45  ;;  %v1929_v34 = vmul.f32 %v1924_v36, %v4592_v43  ;;  %2913 = vset.pattern.permute.xlu1 %v6179_v26  ;;  %v261_v4 = vmul.f32 %v2954_v58, %v6183_v40  ;;  %v1538_v32 = vmul.f32 %v6185_v15, %v6184_v41  ;;  %v6186_v36 = vld [vmem:[#allocation157_spill] sm:$0xff]  ;;  %v6188_v43 = vld [vmem:[#allocation186_spill] sm:$0xff]  ;;  %v6190_v58 = vld [vmem:[#allocation175_spill] sm:$0xff] }
 0x2e1   : > { %6178 = vst [vmem:[#allocation72_spill] sm:$0xff] %v4814_v35  ;;  %1639 = vperm.xlu1 %2913, %v4081_v37   ;;  %v1908_v30 = vmul.f32 %v1904_v31, %v4809_v45  ;;  %v1909_v56 = vmul.f32 %v1905_v50, %v4793_v59  ;;  %v718_v57 = vmul.f32 %v6186_v36, %v4657_v61  ;;  %v6191_v50 = vld [vmem:[#allocation177_spill] sm:$0xff]  ;;  %v6192_v59 = vld [vmem:[#allocation163_spill] sm:$0xff]  ;;  %v6194_v36 = vmov 35   ;;  %vm4886_vm11 = vmand %vm363_vm8, %vm383_vm9 }
 0x2e2   : > { %v1933_v26 = vmul.f32 %v1929_v34, %v4814_v35  ;;  %v778_v53 = vmul.f32 %v6187_v55, %v774_v27  ;;  %v1086_v37 = vmul.f32 %v6188_v43, %v1082_v25  ;;  %v834_v22 = vmul.f32 %v6189_v24, %v830_v9  ;;  %v6193_v61 = vld [vmem:[#allocation107_spill] sm:$0xff]  ;;  %v4846_v24 = vpop.permute.xlu0 %1975  ;;  %v6197_v55 = vld [vmem:[#allocation156_spill] sm:$0xff] }
 0x2e3   : > { %v1562_v3 = vmul.f32 %v6190_v58, %v6166_v28  ;;  %v1567_v15 = vmul.f32 %v1563_v19, %v4820_v6  ;;  %v1936_v41 = vadd.f32 %v1932_v29, %v1908_v30  ;;  %v862_v34 = vmul.f32 %v6192_v59, %v6191_v50  ;;  %v6195_v59 = vld [vmem:[#allocation164_spill] sm:$0xff]  ;;  %v6212_v5 = vld [vmem:[#allocation31_spill] sm:$0xff] }
 0x2e4   : > { %v1937_v31 = vadd.f32 %v1933_v26, %v1909_v56  ;;  %v1944_v45 = vpop.permute.xlu1 %1943  ;;  %v4840_v35 = vadd.f32 %v1086_v37, %v1058_v11  ;;  %v1330_v27 = vmul.f32 %v6193_v61, %v6162_v18  ;;  %v2647_v25 = vpack.c.bf16 %v261_v4, %v260_v60  ;;  %v6196_v56 = vld [vmem:[#allocation126_spill] sm:$0xff]  ;;  %v6198_v58 = vld [vmem:[#allocation148_spill] sm:$0xff] }
 0x2e5   : > { %2914 = vset.pattern.permute.xlu1 %v6194_v36  ;;  %v1543_v9 = vmul.f32 %v1539_v38, %v4694_v62  ;;  %v1542_v19 = vmul.f32 %v1538_v32, %v4692_v23  ;;  %v1955_v29 = vmul.f32 %v1944_v45, %v4357_v20  ;;  %v810_v11 = vadd.f32 %v6195_v59, %v778_v53  ;;  %v6199_v4 = vld [vmem:[#allocation102_spill] sm:$0xff]  ;;  %v6213_v59 = vld [vmem:[#allocation124_spill] sm:$0xff] }
 0x2e6   : > { %1659 = vperm.xlu1 %2914, %v4652_v21   ;;  %v2645_v30 = vpack.c.bf16 %v1937_v31, %v1936_v41  ;;  %v1354_v26 = vmul.f32 %v6196_v56, %v4255_v10  ;;  %v750_v37 = vadd.f32 %v6197_v55, %v718_v57  ;;  %v1278_v60 = vmul.f32 %v6199_v4, %v6198_v58  ;;  %v6202_v62 = vld [vmem:[#allocation46_spill] sm:$0xff]  ;;  %v6205_v57 = vld [vmem:[#allocation51_spill] sm:$0xff]  ;;  %v6206_v31 = vld [vmem:[#allocation113_spill] sm:$0xff] }
 0x2e7   : > { %v803_v45 = vmul.f32 %v6202_v62, %v4238_v17  ;;  %v4869_v38 = vadd.f32 %v862_v34, %v834_v22  ;;  %v1566_v41 = vmul.f32 %v1562_v3, %v4840_v35  ;;  %v4872_v32 = vadd.f32 %v1567_v15, %v1543_v9  ;;  %v6215_v4 = vld [vmem:[#allocation160_spill] sm:$0xff]  ;;  %v6219_v3 = vld [vmem:[#allocation105_spill] sm:$0xff] }
 0x2e8   : > { %2646 = vmatprep.subr.bf16.mxu0 %v2645_v30  ;;  %v859_v53 = vmul.f32 %v6205_v57, %v4357_v20  ;;  %v1302_v7 = vmul.f32 %v6206_v31, %v4171_v42  ;;  %v1954_v50 = vmul.f32 %v4737_v52, %v4255_v10  ;;  %v1334_v61 = vmul.f32 %v1330_v27, %v810_v11 }
 0x2e9   : > { %6203 = vst [vmem:[#allocation63_spill] sm:$0xff] %v4869_v38  ;;  %6204 = vst [vmem:[#allocation67_spill] sm:$0xff] %v4872_v32  ;;  %v1964_v36 = vpop.permute.xlu1 %1963  ;;  %2648 = vmatpush3.bf16.msra.mxu0 %v2647_v25  ;;  %v1979_v22 = vmul.f32 %v1968_v49, %v6156_v8  ;;  %v1959_v42 = vmul.f32 %v1955_v29, %v4729_v39  ;;  %v4892_v15 = vadd.f32 %v1566_v41, %v1542_v19  ;;  %v6209_v34 = vmov 50   ;;  %v6211_v25 = vld [vmem:[#allocation158_spill] sm:$0xff]  ;;  %v6214_v39 = vld [vmem:[#allocation40_spill] sm:$0xff]  ;;  %v1756_v19 = vpop.permute.xlu0 %1755 }
 0x2ea   : > { %v1978_v52 = vmul.f32 %v1964_v36, %v6166_v28  ;;  %2915 = vset.pattern.permute.xlu1 %v6209_v34  ;;  %v6210_v27 = vmov 0.0   ;;  %v831_v16 = vmul.f32 %v6212_v5, %v6211_v25  ;;  %v1358_v9 = vmul.f32 %v1354_v26, %v4869_v38  ;;  %v6217_v41 = vld [vmem:[#allocation169_spill] sm:$0xff]  ;;  %v6260_v8 = vld [vmem:[#allocation172_spill] sm:$0xff] }
 0x2eb   : > { %v2528_v54 = vsel %vm4863_vm10, 1.0, %v6210_v27  ;;  %v1282_v30 = vmul.f32 %v1278_v60, %v750_v37  ;;  %2043 = vperm.xlu1 %2915, %v6213_v59   ;;  %v743_v49 = vmul.f32 %v6214_v39, %v6211_v25  ;;  %v1983_v29 = vmul.f32 %v1979_v22, %v4872_v32  ;;  %v6218_v39 = vld [vmem:[#allocation129_spill] sm:$0xff]  ;;  %v6282_v25 = vld [vmem:[#allocation106_spill] sm:$0xff] }
 0x2ec   : > { %v1958_v56 = vmul.f32 %v1954_v50, %v4714_v12  ;;  %v1982_v55 = vmul.f32 %v1978_v52, %v4892_v15  ;;  %v779_v23 = vmul.f32 %v2528_v54, %v6215_v4  ;;  %v2532_v62 = vsel %vm4886_vm11, 1.0, %v6210_v27 }
 0x2ed   : > { %v1306_v26 = vmul.f32 %v1302_v7, %v810_v11  ;;  %v4912_v37 = vadd.f32 %v1358_v9, %v1334_v61  ;;  %v807_v60 = vmul.f32 %v2532_v62, %v803_v45  ;;  %v863_v57 = vmul.f32 %v6217_v41, %v859_v53  ;;  %v6220_v7 = vld [vmem:[#allocation112_spill] sm:$0xff]  ;;  %v6221_v53 = vld [vmem:[#allocation151_spill] sm:$0xff] }
 0x2ee   : > { %v1987_v31 = vadd.f32 %v1983_v29, %v1959_v42  ;;  %v1986_v36 = vadd.f32 %v1982_v55, %v1958_v56  ;;  %v1732_v5 = vpop.permute.xlu1 %1731  ;;  %v835_v22 = vmul.f32 %v2532_v62, %v831_v16  ;;  %v1770_v12 = vmul.f32 %v1756_v19, %v4255_v10  ;;  %v6222_v42 = vld [vmem:[#allocation154_spill] sm:$0xff]  ;;  %v6223_v10 = vld [vmem:[#allocation147_spill] sm:$0xff] }
 0x2ef   : > { %6216 = vst [vmem:[#allocation68_spill] sm:$0xff] %v4912_v37  ;;  %v1310_v50 = vadd.f32 %v1306_v26, %v1282_v30  ;;  %v1746_v52 = vmul.f32 %v1732_v5, %v6198_v58  ;;  %2047 = vperm.xlu1 %2915, %v6218_v39   ;;  %v747_v4 = vmul.f32 %v2528_v54, %v743_v49  ;;  %v6224_v30 = vld [vmem:[#allocation111_spill] sm:$0xff]  ;;  %v6225_v56 = vld [vmem:[#allocation150_spill] sm:$0xff]  ;;  %v6228_v26 = vmov 51   ;;  %v6229_v5 = vld [vmem:[#allocation25_spill] sm:$0xff] }
 0x2f0   : > { %v1303_v11 = vmul.f32 %v6219_v3, %v4238_v17  ;;  %v1355_v45 = vmul.f32 %v6220_v7, %v4357_v20  ;;  %v2649_v61 = vpack.c.bf16 %v1987_v31, %v1986_v36  ;;  %v719_v9 = vmul.f32 %v6222_v42, %v6221_v53  ;;  %v6226_v55 = vld [vmem:[#allocation118_spill] sm:$0xff] }
 0x2f1   : > { %v1750_v29 = vmul.f32 %v1746_v52, %v1310_v50  ;;  %v1774_v16 = vmul.f32 %v1770_v12, %v4912_v37  ;;  %v1279_v19 = vmul.f32 %v6224_v30, %v6223_v10  ;;  %v811_v58 = vadd.f32 %v807_v60, %v779_v23  ;;  %v6231_v50 = vld [vmem:[#allocation22_spill] sm:$0xff]  ;;  %v6275_v37 = vld [vmem:[#allocation55_spill] sm:$0xff] }
 0x2f2   : > { %v1331_v54 = vmul.f32 %v6226_v55, %v6225_v56  ;;  %v4929_v49 = vadd.f32 %v863_v57, %v835_v22  ;;  %v1736_v17 = vpop.permute.xlu1 %1735  ;;  %2650 = vmatprep.subr.bf16.mxu0 %v2649_v61  ;;  %v751_v41 = vadd.f32 %v747_v4, %v719_v9  ;;  %vm564_vm12 = vcmp.lt.f32.partialorder %v6182_v1, %v6229_v5  ;;  %v6230_v22 = vld [vmem:[#allocation12_spill] sm:$0xff]  ;;  %v6236_v61 = vld [vmem:[#allocation19_spill] sm:$0xff]  ;;  %v6237_v53 = vld [vmem:[#allocation26_spill] sm:$0xff] }
 0x2f3   : > { %v4931_v62 = vadd.f32 %v1774_v16, %v1750_v29  ;;  %2916 = vset.pattern.permute.xlu1 %v6228_v26  ;;  %v1307_v31 = vmul.f32 %v1303_v11, %v811_v58  ;;  %v1747_v57 = vmul.f32 %v1736_v17, %v6223_v10  ;;  %vm292_vm6 = vcmp.ge.f32.partialorder %v6182_v1, %v6230_v22  ;;  %v6233_v4 = vld [vmem:[#allocation44_spill] sm:$0xff]  ;;  %v6239_v9 = vld [vmem:[#allocation77_spill] sm:$0xff]  ;;  %v4979_v55 = vld [vmem:[%s3330_s11 + $0x10] sm:$0xff] }
 0x2f4   : > { %6227 = vst [vmem:[#allocation183_spill] sm:$0xff] %v4929_v49  ;;  %v1359_v36 = vmul.f32 %v1355_v45, %v4929_v49  ;;  %2071 = vperm.xlu1 %2916, %v6218_v39   ;;  %v1283_v23 = vmul.f32 %v1279_v19, %v751_v41  ;;  %v1335_v60 = vmul.f32 %v1331_v54, %v811_v58  ;;  %v6235_v45 = vmov 42   ;;  %v6240_v16 = vld [vmem:[#allocation81_spill] sm:$0xff]  ;;  %v6243_v54 = vld [vmem:[#allocation15_spill] sm:$0xff] }
 0x2f5   : > { %v4943_v12 = vsub.f32 %v6182_v1, %v6230_v22  ;;  %vm544_vm13 = vcmp.ge.f32.partialorder %v6182_v1, %v6231_v50  ;;  %v4949_v52 = vsub.f32 %v6182_v1, %v6229_v5  ;;  %vm545_vm14 = vcmp.ge.f32.partialorder %v6183_v40, %v6233_v4  ;;  %v6242_v58 = vld [vmem:[#allocation13_spill] sm:$0xff]  ;;  %v6266_v1 = vld [vmem:[#allocation28_spill] sm:$0xff] }
 0x2f6   : > { %v1311_v3 = vadd.f32 %v1307_v31, %v1283_v23  ;;  %v4953_v11 = vadd.f32 %v1359_v36, %v1335_v60  ;;  %vm329_vm15 = vcmp.ge.f32.partialorder %v6183_v40, %v6236_v61  ;;  %v4961_v42 = vsub.f32 %v6183_v40, %v6237_v53  ;;  %vm568_vm2 = vmand %vm544_vm13, %vm564_vm12  ;;  %v6246_v17 = vld [vmem:[#allocation73_spill] sm:$0xff]  ;;  %v6247_v31 = vld [vmem:[#allocation75_spill] sm:$0xff] }
 0x2f7   : > { %6232 = vst [vmem:[#allocation143_spill] sm:$0xff] %v4949_v52  ;;  %v1760_v39 = vpop.permute.xlu1 %1759  ;;  %v1057_v29 = vmul.f32 %v6239_v9, %v6151_v2  ;;  %v1084_v10 = vmul.f32 %v6240_v16, %v4949_v52  ;;  %vm565_vm1 = vcmp.lt.f32.partialorder %v6183_v40, %v6237_v53  ;;  %vm293_vm0 = vcmp.ge.f32.partialorder %v6183_v40, %v6242_v58  ;;  %v6251_v9 = vld [vmem:[#allocation161_spill] sm:$0xff] }
 0x2f8   : > { %6234 = vst [vmem:[#allocation125_spill] sm:$0xff] %v4953_v11  ;;  %v1771_v7 = vmul.f32 %v1760_v39, %v4357_v20  ;;  %2917 = vset.pattern.permute.xlu1 %v6235_v45  ;;  %6238 = vst [vmem:[#allocation178_spill] sm:$0xff] %v4961_v42  ;;  %v6241_v20 = vld [vmem:[#allocation17_spill] sm:$0xff]  ;;  %v1751_v30 = vmul.f32 %v1747_v57, %v1311_v3  ;;  %vm312_vm4 = vcmp.lt.f32.partialorder %v4979_v55, %v6243_v54  ;;  %v6248_v39 = vld [vmem:[#allocation16_spill] sm:$0xff] }
 0x2f9   : > { %1835 = vperm.xlu1 %2917, %v6213_v59   ;;  %vm349_vm3 = vcmp.lt.f32.partialorder %v6183_v40, %v6241_v20  ;;  %vm4986_vm5 = vmand %vm545_vm14, %vm565_vm1  ;;  %v1085_v41 = vmul.f32 %v6246_v17, %v4961_v42  ;;  %v1056_v36 = vmul.f32 %v6247_v31, %v4419_v13  ;;  %vm313_vm7 = vcmp.lt.f32.partialorder %v6183_v40, %v6236_v61  ;;  %v6259_v31 = vld [vmem:[#allocation187_spill] sm:$0xff] }
 0x2fa   : > { %v1775_v19 = vmul.f32 %v1771_v7, %v4953_v11  ;;  %v4998_v23 = vsub.f32 %v6183_v40, %v6241_v20  ;;  %v5001_v60 = vsel %vm568_vm2, 1.0, %v6210_v27  ;;  %vm348_vm8 = vcmp.lt.f32.partialorder %v4979_v55, %v6248_v39  ;;  %vm5013_vm9 = vmand %vm329_vm15, %vm349_vm3 }
 0x2fb   : > { %v1061_v3 = vmul.f32 %v4598_v63, %v1057_v29  ;;  %v1088_v7 = vmul.f32 %v5001_v60, %v1084_v10  ;;  %v1541_v16 = vmul.f32 %v6251_v9, %v6138_v47  ;;  %vm328_vm10 = vcmp.ge.f32.partialorder %v4979_v55, %v6243_v54  ;;  %vm5032_vm12 = vmand %vm292_vm6, %vm312_vm4  ;;  %v5044_v10 = vld [vmem:[%s5659_s2] sm:$0xff]  ;;  %v6268_v47 = vld [vmem:[#allocation38_spill] sm:$0xff] }
 0x2fc   : > { %v1779_v57 = vadd.f32 %v1775_v19, %v1751_v30  ;;  %v5003_v50 = vpop.permute.xlu1 %1603  ;;  %v6252_v30 = vmov 43   ;;  %v6253_v19 = vld [vmem:[#allocation24_spill] sm:$0xff]  ;;  %v5039_v29 = vsel %vm4986_vm5, 1.0, %v6210_v27  ;;  %vm5054_vm6 = vmand %vm293_vm0, %vm313_vm7  ;;  %v1060_v59 = vmul.f32 %v6142_v14, %v1056_v36 }
 0x2fd   : > { %2919 = vset.pattern.permute.xlu1 %v6252_v30  ;;  %vm385_vm11 = vcmp.lt.f32.partialorder %v6183_v40, %v6253_v19  ;;  %6256 = vst [vmem:[#allocation174_spill] sm:$0xff] %v5039_v29  ;;  %v1089_v22 = vmul.f32 %v5039_v29, %v1085_v41  ;;  %v1565_v9 = vmul.f32 %v6259_v31, %v4961_v42  ;;  %v2530_v28 = vsel %vm5013_vm9, 1.0, %v6210_v27  ;;  %v6261_v41 = vld [vmem:[#allocation20_spill] sm:$0xff]  ;;  %vm352_vm14 = vmand %vm328_vm10, %vm348_vm8  ;;  %v6271_v29 = vld [vmem:[#allocation41_spill] sm:$0xff] }
 0x2fe   : > { %1859 = vperm.xlu1 %2919, %v5044_v10   ;;  %v2651_v17 = vpack.c.bf16 %v1779_v57, %v4931_v62  ;;  %v1564_v62 = vmul.f32 %v6260_v8, %v4949_v52  ;;  %v5066_v57 = vsub.f32 %v6183_v40, %v6242_v58  ;;  %vm365_vm13 = vcmp.ge.f32.partialorder %v6183_v40, %v6241_v20  ;;  %v6265_v58 = vld [vmem:[#allocation149_spill] sm:$0xff] }
 0x2ff   : > { %v745_v14 = vmul.f32 %v6261_v41, %v4998_v23  ;;  %vm5084_vm15 = vmand %vm365_vm13, %vm385_vm11  ;;  %v5088_v20 = vadd.f32 %v1089_v22, %v1061_v3  ;;  %v1540_v36 = vmul.f32 %v6265_v58, %v4000_v0  ;;  %v1545_v4 = vmul.f32 %v1541_v16, %v4781_v48  ;;  %v5112_v48 = vld [vmem:[%s5659_s2 + $0x8] sm:$0xff]  ;;  %v6267_v41 = vld [vmem:[#allocation47_spill] sm:$0xff] }
 0x300   : > { %2652 = vmatpush3.bf16.msra.mxu0 %v2651_v17  ;;  %v5093_v39 = vadd.f32 %v1088_v7, %v1060_v59  ;;  %v5097_v17 = vsub.f32 %v4979_v55, %v6243_v54  ;;  %v5101_v19 = vsub.f32 %v6183_v40, %v6236_v61  ;;  %v2525_v3 = vsel %vm5032_vm12, 1.0, %v6210_v27  ;;  %v6272_v0 = vld [vmem:[#allocation43_spill] sm:$0xff] }
 0x301   : > { %6264 = vst [vmem:[#allocation136_spill] sm:$0xff] %v5088_v20  ;;  %v1952_v31 = vpop.permute.xlu1 %1951  ;;  %v2526_v22 = vsel %vm5054_vm6, 1.0, %v6210_v27  ;;  %v2529_v54 = vsel %vm352_vm14, 1.0, %v6210_v27  ;;  %v1569_v40 = vmul.f32 %v1565_v9, %v5088_v20  ;;  %v749_v16 = vmul.f32 %v2530_v28, %v745_v14  ;;  %v6269_v9 = vld [vmem:[#allocation39_spill] sm:$0xff]  ;;  %v6270_v14 = vld [vmem:[#allocation122_spill] sm:$0xff] }
 0x302   : > { %1863 = vperm.xlu1 %2919, %v5112_v48   ;;  %v1568_v61 = vmul.f32 %v1564_v62, %v5093_v39  ;;  %v1957_v7 = vmul.f32 %v1952_v31, %v4302_v33  ;;  %v2534_v63 = vsel %vm5084_vm15, 1.0, %v6210_v27  ;;  %v805_v59 = vmul.f32 %v6266_v1, %v4261_v51  ;;  %v6273_v1 = vld [vmem:[#allocation45_spill] sm:$0xff] }
 0x303   : > { %v804_v58 = vmul.f32 %v6267_v41, %v6158_v46  ;;  %v861_v2 = vmul.f32 %v6268_v47, %v4302_v33  ;;  %v717_v20 = vmul.f32 %v6269_v9, %v5066_v57  ;;  %v1544_v62 = vmul.f32 %v1540_v36, %v4753_v44  ;;  %v6274_v41 = vld [vmem:[#allocation119_spill] sm:$0xff]  ;;  %v6276_v36 = vld [vmem:[#allocation72_spill] sm:$0xff] }
 0x304   : > { %v5131_v31 = vadd.f32 %v1569_v40, %v1545_v4  ;;  %v744_v8 = vmul.f32 %v6271_v29, %v6270_v14  ;;  %v776_v53 = vmul.f32 %v6272_v0, %v5097_v17  ;;  %v777_v11 = vmul.f32 %v6273_v1, %v5101_v19  ;;  %v5151_v0 = vld [vmem:[%s5659_s2 + $0x18] sm:$0xff]  ;;  %v6278_v1 = vld [vmem:[#allocation128_spill] sm:$0xff] }
 0x305   : > { %v1956_v56 = vmul.f32 %v6275_v37, %v6274_v41  ;;  %v1981_v44 = vmul.f32 %v4846_v24, %v4961_v42  ;;  %v1961_v4 = vmul.f32 %v1957_v7, %v6276_v36  ;;  %v5145_v40 = vadd.f32 %v1568_v61, %v1544_v62  ;;  %v6279_v24 = vld [vmem:[#allocation50_spill] sm:$0xff]  ;;  %v6280_v61 = vld [vmem:[#allocation165_spill] sm:$0xff] }
 0x306   : > { %2922 = vset.pattern.permute.xlu1 %v6209_v34  ;;  %v1972_v47 = vpop.permute.xlu1 %1971  ;;  %v809_v37 = vmul.f32 %v2534_v63, %v805_v59  ;;  %v6277_v34 = vld [vmem:[#allocation37_spill] sm:$0xff]  ;;  %v808_v14 = vmul.f32 %v6278_v1, %v804_v58  ;;  %v833_v7 = vmul.f32 %v6279_v24, %v4998_v23  ;;  %v865_v62 = vmul.f32 %v6280_v61, %v861_v2  ;;  %v6281_v36 = vld [vmem:[#allocation58_spill] sm:$0xff] }
 0x307   : > { %v1980_v29 = vmul.f32 %v1972_v47, %v4949_v52  ;;  %2055 = vperm.xlu1 %2922, %v5151_v0   ;;  %v716_v9 = vmul.f32 %v6277_v34, %v4943_v12  ;;  %v1985_v47 = vmul.f32 %v1981_v44, %v5131_v31  ;;  %v1960_v52 = vmul.f32 %v1956_v56, %v6281_v36  ;;  %v6283_v58 = vld [vmem:[#allocation114_spill] sm:$0xff]  ;;  %v6284_v56 = vld [vmem:[#allocation103_spill] sm:$0xff] }
 0x308   : > { %v721_v18 = vmul.f32 %v2526_v22, %v717_v20  ;;  %v748_v49 = vmul.f32 %v2529_v54, %v744_v8  ;;  %v780_v38 = vmul.f32 %v2529_v54, %v776_v53  ;;  %v781_v59 = vmul.f32 %v2530_v28, %v777_v11  ;;  %v6285_v28 = vld [vmem:[#allocation104_spill] sm:$0xff]  ;;  %v6287_v53 = vld [vmem:[#allocation110_spill] sm:$0xff] }
 0x309   : > { %v1984_v42 = vmul.f32 %v1980_v29, %v5145_v40  ;;  %v1304_v34 = vmul.f32 %v6282_v25, %v6158_v46  ;;  %v1356_v1 = vmul.f32 %v6283_v58, %v6274_v41  ;;  %v1989_v32 = vadd.f32 %v1985_v47, %v1961_v4  ;;  %v6286_v46 = vld [vmem:[#allocation108_spill] sm:$0xff] }
 0x30a   : > { %v720_v44 = vmul.f32 %v2525_v3, %v716_v9  ;;  %v837_v61 = vmul.f32 %v2534_v63, %v833_v7  ;;  %v1280_v29 = vmul.f32 %v6284_v56, %v4943_v12  ;;  %v812_v20 = vadd.f32 %v808_v14, %v780_v38  ;;  %v6289_v3 = vld [vmem:[#allocation116_spill] sm:$0xff]  ;;  %v6291_v9 = vld [vmem:[#allocation130_spill] sm:$0xff] }
 0x30b   : > { %v1988_v24 = vadd.f32 %v1984_v42, %v1960_v52  ;;  %2923 = vset.pattern.permute.xlu1 %v6228_v26  ;;  %v1740_v2 = vpop.permute.xlu1 %1739  ;;  %v1281_v11 = vmul.f32 %v6285_v28, %v5066_v57  ;;  %v1332_v25 = vmul.f32 %v6286_v46, %v5097_v17  ;;  %v1333_v52 = vmul.f32 %v6287_v53, %v5101_v19  ;;  %v6288_v26 = vld [vmem:[#allocation29_spill] sm:$0xff]  ;;  %v6290_v14 = vld [vmem:[#allocation132_spill] sm:$0xff] }
 0x30c   : > { %2075 = vperm.xlu1 %2923, %v4652_v21   ;;  %vm600_vm2 = vcmp.lt.f32.partialorder %v4979_v55, %v6288_v26  ;;  %v1305_v22 = vmul.f32 %v6289_v3, %v4261_v51  ;;  %v752_v54 = vadd.f32 %v748_v49, %v720_v44  ;;  %v753_v38 = vadd.f32 %v749_v16, %v721_v18  ;;  %v1764_v18 = vpop.permute.xlu0 %1763  ;;  %v6294_v44 = vld [vmem:[#allocation181_spill] sm:$0xff] }
 0x30d   : > { %v2653_v42 = vpack.c.bf16 %v1989_v32, %v1988_v24  ;;  %v813_v63 = vadd.f32 %v809_v37, %v781_v59  ;;  %v1357_v8 = vmul.f32 %v6290_v14, %v4302_v33  ;;  %v1308_v4 = vmul.f32 %v1304_v34, %v812_v20  ;;  %v6293_v34 = vld [vmem:[#allocation89_spill] sm:$0xff] }
 0x30e   : > { %v1360_v7 = vmul.f32 %v1356_v1, %v6291_v9  ;;  %vm580_vm3 = vcmp.ge.f32.partialorder %v4979_v55, %v6229_v5  ;;  %v5188_v32 = vsub.f32 %v4979_v55, %v6288_v26  ;;  %v5190_v36 = vadd.f32 %v865_v62, %v837_v61  ;;  %v6295_v61 = vld [vmem:[#allocation84_spill] sm:$0xff]  ;;  %v5216_v46 = vld [vmem:[%s3330_s11 + $0x8] sm:$0xff] }
 0x30f   : > { %v1744_v47 = vpop.permute.xlu1 %1743  ;;  %2654 = vmatprep.subr.bf16.mxu0 %v2653_v42  ;;  %v1284_v51 = vmul.f32 %v1280_v29, %v752_v54  ;;  %vm604_vm1 = vmand %vm580_vm3, %vm600_vm2  ;;  %v1285_v49 = vmul.f32 %v1281_v11, %v753_v38  ;;  %v1336_v16 = vmul.f32 %v1332_v25, %v812_v20  ;;  %v1337_v37 = vmul.f32 %v1333_v52, %v813_v63  ;;  %v6296_v25 = vld [vmem:[#allocation49_spill] sm:$0xff]  ;;  %v6297_v42 = vld [vmem:[#allocation27_spill] sm:$0xff] }
 0x310   : > { %6292 = vst [vmem:[#allocation144_spill] sm:$0xff] %v5188_v32  ;;  %2924 = vset.pattern.permute.xlu1 %v6235_v45  ;;  %v1748_v59 = vmul.f32 %v1740_v2, %v4943_v12  ;;  %v1309_v5 = vmul.f32 %v1305_v22, %v813_v63  ;;  %v1140_v62 = vmul.f32 %v6293_v34, %v5188_v32  ;;  %v5207_v12 = vsel %vm604_vm1, 1.0, %v6210_v27  ;;  %v5227_v22 = vld [vmem:[%s3330_s11] sm:$0xff]  ;;  %v6301_v63 = vld [vmem:[#allocation189_spill] sm:$0xff] }
 0x311   : > { %1843 = vperm.xlu1 %2924, %v4652_v21   ;;  %v1361_v58 = vmul.f32 %v1357_v8, %v5190_v36  ;;  %v5201_v45 = vadd.f32 %v1360_v7, %v1336_v16  ;;  %v1312_v1 = vadd.f32 %v1308_v4, %v1284_v51  ;;  %v1749_v24 = vmul.f32 %v1744_v47, %v5066_v57  ;;  %v6302_v7 = vld [vmem:[#allocation185_spill] sm:$0xff]  ;;  %v6304_v51 = vld [vmem:[#allocation88_spill] sm:$0xff] }
 0x312   : > { %v1112_v56 = vmul.f32 %v6295_v61, %v6294_v44  ;;  %v1772_v21 = vmul.f32 %v1764_v18, %v6274_v41  ;;  %v1313_v20 = vadd.f32 %v1309_v5, %v1285_v49  ;;  %v1144_v57 = vmul.f32 %v5207_v12, %v1140_v62  ;;  %v6306_v5 = vld [vmem:[#allocation179_spill] sm:$0xff]  ;;  %v6307_v34 = vld [vmem:[#allocation76_spill] sm:$0xff] }
 0x313   : > { %v1752_v29 = vmul.f32 %v1748_v59, %v1312_v1  ;;  %v5210_v28 = vadd.f32 %v1361_v58, %v1337_v37  ;;  %vm579_vm0 = vcmp.ge.f32.partialorder %v5216_v46, %v6296_v25  ;;  %v5224_v3 = vsub.f32 %v5216_v46, %v6297_v42  ;;  %v6305_v37 = vld [vmem:[#allocation23_spill] sm:$0xff]  ;;  %v6308_v58 = vld [vmem:[#allocation78_spill] sm:$0xff] }
 0x314   : > { %v1768_v2 = vpop.permute.xlu1 %1767  ;;  %v1776_v53 = vmul.f32 %v1772_v21, %v5201_v45  ;;  %v1753_v52 = vmul.f32 %v1749_v24, %v1313_v20  ;;  %v1116_v38 = vmul.f32 %v5001_v60, %v1112_v56  ;;  %v1592_v14 = vmul.f32 %v6301_v63, %v4419_v13  ;;  %v6303_v60 = vld [vmem:[#allocation82_spill] sm:$0xff]  ;;  %v6310_v20 = vld [vmem:[#allocation180_spill] sm:$0xff] }
 0x315   : > { %v1773_v11 = vmul.f32 %v1768_v2, %v4302_v33  ;;  %1847 = vperm.xlu1 %2924, %v5151_v0   ;;  %6298 = vst [vmem:[#allocation139_spill] sm:$0xff] %v5224_v3  ;;  %v6299_v33 = vld [vmem:[#allocation52_spill] sm:$0xff]  ;;  %vm599_vm4 = vcmp.lt.f32.partialorder %v5216_v46, %v6297_v42  ;;  %v1110_v47 = vmul.f32 %v6303_v60, %v6302_v7  ;;  %v6311_v25 = vmov 36  }
 0x316   : > { %v5231_v54 = vsub.f32 %v5227_v22, %v6299_v33  ;;  %vm598_vm5 = vcmp.lt.f32.partialorder %v5227_v22, %v6299_v33  ;;  %v1780_v8 = vadd.f32 %v1776_v53, %v1752_v29  ;;  %vm603_vm7 = vmand %vm579_vm0, %vm599_vm4  ;;  %v1139_v18 = vmul.f32 %v6304_v51, %v5224_v3  ;;  %v6309_v29 = vld [vmem:[#allocation170_spill] sm:$0xff] }
 0x317   : > { %v1777_v41 = vmul.f32 %v1773_v11, %v5210_v28  ;;  %v5248_v49 = vadd.f32 %v1144_v57, %v1116_v38  ;;  %vm578_vm8 = vcmp.ge.f32.partialorder %v5227_v22, %v6305_v37  ;;  %v1111_v62 = vmul.f32 %v6307_v34, %v6306_v5 }
 0x318   : > { %6300 = vst [vmem:[#allocation142_spill] sm:$0xff] %v5231_v54  ;;  %vm602_vm9 = vmand %vm578_vm8, %vm598_vm5  ;;  %v1138_v1 = vmul.f32 %v6308_v58, %v5231_v54  ;;  %v1596_v24 = vmul.f32 %v1592_v14, %v5093_v39  ;;  %v5264_v56 = vsel %vm603_vm7, 1.0, %v6210_v27  ;;  %v1114_v21 = vmul.f32 %v6188_v43, %v1110_v47  ;;  %v6317_v58 = vld [vmem:[#allocation168_spill] sm:$0xff] }
 0x319   : > { %v1781_v4 = vadd.f32 %v1777_v41, %v1753_v52  ;;  %2926 = vset.pattern.permute.xlu1 %v6252_v30  ;;  %v1608_v9 = vpop.permute.xlu1 %1607  ;;  %v1600_v30 = vpop.permute.xlu0 %1599  ;;  %v1143_v2 = vmul.f32 %v5264_v56, %v1139_v18  ;;  %v1590_v11 = vmul.f32 %v6310_v20, %v6309_v29  ;;  %v5274_v39 = vsel %vm602_vm9, 1.0, %v6210_v27  ;;  %v6312_v52 = vld [vmem:[#allocation191_spill] sm:$0xff] }
 0x31a   : > { %v1616_v16 = vmul.f32 %v1608_v9, %v5188_v32  ;;  %1871 = vperm.xlu1 %2926, %v5151_v0   ;;  %v1115_v41 = vmul.f32 %v6312_v52, %v1111_v62  ;;  %v1142_v38 = vmul.f32 %v5274_v39, %v1138_v1  ;;  %v1614_v43 = vmul.f32 %v1600_v30, %v5231_v54 }
 0x31b   : > { %v2655_v59 = vpack.c.bf16 %v1781_v4, %v1780_v8  ;;  %v1615_v63 = vmul.f32 %v5003_v50, %v5224_v3  ;;  %v6313_v8 = vld [vmem:[#allocation182_spill] sm:$0xff]  ;;  %v6314_v4 = vld [vmem:[#allocation64_spill] sm:$0xff]  ;;  %v1594_v47 = vmul.f32 %v1590_v11, %v4840_v35  ;;  %vm2226_vm6 = vcmask 261120  }
 0x31c   : > { %v1620_v61 = vmul.f32 %v1616_v16, %v5248_v49  ;;  %v1591_v9 = vmul.f32 %v6314_v4, %v6313_v8  ;;  %v5286_v60 = vadd.f32 %v1142_v38, %v1114_v21  ;;  %v5289_v51 = vadd.f32 %v1143_v2, %v1115_v41  ;;  %v6319_v41 = vld [vmem:[#allocation145_spill] sm:$0xff]  ;;  %v6320_v38 = vld [vmem:[#allocation115_spill] sm:$0xff] }
 0x31d   : > { %2656 = vmatpush3.bf16.msra.mxu0 %v2655_v59  ;;  %v5282_v14 = vpop.permute.xlu0 %1611  ;;  %v6315_v16 = vmov 37   ;;  %v6316_v59 = vld [vmem:[#allocation171_spill] sm:$0xff]  ;;  %vm614_vm13 = vcmp.ge.f32.partialorder %v5227_v22, %v6299_v33  ;;  %v6355_v33 = vld [vmem:[#allocation85_spill] sm:$0xff]  ;;  %vm615_vm3 = vcmp.ge.f32.partialorder %v5216_v46, %v6297_v42  ;;  %vm616_vm5 = vcmp.ge.f32.partialorder %v4979_v55, %v6288_v26 }
 0x31e   : > { %v5270_v57 = vadd.f32 %v1620_v61, %v1596_v24  ;;  %2927 = vset.pattern.permute.xlu1 %v6311_v25  ;;  %v1992_v53 = vpop.permute.xlu1 %1991  ;;  %v1618_v37 = vmul.f32 %v1614_v43, %v5286_v60  ;;  %v1619_v30 = vmul.f32 %v1615_v63, %v5289_v51  ;;  %v1595_v34 = vmul.f32 %v1591_v9, %v4820_v6  ;;  %v6366_v26 = vld [vmem:[#allocation143_spill] sm:$0xff] }
 0x31f   : > { %1679 = vperm.xlu1 %2927, %v5044_v10   ;;  %v2006_v50 = vmul.f32 %v1992_v53, %v6316_v59  ;;  %v6318_v53 = vld [vmem:[#allocation67_spill] sm:$0xff]  ;;  %v1382_v43 = vmul.f32 %v6320_v38, %v6319_v41 }
 0x320   : > { %v5297_v62 = vadd.f32 %v1618_v37, %v1594_v47  ;;  %v5302_v2 = vadd.f32 %v1619_v30, %v1595_v34  ;;  %v6321_v47 = vld [vmem:[#allocation137_spill] sm:$0xff]  ;;  %v6322_v37 = vld [vmem:[#allocation127_spill] sm:$0xff]  ;;  %v6323_v34 = vld [vmem:[#allocation158_spill] sm:$0xff] }
 0x321   : > { %v2016_v35 = vpop.permute.xlu0 %2015  ;;  %v2010_v21 = vmul.f32 %v2006_v50, %v4892_v15  ;;  %v1407_v30 = vmul.f32 %v6322_v37, %v6317_v58  ;;  %v6328_v38 = vld [vmem:[#allocation183_spill] sm:$0xff] }
 0x322   : > { %v1996_v18 = vpop.permute.xlu1 %1995  ;;  %v2030_v61 = vmul.f32 %v2016_v35, %v5231_v54 }
 0x323   : > { %2929 = vset.pattern.permute.xlu1 %v6315_v16  ;;  %v2007_v1 = vmul.f32 %v1996_v18, %v6317_v58  ;;  %v1406_v18 = vmul.f32 %v6321_v47, %v6316_v59 }
 0x324   : > { %1703 = vperm.xlu1 %2929, %v5044_v10   ;;  %v2034_v11 = vmul.f32 %v2030_v61, %v5297_v62 }
 0x325   : > { %v2011_v6 = vmul.f32 %v2007_v1, %v6318_v53  ;;  %v2024_v9 = vpop.permute.xlu0 %2023  ;;  %v6324_v1 = vld [vmem:[#allocation134_spill] sm:$0xff] }
 0x326   : > { %v2038_v63 = vadd.f32 %v2034_v11, %v2010_v21  ;;  %v1383_v35 = vmul.f32 %v6324_v1, %v6323_v34  ;;  %v6326_v21 = vld [vmem:[#allocation54_spill] sm:$0xff]  ;;  %v6327_v11 = vld [vmem:[#allocation65_spill] sm:$0xff] }
 0x327   : > { %v2020_v24 = vpop.permute.xlu1 %2019  ;;  %v1411_v53 = vmul.f32 %v1407_v30, %v6327_v11 }
 0x328   : > { %v2031_v20 = vmul.f32 %v2020_v24, %v5224_v3  ;;  %1707 = vperm.xlu1 %2929, %v5112_v48   ;;  %v6325_v24 = vld [vmem:[#allocation63_spill] sm:$0xff] }
 0x329   : > { %v1386_v61 = vmul.f32 %v1382_v43, %v6325_v24  ;;  %v6332_v24 = vld [vmem:[#allocation68_spill] sm:$0xff] }
 0x32a   : > { %v2035_v52 = vmul.f32 %v2031_v20, %v5302_v2  ;;  %v1410_v20 = vmul.f32 %v1406_v18, %v6326_v21 }
 0x32c   : > { %v2039_v4 = vadd.f32 %v2035_v52, %v2011_v6  ;;  %2930 = vset.pattern.permute.xlu1 %v6311_v25  ;;  %v1784_v15 = vpop.permute.xlu1 %1783  ;;  %v1788_v52 = vpop.permute.xlu0 %1787  ;;  %v5327_v37 = vadd.f32 %v1410_v20, %v1386_v61 }
 0x32d   : > { %1691 = vperm.xlu1 %2930, %v5151_v0  }
 0x32e   : > { %v2657_v50 = vpack.c.bf16 %v2039_v4, %v2038_v63  ;;  %v1387_v63 = vmul.f32 %v1383_v35, %v6328_v38  ;;  %v6329_v4 = vld [vmem:[#allocation155_spill] sm:$0xff]  ;;  %v6335_v38 = vld [vmem:[#allocation53_spill] sm:$0xff] }
 0x32f   : > { %v1798_v47 = vmul.f32 %v1784_v15, %v6329_v4  ;;  %v6337_v4 = vld [vmem:[#allocation188_spill] sm:$0xff] }
 0x330   : > { %2658 = vmatprep.subr.bf16.mxu0 %v2657_v50  ;;  %v6330_v50 = vld [vmem:[#allocation150_spill] sm:$0xff]  ;;  %v5331_v18 = vadd.f32 %v1411_v53, %v1387_v63 }
 0x331   : > { %2932 = vset.pattern.permute.xlu1 %v6315_v16  ;;  %v1808_v25 = vpop.permute.xlu1 %1807  ;;  %v1799_v1 = vmul.f32 %v1788_v52, %v6330_v50  ;;  %v1802_v35 = vmul.f32 %v1798_v47, %v6332_v24  ;;  %v5346_v52 = vld [vmem:[%s3330_s11 + $0x18] sm:$0xff]  ;;  %v6338_v47 = vld [vmem:[#allocation86_spill] sm:$0xff]  ;;  %v6341_v24 = vld [vmem:[#allocation120_spill] sm:$0xff]  ;;  %s229_s11 = scalar_lea.vmem [#allocation8], %s2516_s30  ;;  %s2414_s30 = scalar_lea.sflag [#allocation5], %s3324_s23 }
 0x332   : > { %v1822_v6 = vmul.f32 %v1808_v25, %v6316_v59  ;;  %1715 = vperm.xlu1 %2932, %v5151_v0   ;;  %v6331_v59 = vmov 52   ;;  %v6333_v25 = vld [vmem:[#allocation125_spill] sm:$0xff]  ;;  %v5350_v63 = vsub.f32 %v5346_v52, %v6335_v38  ;;  %vm601_vm10 = vcmp.lt.f32.partialorder %v5346_v52, %v6335_v38  ;;  %v6339_v50 = vld [vmem:[#allocation26_spill] sm:$0xff]  ;;  %s2426_s14 = sshll.u32 %s229_s11, 4  ;;  %s5609_s14 = int_to_ptr.vmem [resolvable:$true] %s2426_s14 }
 0x333   : > { %v1803_v15 = vmul.f32 %v1799_v1, %v6333_v25  ;;  %vm581_vm11 = vcmp.ge.f32.partialorder %v5346_v52, %v6339_v50  ;;  %vm617_vm4 = vcmp.ge.f32.partialorder %v5346_v52, %v6335_v38  ;;  %s3024_s19 = scalar_lea.vmem %s5609_s14, 512  ;;  %p3031_p3 = scmp.lt.s32.totalorder %s5609_s14, %s3029_s12 }
 0x334   : > { %v1826_v16 = vmul.f32 %v1822_v6, %v5327_v37  ;;  %v6334_v6 = vmov 53   ;;  %6336 = vst [vmem:[#allocation140_spill] sm:$0xff] %v5350_v63  ;;  %vm605_vm12 = vmand %vm581_vm11, %vm601_vm10  ;;  %p3025_p7 = scmp.ne.s32.totalorder %s5609_s14, %s3024_s19  ;;  %p3032_p8 = scmp.lt.s32.totalorder %s3030_s13, %s3024_s19 }
 0x335   : > { %v1812_v43 = vpop.permute.xlu1 %1811 }
 0x336   : > { %v1823_v30 = vmul.f32 %v1812_v43, %v6317_v58  ;;  %2933 = vset.pattern.permute.xlu1 %v6331_v59  ;;  %v1830_v21 = vadd.f32 %v1826_v16, %v1802_v35  ;;  %v1113_v43 = vmul.f32 %v6338_v47, %v6337_v4  ;;  %v6342_v35 = vld [vmem:[#allocation174_spill] sm:$0xff]  ;;  %p3026_p10 = pnand %p3025_p7, %p6393_p9  ;;  %p3033_p5 = por %p3032_p8, %p3031_p3 }
 0x337   : > { %2095 = vperm.xlu1 %2933, %v5044_v10  }
 0x338   : > { %v1827_v61 = vmul.f32 %v1823_v30, %v5331_v18  ;;  %v2032_v30 = vmul.f32 %v2024_v9, %v5188_v32  ;;  %v1117_v25 = vmul.f32 %v6342_v35, %v1113_v43  ;;  %v1617_v9 = vmul.f32 %v5282_v14, %v5350_v63  ;;  %v2179_v43 = vld [vmem:[#allocation6 + $0x8] sm:$0xff]  ;;  %p3027_p1 = pneg %p3026_p10 }
 0x339   : > { %2303 = vmatprep.mubr.f32.mxu0 %v2179_v43 }
 0x33a   : > { %v1831_v20 = vadd.f32 %v1827_v61, %v1803_v15  ;;  %v5339_v11 = vpop.permute.xlu1 %1631  ;;  %v6343_v15 = vld [vmem:[#allocation176_spill] sm:$0xff]  ;;  %v6344_v61 = vld [vmem:[#allocation57_spill] sm:$0xff]  ;;  %p3034_p11 = pnand %p3033_p5, %p3027_p1 }
 0x33b   : > { %2935 = vset.pattern.permute.xlu1 %v6334_v6 }
 0x33c   : > { %2119 = vperm.xlu1 %2935, %v5044_v10   ;;  %v2659_v53 = vpack.c.bf16 %v1831_v20, %v1830_v21  ;;  %v6340_v10 = vld [vmem:[#allocation80_spill] sm:$0xff]  ;;  %v1593_v21 = vmul.f32 %v6344_v61, %v6343_v15  ;;  %v5369_v20 = vsel %vm605_vm12, 1.0, %v6210_v27 }
 0x33d   : > { %v1141_v1 = vmul.f32 %v6340_v10, %v5350_v63  ;;  %v6345_v61 = vld [vmem:[#allocation136_spill] sm:$0xff] }
 0x33e   : > { %2660 = vmatpush3.bf16.msra.mxu0 %v2659_v53  ;;  %v1796_v53 = vpop.permute.xlu0 %1795  ;;  %v1597_v32 = vmul.f32 %v1593_v21, %v6345_v61 }
 0x33f   : > { %v5343_v58 = vpop.permute.xlu1 %1651  ;;  %v1145_v50 = vmul.f32 %v5369_v20, %v1141_v1 }
 0x340   : > { %2123 = vperm.xlu1 %2935, %v5112_v48  }
 0x341   : > { %v5377_v35 = vadd.f32 %v1145_v50, %v1117_v25  ;;  %v6347_v50 = vld [vmem:[#allocation121_spill] sm:$0xff] }
 0x342   : > { %v1628_v1 = vpop.permute.xlu0 %1627 }
 0x344   : > { %2936 = vset.pattern.permute.xlu1 %v6331_v59  ;;  %v2000_v16 = vpop.permute.xlu1 %1999  ;;  %v2036_v59 = vmul.f32 %v2032_v30, %v5270_v57  ;;  %v6346_v30 = vld [vmem:[#allocation173_spill] sm:$0xff] }
 0x345   : > { %v2008_v48 = vmul.f32 %v2000_v16, %v6341_v24  ;;  %2107 = vperm.xlu1 %2936, %v5151_v0  }
 0x346   : > { %v5388_v21 = vpop.permute.xlu0 %1635 }
 0x347   : > { %v2012_v47 = vmul.f32 %v2008_v48, %v5145_v40  ;;  %v1621_v40 = vmul.f32 %v1617_v9, %v5377_v35  ;;  %v1385_v9 = vmul.f32 %v6347_v50, %v4998_v23  ;;  %v1801_v50 = vmul.f32 %v1796_v53, %v5101_v19  ;;  %v6351_v19 = vld [vmem:[#allocation30_spill] sm:$0xff] }
 0x348   : > { %v2004_v10 = vpop.permute.xlu1 %2003  ;;  %v1174_v53 = vsub.f32 %v5227_v22, %v6351_v19  ;;  %vm634_vm14 = vcmp.lt.f32.partialorder %v5227_v22, %v6351_v19 }
 0x349   : > { %v2040_v16 = vadd.f32 %v2036_v59, %v2012_v47  ;;  %2938 = vset.pattern.permute.xlu1 %v6334_v6  ;;  %v2009_v48 = vmul.f32 %v2004_v10, %v6346_v30  ;;  %v5383_v54 = vadd.f32 %v1621_v40, %v1597_v32  ;;  %v6348_v32 = vld [vmem:[#allocation138_spill] sm:$0xff]  ;;  %vm638_vm2 = vmand %vm614_vm13, %vm634_vm14  ;;  %vm650_vm13 = vcmp.ge.f32.partialorder %v5227_v22, %v6351_v19 }
 0x34a   : > { %2131 = vperm.xlu1 %2938, %v5151_v0   ;;  %v2180_v0 = vld [vmem:[#allocation6 + $0x10] sm:$0xff]  ;;  %v1409_v43 = vmul.f32 %v6348_v32, %v6346_v30  ;;  %v1656_v40 = vpop.permute.xlu0 %1655 }
 0x34b   : > { %v2013_v6 = vmul.f32 %v2009_v48, %v5131_v31  ;;  %2635 = vmatprep.mubr.msk.f32.mxu1 %vm2226_vm6, %v2180_v0  ;;  %v1389_v31 = vmul.f32 %v1385_v9, %v5190_v36  ;;  %v6349_v48 = vld [vmem:[#allocation62_spill] sm:$0xff]  ;;  %v1805_v36 = vmul.f32 %v1801_v50, %v5210_v28  ;;  %v6354_v28 = vld [vmem:[#allocation91_spill] sm:$0xff] }
 0x34c   : > { %v6356_v50 = vld [vmem:[#allocation95_spill] sm:$0xff] }
 0x34d   : > { %v2028_v3 = vpop.permute.xlu1 %2027 }
 0x34e   : > { %v2033_v14 = vmul.f32 %v2028_v3, %v5350_v63  ;;  %v5407_v9 = vpop.permute.xlu0 %1663 }
 0x350   : > { %v2037_v25 = vmul.f32 %v2033_v14, %v5383_v54  ;;  %v1413_v14 = vmul.f32 %v1409_v43, %v6349_v48 }
 0x352   : > { %v2041_v47 = vadd.f32 %v2037_v25, %v2013_v6  ;;  %v1792_v59 = vpop.permute.xlu1 %1791  ;;  %v5401_v0 = vadd.f32 %v1413_v14, %v1389_v31  ;;  %v6353_v31 = vld [vmem:[#allocation184_spill] sm:$0xff]  ;;  %v5423_v48 = vpop.permute.xlu0 %1839 }
 0x353   : > { %v1800_v6 = vmul.f32 %v1792_v59, %v5097_v17 }
 0x354   : > { %v2661_v10 = vpack.c.bf16 %v2041_v47, %v2040_v16  ;;  %v6350_v16 = vld [vmem:[#allocation133_spill] sm:$0xff] }
 0x356   : > { %2662 = vmatprep.subr.bf16.mxu0 %v2661_v10  ;;  %v1804_v10 = vmul.f32 %v1800_v6, %v5201_v45  ;;  %v1194_v6 = vmul.f32 %v6355_v33, %v1174_v53  ;;  %v5442_v42 = vpop.permute.xlu0 %2051  ;;  %v1643_v33 = vmul.f32 %v5339_v11, %v6306_v5 }
 0x357   : > { %v1816_v3 = vpop.permute.xlu1 %1815 }
 0x358   : > { %v1824_v61 = vmul.f32 %v1816_v3, %v6341_v24 }
 0x35a   : > { %v1828_v47 = vmul.f32 %v1824_v61, %v6350_v16  ;;  %v1166_v61 = vmul.f32 %v6354_v28, %v6353_v31 }
 0x35b   : > { %v1820_v25 = vpop.permute.xlu1 %1819 }
 0x35c   : > { %v1825_v32 = vmul.f32 %v1820_v25, %v6346_v30  ;;  %v1832_v43 = vadd.f32 %v1828_v47, %v1804_v10  ;;  %v6352_v30 = vld [vmem:[#allocation56_spill] sm:$0xff]  ;;  %v1170_v25 = vmul.f32 %v5274_v39, %v1166_v61  ;;  %v6358_v10 = vld [vmem:[#allocation190_spill] sm:$0xff]  ;;  %v1642_v61 = vmul.f32 %v1628_v1, %v6302_v7  ;;  %v2068_v1 = vpop.permute.xlu0 %2067 }
 0x35d   : > { %v1175_v45 = vsub.f32 %v5216_v46, %v6352_v30  ;;  %vm635_vm15 = vcmp.lt.f32.partialorder %v5216_v46, %v6352_v30  ;;  %vm651_vm10 = vcmp.ge.f32.partialorder %v5216_v46, %v6352_v30 }
 0x35e   : > { %v1829_v24 = vmul.f32 %v1825_v32, %v5401_v0  ;;  %vm639_vm1 = vmand %vm615_vm3, %vm635_vm15  ;;  %v5433_v32 = vsel %vm638_vm2, 1.0, %v6210_v27 }
 0x35f   : > { %v1195_v47 = vmul.f32 %v6356_v50, %v1175_v45  ;;  %6357 = vst [vmem:[#allocation141_spill] sm:$0xff] %v5433_v32  ;;  %v5440_v28 = vsel %vm639_vm1, 1.0, %v6210_v27 }
 0x360   : > { %v1833_v3 = vadd.f32 %v1829_v24, %v1805_v36  ;;  %v5409_v17 = vpop.permute.xlu1 %1639  ;;  %v6359_v36 = vld [vmem:[#allocation83_spill] sm:$0xff] }
 0x361   : > { %v1167_v24 = vmul.f32 %v6359_v36, %v6358_v10  ;;  %v1199_v39 = vmul.f32 %v5440_v28, %v1195_v47  ;;  %v1646_v10 = vmul.f32 %v1642_v61, %v5286_v60 }
 0x362   : > { %v2663_v59 = vpack.c.bf16 %v1833_v3, %v1832_v43  ;;  %v1198_v43 = vmul.f32 %v5433_v32, %v1194_v6  ;;  %v1666_v3 = vmul.f32 %v5343_v58, %v1174_v53  ;;  %v1667_v6 = vmul.f32 %v1656_v40, %v1175_v45 }
 0x363   : > { %v1171_v36 = vmul.f32 %v5264_v56, %v1167_v24  ;;  %v1647_v32 = vmul.f32 %v1643_v33, %v5289_v51  ;;  %v2082_v40 = vmul.f32 %v2068_v1, %v1174_v53 }
 0x364   : > { %2664 = vmatpush3.bf16.msra.mxu0 %v2663_v59  ;;  %v5448_v50 = vadd.f32 %v1198_v43, %v1170_v25 }
 0x365   : > { %v5425_v14 = vpop.permute.xlu1 %1659  ;;  %v5453_v31 = vadd.f32 %v1199_v39, %v1171_v36  ;;  %v6364_v36 = vld [vmem:[#allocation96_spill] sm:$0xff] }
 0x366   : > { %v1670_v58 = vmul.f32 %v1666_v3, %v5448_v50 }
 0x367   : > { %v1671_v7 = vmul.f32 %v1667_v6, %v5453_v31 }
 0x368   : > { %v5458_v11 = vadd.f32 %v1670_v58, %v1646_v10  ;;  %v6360_v10 = vld [vmem:[#allocation32_spill] sm:$0xff] }
 0x369   : > { %v5462_v43 = vadd.f32 %v1671_v7, %v1647_v32  ;;  %vm636_vm0 = vcmp.lt.f32.partialorder %v4979_v55, %v6360_v10  ;;  %v1176_v53 = vsub.f32 %v4979_v55, %v6360_v10  ;;  %v6361_v7 = vld [vmem:[#allocation33_spill] sm:$0xff]  ;;  %vm652_vm1 = vcmp.ge.f32.partialorder %v4979_v55, %v6360_v10 }
 0x36a   : > { %v2044_v59 = vpop.permute.xlu1 %2043  ;;  %v2086_v3 = vmul.f32 %v2082_v40, %v5458_v11  ;;  %vm637_vm7 = vcmp.lt.f32.partialorder %v5346_v52, %v6361_v7  ;;  %vm640_vm8 = vmand %vm616_vm5, %vm636_vm0 }
 0x36b   : > { %v2058_v47 = vmul.f32 %v2044_v59, %v6309_v29  ;;  %v1196_v6 = vmul.f32 %v6364_v36, %v1176_v53  ;;  %vm641_vm9 = vmand %vm617_vm4, %vm637_vm7  ;;  %v5487_v40 = vsel %vm640_vm8, 1.0, %v6210_v27  ;;  %vm653_vm4 = vcmp.ge.f32.partialorder %v5346_v52, %v6361_v7 }
 0x36d   : > { %v2062_v24 = vmul.f32 %v2058_v47, %v5297_v62  ;;  %v1177_v62 = vsub.f32 %v5346_v52, %v6361_v7  ;;  %v6365_v47 = vld [vmem:[#allocation87_spill] sm:$0xff]  ;;  %v6392_v7 = vld [vmem:[#allocation185_spill] sm:$0xff] }
 0x36e   : > { %v2048_v63 = vpop.permute.xlu1 %2047 }
 0x36f   : > { %v2059_v25 = vmul.f32 %v2048_v63, %v6313_v8  ;;  %v2090_v39 = vadd.f32 %v2086_v3, %v2062_v24  ;;  %v1197_v1 = vmul.f32 %v6365_v47, %v1177_v62  ;;  %v1669_v36 = vmul.f32 %v5407_v9, %v1177_v62 }
 0x371   : > { %v2063_v51 = vmul.f32 %v2059_v25, %v5302_v2  ;;  %v6362_v2 = vld [vmem:[#allocation178_spill] sm:$0xff]  ;;  %v6367_v25 = vld [vmem:[#allocation93_spill] sm:$0xff] }
 0x373   : > { %v2072_v56 = vpop.permute.xlu1 %2071 }
 0x374   : > { %v2083_v60 = vmul.f32 %v2072_v56, %v1175_v45  ;;  %v6363_v45 = vld [vmem:[#allocation94_spill] sm:$0xff]  ;;  %v1168_v56 = vmul.f32 %v6367_v25, %v6366_v26  ;;  %v2080_v25 = vpop.permute.xlu0 %2079 }
 0x375   : > { %v1169_v32 = vmul.f32 %v6363_v45, %v6362_v2 }
 0x376   : > { %v2087_v59 = vmul.f32 %v2083_v60, %v5462_v43  ;;  %v5491_v60 = vsel %vm641_vm9, 1.0, %v6210_v27 }
 0x377   : > { %v1173_v3 = vmul.f32 %v5369_v20, %v1169_v32  ;;  %v1668_v20 = vmul.f32 %v5425_v14, %v1176_v53 }
 0x378   : > { %v2091_v61 = vadd.f32 %v2087_v59, %v2063_v51  ;;  %v1836_v33 = vpop.permute.xlu1 %1835  ;;  %v1200_v51 = vmul.f32 %v5487_v40, %v1196_v6 }
 0x379   : > { %v1850_v24 = vmul.f32 %v1836_v33, %v6319_v41  ;;  %v1201_v41 = vmul.f32 %v5491_v60, %v1197_v1  ;;  %v1172_v33 = vmul.f32 %v5207_v12, %v1168_v56 }
 0x37a   : > { %v2665_v63 = vpack.c.bf16 %v2091_v61, %v2090_v39  ;;  %v1645_v39 = vmul.f32 %v5409_v17, %v6337_v4  ;;  %v6368_v61 = vld [vmem:[#allocation70_spill] sm:$0xff] }
 0x37b   : > { %v1854_v32 = vmul.f32 %v1850_v24, %v5327_v37  ;;  %v5510_v17 = vadd.f32 %v1200_v51, %v1172_v33 }
 0x37c   : > { %2666 = vmatprep.subr.bf16.mxu0 %v2665_v63 }
 0x37d   : > { %v1860_v58 = vpop.permute.xlu1 %1859  ;;  %v1672_v37 = vmul.f32 %v1668_v20, %v5510_v17 }
 0x37e   : > { %v1874_v38 = vmul.f32 %v1860_v58, %v6309_v29  ;;  %v1851_v29 = vmul.f32 %v5423_v48, %v6323_v34  ;;  %v6369_v34 = vld [vmem:[#allocation66_spill] sm:$0xff]  ;;  %v5508_v58 = vadd.f32 %v1201_v41, %v1173_v3  ;;  %v2085_v3 = vmul.f32 %v2080_v25, %v1177_v62  ;;  %v1868_v62 = vpop.permute.xlu0 %1867 }
 0x380   : > { %v1878_v63 = vmul.f32 %v1874_v38, %v6368_v61  ;;  %v1855_v6 = vmul.f32 %v1851_v29, %v5331_v18  ;;  %v1649_v38 = vmul.f32 %v1645_v39, %v5377_v35  ;;  %v1673_v14 = vmul.f32 %v1669_v36, %v5508_v58 }
 0x381   : > { %v1864_v59 = vpop.permute.xlu1 %1863 }
 0x382   : > { %v1875_v45 = vmul.f32 %v1864_v59, %v6313_v8  ;;  %v1644_v8 = vmul.f32 %v5388_v21, %v6294_v44  ;;  %v1882_v12 = vadd.f32 %v1878_v63, %v1854_v32  ;;  %v5519_v24 = vadd.f32 %v1673_v14, %v1649_v38  ;;  %v6372_v38 = vld [vmem:[#allocation36_spill] sm:$0xff] }
 0x383   : > { %v2060_v21 = vmul.f32 %v5442_v42, %v4419_v13  ;;  %v6370_v42 = vld [vmem:[#allocation122_spill] sm:$0xff] }
 0x384   : > { %v1879_v48 = vmul.f32 %v1875_v45, %v6369_v34  ;;  %v1648_v56 = vmul.f32 %v1644_v8, %v5248_v49  ;;  %v2089_v39 = vmul.f32 %v2085_v3, %v5519_v24  ;;  %v6371_v34 = vld [vmem:[#allocation60_spill] sm:$0xff]  ;;  %v6373_v3 = vld [vmem:[#allocation59_spill] sm:$0xff] }
 0x385   : > { %v2064_v61 = vmul.f32 %v2060_v21, %v5270_v57  ;;  %vm670_vm11 = vcmp.lt.f32.partialorder %v5227_v22, %v6373_v3 }
 0x386   : > { %v1883_v47 = vadd.f32 %v1879_v48, %v1855_v6  ;;  %v2056_v9 = vpop.permute.xlu1 %2055  ;;  %v5524_v59 = vadd.f32 %v1672_v37, %v1648_v56  ;;  %v2184_v56 = vld [vmem:[#allocation6 + $0x30] sm:$0xff]  ;;  %vm674_vm15 = vmand %vm650_vm13, %vm670_vm11 }
 0x387   : > { %v2061_v18 = vmul.f32 %v2056_v9, %v6343_v15 }
 0x388   : > { %v2667_v1 = vpack.c.bf16 %v1883_v47, %v1882_v12 }
 0x389   : > { %v2065_v51 = vmul.f32 %v2061_v18, %v5383_v54  ;;  %v2178_v18 = vld [vmem:[#allocation6] sm:$0xff] }
 0x38a   : > { %2668 = vmatpush3.bf16.msra.mxu0 %v2667_v1  ;;  %v2182_v1 = vld [vmem:[#allocation6 + $0x20] sm:$0xff] }
 0x38b   : > { %v2076_v35 = vpop.permute.xlu1 %2075  ;;  %v2093_v49 = vadd.f32 %v2089_v39, %v2065_v51  ;;  %v1230_v51 = vsub.f32 %v5227_v22, %v6373_v3  ;;  %v6374_v39 = vld [vmem:[#allocation34_spill] sm:$0xff] }
 0x38c   : > { %v2084_v29 = vmul.f32 %v2076_v35, %v1176_v53  ;;  %v1876_v53 = vmul.f32 %v1868_v62, %v4419_v13  ;;  %v2181_v13 = vld [vmem:[#allocation6 + $0x18] sm:$0xff]  ;;  %vm671_vm12 = vcmp.lt.f32.partialorder %v5216_v46, %v6374_v39 }
 0x38d   : > { %vm675_vm14 = vmand %vm651_vm10, %vm671_vm12  ;;  %v6379_v62 = vld [vmem:[#allocation139_spill] sm:$0xff] }
 0x38e   : > { %v2088_v63 = vmul.f32 %v2084_v29, %v5524_v59  ;;  %v1880_v48 = vmul.f32 %v1876_v53, %v6371_v34  ;;  %v2187_v29 = vld [vmem:[#allocation6 + $0x48] sm:$0xff] }
 0x38f   : > { %v6381_v53 = vld [vmem:[#allocation141_spill] sm:$0xff] }
 0x390   : > { %v2092_v45 = vadd.f32 %v2088_v63, %v2064_v61  ;;  %v1844_v41 = vpop.permute.xlu1 %1843  ;;  %v1231_v61 = vsub.f32 %v5216_v46, %v6374_v39  ;;  %v6375_v63 = vld [vmem:[#allocation142_spill] sm:$0xff] }
 0x391   : > { %v1852_v20 = vmul.f32 %v1844_v41, %v6370_v42  ;;  %v6377_v41 = vld [vmem:[#allocation92_spill] sm:$0xff] }
 0x392   : > { %v2669_v33 = vpack.c.bf16 %v2093_v49, %v2092_v45  ;;  %v6376_v49 = vld [vmem:[#allocation97_spill] sm:$0xff] }
 0x393   : > { %v1856_v6 = vmul.f32 %v1852_v20, %v6350_v16  ;;  %v1684_v16 = vpop.permute.xlu0 %1683  ;;  %v1222_v45 = vmul.f32 %v6376_v49, %v6375_v63 }
 0x394   : > { %v1848_v36 = vpop.permute.xlu1 %1847  ;;  %2670 = vmatprep.subr.bf16.mxu0 %v2669_v33  ;;  %v1250_v33 = vmul.f32 %v6377_v41, %v1230_v51 }
 0x395   : > { %v1853_v54 = vmul.f32 %v1848_v36, %v4998_v23  ;;  %v1884_v47 = vadd.f32 %v1880_v48, %v1856_v6  ;;  %v6378_v36 = vld [vmem:[#allocation100_spill] sm:$0xff]  ;;  %v1226_v46 = vmul.f32 %v6381_v53, %v1222_v45  ;;  %v2563_v6 = vsel %vm674_vm15, 1.0, %v6210_v27 }
 0x396   : > { %v1251_v42 = vmul.f32 %v6378_v36, %v1231_v61  ;;  %v1254_v34 = vmul.f32 %v2563_v6, %v1250_v33  ;;  %v6391_v33 = vld [vmem:[#allocation98_spill] sm:$0xff] }
 0x397   : > { %v1857_v8 = vmul.f32 %v1853_v54, %v5401_v0  ;;  %v2188_v0 = vld [vmem:[#allocation6 + $0x50] sm:$0xff]  ;;  %v5539_v35 = vpop.permute.xlu0 %1687 }
 0x398   : > { %v6380_v54 = vld [vmem:[#allocation90_spill] sm:$0xff] }
 0x399   : > { %v1872_v32 = vpop.permute.xlu1 %1871 }
 0x39a   : > { %v1877_v57 = vmul.f32 %v1872_v32, %v6343_v15  ;;  %v2185_v15 = vld [vmem:[#allocation6 + $0x38] sm:$0xff]  ;;  %v1223_v32 = vmul.f32 %v6380_v54, %v6379_v62 }
 0x39b   : > { %v1712_v20 = vpop.permute.xlu0 %1711 }
 0x39c   : > { %v1881_v12 = vmul.f32 %v1877_v57, %v6372_v38  ;;  %v2564_v57 = vsel %vm675_vm14, 1.0, %v6210_v27  ;;  %v1227_v38 = vmul.f32 %v5440_v28, %v1223_v32 }
 0x39d   : > { %v1255_v22 = vmul.f32 %v2564_v57, %v1251_v42 }
 0x39e   : > { %v1885_v9 = vadd.f32 %v1881_v12, %v1857_v8  ;;  %v1680_v14 = vpop.permute.xlu1 %1679  ;;  %v6382_v8 = vld [vmem:[#allocation35_spill] sm:$0xff]  ;;  %v6383_v12 = vld [vmem:[#allocation184_spill] sm:$0xff] }
 0x39f   : > { %vm672_vm2 = vcmp.lt.f32.partialorder %v4979_v55, %v6382_v8 }
 0x3a0   : > { %v2671_v37 = vpack.c.bf16 %v1885_v9, %v1884_v47  ;;  %v1694_v47 = vmul.f32 %v1680_v14, %v6383_v12  ;;  %v1258_v9 = vadd.f32 %v1254_v34, %v1226_v46  ;;  %vm676_vm0 = vmand %vm652_vm1, %vm672_vm2  ;;  %v6386_v14 = vld [vmem:[#allocation140_spill] sm:$0xff] }
 0x3a1   : > { %v2565_v42 = vsel %vm676_vm0, 1.0, %v6210_v27 }
 0x3a2   : > { %2672 = vmatpush3.bf16.msra.mxu0 %v2671_v37  ;;  %v1698_v49 = vmul.f32 %v1694_v47, %v5448_v50 }
 0x3a3   : > { %v1704_v23 = vpop.permute.xlu1 %1703 }
 0x3a4   : > { %v1718_v19 = vmul.f32 %v1704_v23, %v1230_v51  ;;  %v2100_v23 = vpop.permute.xlu0 %2099 }
 0x3a5   : > { %2304 = vmatmul.mubr.f32.vlgmr.msra.gmra.mrb[0].mxu0 %v2178_v18  ;;  %v1232_v18 = vsub.f32 %v4979_v55, %v6382_v8  ;;  %v6389_v55 = vld [vmem:[#allocation109_spill] sm:$0xff] }
 0x3a6   : > { %2308 = vmatprep.mubr.f32.mxu0 %v2182_v1  ;;  %v6384_v1 = vld [vmem:[#allocation61_spill] sm:$0xff]  ;;  %v1722_v28 = vmul.f32 %v1718_v19, %v1258_v9 }
 0x3a7   : > { %v1708_v25 = vpop.permute.xlu1 %1707  ;;  %vm673_vm3 = vcmp.lt.f32.partialorder %v5346_v52, %v6384_v1 }
 0x3a8   : > { %v1719_v37 = vmul.f32 %v1708_v25, %v1231_v61  ;;  %v6387_v25 = vld [vmem:[#allocation99_spill] sm:$0xff]  ;;  %vm677_vm5 = vmand %vm653_vm4, %vm673_vm3  ;;  %v1726_v54 = vadd.f32 %v1722_v28, %v1698_v49  ;;  %v2104_v50 = vpop.permute.xlu0 %2103 }
 0x3a9   : > { %2309 = vmatmul.mubr.f32.gmra.mrb[2].mxu0 %v2181_v13  ;;  %v1233_v13 = vsub.f32 %v5346_v52, %v6384_v1  ;;  %v1225_v3 = vmul.f32 %v6387_v25, %v6386_v14  ;;  %v2566_v32 = vsel %vm677_vm5, 1.0, %v6210_v27 }
 0x3aa   : > { %2313 = vmatprep.mubr.f32.mxu0 %v2185_v15  ;;  %v6385_v15 = vld [vmem:[#allocation190_spill] sm:$0xff] }
 0x3ab   : > { %v1253_v10 = vmul.f32 %v6389_v55, %v1233_v13  ;;  %v1229_v53 = vmul.f32 %v5491_v60, %v1225_v3  ;;  %v1696_v60 = vmul.f32 %v5539_v35, %v6366_v26 }
 0x3ac   : > { %v5537_v21 = vpop.permute.xlu1 %1691 }
 0x3ad   : > { %2314 = vmatmul.mubr.f32.gmra.mrb[4].mxu0 %v2184_v56  ;;  %v1695_v56 = vmul.f32 %v1684_v16, %v6385_v15  ;;  %v6390_v16 = vld [vmem:[#allocation144_spill] sm:$0xff]  ;;  %v1257_v19 = vmul.f32 %v2566_v32, %v1253_v10  ;;  %v2112_v15 = vmul.f32 %v2104_v50, %v6294_v44 }
 0x3ae   : > { %2318 = vmatprep.mubr.f32.mxu0 %v2188_v0  ;;  %v1259_v0 = vadd.f32 %v1255_v22, %v1227_v38  ;;  %v1224_v36 = vmul.f32 %v6391_v33, %v6390_v16  ;;  %v1720_v38 = vmul.f32 %v1712_v20, %v1232_v18 }
 0x3af   : > { %v1699_v52 = vmul.f32 %v1695_v56, %v5453_v31  ;;  %v1261_v47 = vadd.f32 %v1257_v19, %v1229_v53 }
 0x3b0   : > { %v1723_v45 = vmul.f32 %v1719_v37, %v1259_v0  ;;  %v1228_v8 = vmul.f32 %v5487_v40, %v1224_v36 }
 0x3b1   : > { %v1716_v30 = vpop.permute.xlu1 %1715  ;;  %2319 = vmatmul.mubr.f32.gmra.mrb[6].mxu0 %v2187_v29  ;;  %v6388_v29 = vld [vmem:[#allocation101_spill] sm:$0xff] }
 0x3b2   : > { %v1252_v39 = vmul.f32 %v6388_v29, %v1232_v18  ;;  %v1727_v34 = vadd.f32 %v1723_v45, %v1699_v52  ;;  %v1721_v31 = vmul.f32 %v1716_v30, %v1233_v13 }
 0x3b4   : > { %v1256_v46 = vmul.f32 %v2565_v42, %v1252_v39  ;;  %v1725_v20 = vmul.f32 %v1721_v31, %v1261_v47 }
 0x3b6   : > { %v2096_v48 = vpop.permute.xlu1 %2095  ;;  %v1260_v9 = vadd.f32 %v1256_v46, %v1228_v8 }
 0x3b7   : > { %v2110_v62 = vmul.f32 %v2096_v48, %v6392_v7 }
 0x3b8   : > { %v1724_v40 = vmul.f32 %v1720_v38, %v1260_v9 }
 0x3b9   : > { %v2114_v48 = vmul.f32 %v2110_v62, %v5458_v11  ;;  %v1700_v11 = vmul.f32 %v1696_v60, %v5510_v17 }
 0x3bb   : > { %v2120_v63 = vpop.permute.xlu1 %2119 }
 0x3bc   : > { %v2134_v41 = vmul.f32 %v2120_v63, %v1230_v51  ;;  %v2111_v51 = vmul.f32 %v2100_v23, %v6306_v5  ;;  %v1697_v5 = vmul.f32 %v5537_v21, %v6362_v2  ;;  %v2128_v23 = vpop.permute.xlu0 %2127  ;;  %v1728_v2 = vadd.f32 %v1724_v40, %v1700_v11 }
 0x3bd   : > { %v2116_v21 = vmul.f32 %v2112_v15, %v5524_v59 }
 0x3be   : > { %v2138_v57 = vmul.f32 %v2134_v41, %v1726_v54  ;;  %v2115_v27 = vmul.f32 %v2111_v51, %v5462_v43  ;;  %v2136_v43 = vmul.f32 %v2128_v23, %v1232_v18  ;;  %v1701_v56 = vmul.f32 %v1697_v5, %v5508_v58  ;;  %v2183_v58 = vld [vmem:[#allocation6 + $0x28] sm:$0xff]  ;;  %v2186_v18 = vld [vmem:[#allocation6 + $0x40] sm:$0xff] }
 0x3bf   : > { %v2124_v6 = vpop.permute.xlu1 %2123 }
 0x3c0   : > { %v2135_v22 = vmul.f32 %v2124_v6, %v1231_v61  ;;  %v2142_v61 = vadd.f32 %v2138_v57, %v2114_v48  ;;  %v1729_v28 = vadd.f32 %v1725_v20, %v1701_v56  ;;  %v2140_v14 = vmul.f32 %v2136_v43, %v1728_v2 }
 0x3c2   : > { %v2139_v12 = vmul.f32 %v2135_v22, %v1727_v34  ;;  %v2144_v29 = vadd.f32 %v2140_v14, %v2116_v21 }
 0x3c4   : > { %v2108_v37 = vpop.permute.xlu1 %2107  ;;  %v2143_v1 = vadd.f32 %v2139_v12, %v2115_v27 }
 0x3c5   : > { %v2113_v26 = vmul.f32 %v2108_v37, %v6337_v4  ;;  %v2189_v4 = vld [vmem:[#allocation6 + $0x58] sm:$0xff] }
 0x3c6   : > { %v2673_v30 = vpack.c.bf16 %v2143_v1, %v2142_v61 }
 0x3c7   : > { %v2117_v25 = vmul.f32 %v2113_v26, %v5519_v24 }
 0x3c8   : > { %2674 = vmatprep.subr.bf16.mxu1 %v2673_v30 }
 0x3c9   : > { %v2132_v35 = vpop.permute.xlu1 %2131  ;;  %2676 = vmatpush3.bf16.msra.mxu1 %v2673_v30 }
 0x3ca   : > { %v2137_v0 = vmul.f32 %v2132_v35, %v1233_v13 }
 0x3cc   : > { %v2141_v3 = vmul.f32 %v2137_v0, %v1729_v28 }
 0x3ce   : > { %v2145_v17 = vadd.f32 %v2141_v3, %v2117_v25 }
 0x3d0   : > { %v2677_v44 = vpack.c.bf16 %v2145_v17, %v2144_v29 }
 0x3d2   : > { %2678 = vmatprep.subr.bf16.mxu1 %v2677_v44 }
 0x3d3   : > { %2680 = vmatpush3.bf16.msra.mxu1 %v2677_v44 }
 0x3d6   : > { %2636 = vmatmul.mubr.msk.f32.vlgmr.msra.gmra.mrb[0].mxu1 %vm2226_vm6, %v2183_v58 }
 0x3d7   : > { %2638 = vmatprep.mubr.msk.f32.mxu1 %vm2226_vm6, %v2186_v18 }
 0x3da   : > { %2639 = vmatmul.mubr.msk.f32.gmra.mrb[2].mxu1 %vm2226_vm6, %v2189_v4 }
 0x478   : > { %v2607_v59 = vpop.f32.mrb[0].mxu0 }
 0x479   : > { %v2608_v13 = vpop.f32.mrb[1].mxu0 }
 0x47a   : > { %v2609_v39 = vadd.f32 %v2608_v13, %v2607_v59 }
 0x47c   : > { %v2610_v24 = vpop.f32.mrb[2].mxu0 }
 0x47d   : > { %v2611_v63 = vpop.f32.mrb[3].mxu0 }
 0x47e   : > { %v2612_v49 = vadd.f32 %v2611_v63, %v2610_v24 }
 0x480   : > { %v2613_v45 = vpop.f32.mrb[4].mxu0 }
 0x481   : > { %v2614_v41 = vpop.f32.mrb[5].mxu0 }
 0x482   : > { %v2615_v55 = vadd.f32 %v2614_v41, %v2613_v45 }
 0x484   : > { %v2616_v10 = vpop.f32.mrb[6].mxu0 }
 0x485   : > { %v2617_v16 = vpop.f32.mrb[7].mxu0 }
 0x486   : > { %v2618_v33 = vadd.f32 %v2617_v16, %v2616_v10 }
 0x4a9   : > { %v2637_v36 = vpop.f32.mrb[0].mxu1 }
 0x4aa   : > { %v2396_v42 = vadd.f32 %v2637_v36, %v2612_v49  ;;  %v2390_v52 = vpop.f32.mrb[1].mxu1 }
 0x4ab   : > { %v2391_v7 = vadd.f32 %v2609_v39, %v2390_v52 }
 0x4ac   : > { %2410 = vst [vmem:[%s229_s11 + $0x8] sm:$0xff] %v2396_v42 }
 0x4ad   : > { %2409 = vst [vmem:[%s229_s11] sm:$0xff] %v2391_v7  ;;  %v2640_v62 = vpop.f32.mrb[2].mxu1 }
 0x4ae   : > { %v2406_v54 = vadd.f32 %v2640_v62, %v2618_v33  ;;  %v2400_v32 = vpop.f32.mrb[3].mxu1 }
 0x4af   : > { %v2401_v53 = vadd.f32 %v2615_v55, %v2400_v32 }
 0x4b0   : > { %2412 = vst [vmem:[%s229_s11 + $0x18] sm:$0xff] %v2406_v54 }
 0x4b1   : > { %2411 = vst [vmem:[%s229_s11 + $0x10] sm:$0xff] %v2401_v53 }
 0x4b2   : > { %3037 = shalt.err (!%p3034_p11)
}
 0x4b3   : > { %s3038_s5 = scalar_lea.hbm %s5614_s7, 512  ;;  %s3042_s8 = scalar_lea.hbm %s5661_s4, 2048 }
 0x4b4   : > { %p3039_p13 = scmp.ne.s32.totalorder %s5614_s7, %s3038_s5  ;;  %p3043_p12 = scmp.lt.u32.totalorder %s5614_s7, %s5661_s4 }
 0x4b5   : > { %p3044_p4 = scmp.lt.u32.totalorder %s3042_s8, %s3038_s5  ;;  %p3046_p7 = scmp.lt.u32.totalorder %s3038_s5, %s5614_s7 }
 0x4b6   : > { %p3040_p2 = pnand %p3039_p13, %p6393_p9 }
 0x4b7   : > { %p3045_p0 = por %p3044_p4, %p3043_p12 }
 0x4b8   : > { %p3041_p6 = pneg %p3040_p2 }
 0x4b9   : > { %p3047_p10 = por %p3046_p7, %p3045_p0 }
 0x4bb   : > { %p3048_p1 = pnand %p3047_p10, %p3041_p6 }
 0x4bd   : > { %3051 = shalt.err (!%p3048_p1)
}
 0x4be   : > { %s3159_s11 = smov 128   ;;  %s3160_s25 = smov 512  }
 0x4bf   : > { %s3161_s26 = smov 8  }
 0x4c0   : > { %2687 = dma.vmem_to_hbm [thread:$0]  (%p6393_p9), %s5609_s14, 512, %s5614_s7, %s2414_s30, %s3159_s11, %s3160_s25, %s3161_s26  }
 0x4c1 PF: > { %p2704_p3 = scmp.ge.s32.totalorder %s3094_s18, 2  ;;  %s2441_s6 = sand.u32 1, %s3082_s15  }
 0x4c2   : > { %p6394_p8 = scmp.ne.s32.totalorder %s5862_s28, 0  ;;  %s2442_s19 = scalar_lea.sflag [#allocation5], %s2441_s6 }
 0x4c4   : > { %p2698_p5 = pnand %p2704_p3, %p6394_p8 }
 0x4c6   : > { %3077 = dma.done.wait (!%p2698_p5), %s2442_s19, 512  }
 0x4c7   : > { %3079 = vsyncadd (!%p2698_p5), %s2442_s19, 4294966784  ;;  %p18_p11 = scmp.ge.s32.totalorder %s3212_s21, 6   ;;  %s6395_s15 = smov %s3086_s16 }
 0x4c8   : > { %s6396_s16 = smov %s3090_s17  ;;  %s6397_s17 = smov %s3224_s24 }
 0x4c9   : > { %s6398_s18 = smov %s3212_s21  ;;  %20 = sbr.rel (!%p18_p11) target bundleno = 6 (0x6), region = 85 }
 0x4d0   :  { %2447 = vsyncpa [#allocation4], 1 }
 0x4d1   :  { %2449 = vsyncpa [#allocation4 + $0x1], 1 }
 0x4d2   :  { %2450 = vsyncpa [#allocation7], 1 }
 0x4d3   :  { %2451 = vsyncpa [#allocation5], 1 }
 0x4d4   :  { %2453 = vsyncpa [#allocation5 + $0x1], 1 }

</bundles_post_ra>
